<compile_context>
chip_gen: v6e
topology: v6e:2x2x1
jax: 0.10.0
libtpu: 0.0.40
codegen_flags: <defaults>
</compile_context>

<pallas_src>
import functools

import jax
import jax.numpy as jnp
from jax import lax
from jax.experimental import pallas as pl
from jax.experimental.pallas import tpu as pltpu


_SQRT_2_OVER_PI = 0.7978845608028654
_VMEM_BUDGET = 24 * 1024 * 1024   # per-step footprint target, safe for v7x's 64 MiB VMEM


def _gelu_tanh(x):
    # TODO(synk): PyTorch nn.GELU() is the exact erf GELU; we use the tanh
    # approximation (max abs err ~3e-4) since tanh lowers to the EUP on all TPU gens.
    return 0.5 * x * (1.0 + jnp.tanh(_SQRT_2_OVER_PI * (x + 0.044715 * (x * x * x))))


# ---------------------------------------------------------------------------
# Kernel 1: row-tiled linear  y = x @ W (+ b)   (QKV projection, out projection)
# Operands feed the MXU in their native dtype; accumulation in f32.
# ---------------------------------------------------------------------------
def _linear_bias_kernel(x_ref, w_ref, b_ref, o_ref):
    y = jnp.dot(x_ref[...], w_ref[...], preferred_element_type=jnp.float32)
    o_ref[...] = (y + b_ref[...].astype(jnp.float32)).astype(o_ref.dtype)


def _linear_nobias_kernel(x_ref, w_ref, o_ref):
    o_ref[...] = jnp.dot(x_ref[...], w_ref[...],
                         preferred_element_type=jnp.float32).astype(o_ref.dtype)


def _pick_row_tile(rows, din, dout, itemsize):
    for tm in (1024, 512, 256, 128, 64, 32, 16, 8):
        if rows % tm:
            continue
        foot = 2 * tm * (din + dout) * itemsize + 2 * din * dout * itemsize
        if foot <= _VMEM_BUDGET:
            return tm
    return rows  # single full-extent block is always legal


def _linear(x2d, w, b2d=None):
    rows, din = x2d.shape
    dout = w.shape[1]
    tm = _pick_row_tile(rows, din, dout, x2d.dtype.itemsize)
    in_specs = [pl.BlockSpec((tm, din), lambda i: (i, 0)),
                pl.BlockSpec((din, dout), lambda i: (0, 0))]
    operands = [x2d, w]
    kernel = _linear_nobias_kernel
    if b2d is not None:          # bias=False path (QKV) skips the useless DMA + add
        in_specs.append(pl.BlockSpec((1, dout), lambda i: (0, 0)))
        operands.append(b2d)
        kernel = _linear_bias_kernel
    return pl.pallas_call(
        kernel,
        out_shape=jax.ShapeDtypeStruct((rows, dout), x2d.dtype),
        grid_spec=pltpu.PrefetchScalarGridSpec(
            num_scalar_prefetch=0,
            grid=(rows // tm,),
            in_specs=in_specs,
            out_specs=pl.BlockSpec((tm, dout), lambda i: (i, 0)),
        ),
        compiler_params=pltpu.CompilerParams(dimension_semantics=("parallel",)),
    )(*operands)


# ---------------------------------------------------------------------------
# Kernel 2: fused rel-pos-bias-MLP + attention core.
# One grid step = one (batch, q-tile) pair, ALL heads.
# ---------------------------------------------------------------------------
def _attention_kernel(alpha_ref, w1_ref, b1_ref, w2_ref, b2_ref,
                      mask_ref, cq_ref, ckT_ref, qkv_ref,
                      o_ref, attn_ref, *,
                      nhead, head_dim, d_model, dims, n_feat, n_hidden,
                      scale, ns, tq):
    n_kv = ckT_ref.shape[-1]
    qs = pl.multiple_of(pl.program_id(1) * tq, tq)

    # ---- relative-position feature planes, fully lane-dense (tq, N), f32 ----
    cq = cq_ref[...].astype(jnp.float32)        # (tq, dims)   query coords
    ckT = ckT_ref[...].astype(jnp.float32)      # (dims, N)    key coords (transposed)
    planes = [cq[:, f:f + 1] - ckT[f:f + 1, :] for f in range(dims)]
    if dims > 1:
        sq = planes[0] * planes[0]
        for f in range(1, dims):
            sq = sq + planes[f] * planes[f]
        planes.append(jnp.sqrt(sq))             # L2-distance feature plane

    # ---- fused bias MLP: SMEM scalar weights x lane-dense planes (VPU + EUP) ----
    bias_planes = [None] * nhead
    for j in range(n_hidden):
        acc = planes[0] * w1_ref[0, j]
        for f in range(1, n_feat):
            acc = acc + planes[f] * w1_ref[f, j]
        hj = _gelu_tanh(acc + b1_ref[j])
        for h in range(nhead):
            t = hj * w2_ref[j, h]
            bias_planes[h] = t if bias_planes[h] is None else bias_planes[h] + t

    # ---- special-token zeroing: one broadcast mask, shared across heads ----
    if ns > 0:
        col_ok = lax.broadcasted_iota(jnp.int32, (1, n_kv), 1) >= ns
        row_ok = (qs + lax.broadcasted_iota(jnp.int32, (tq, 1), 0)) >= ns
        keep = jnp.logical_and(row_ok, col_ok)

    alpha = alpha_ref[0]
    pad = mask_ref[...] > 0.5                    # (1, N) key-padding mask, shared

    o_parts = []
    for h in range(nhead):
        bias_h = bias_planes[h] + b2_ref[h]
        if ns > 0:
            bias_h = jnp.where(keep, bias_h, 0.0)
        c0 = h * head_dim
        q_h = qkv_ref[pl.ds(qs, tq), c0:c0 + head_dim]                      # (tq, D)
        k_h = qkv_ref[:, d_model + c0:d_model + c0 + head_dim]              # (N,  D)
        v_h = qkv_ref[:, 2 * d_model + c0:2 * d_model + c0 + head_dim]      # (N,  D)
        s = lax.dot_general(q_h, k_h, (((1,), (1,)), ((), ())),
                            preferred_element_type=jnp.float32)             # (tq, N)
        logits = s * scale + alpha * bias_h
        # NOTE: a fully-masked key row gives a NaN softmax row, same as PyTorch.
        logits = jnp.where(pad, -jnp.inf, logits)
        m = jnp.max(logits, axis=-1, keepdims=True)
        e = jnp.exp(logits - m)
        l = jnp.sum(e, axis=-1, keepdims=True)
        p = e * pl.reciprocal(l, approx=False)   # one recip/row instead of N divides
        attn_ref[h, :, :] = p.astype(attn_ref.dtype)
        o_parts.append(jnp.dot(p.astype(v_h.dtype), v_h,
                               preferred_element_type=jnp.float32))
    # single lane-dense (tq, d_model) store, already in (B, N, d_model) layout
    o_ref[...] = jnp.concatenate(o_parts, axis=-1).astype(o_ref.dtype)


def _attn_footprint(N, tq, d_model, nhead, n_feat, itemsize):
    resident = 2 * N * 3 * d_model * itemsize            # fused QKV block (double-buffered)
    resident += 2 * (tq * 128 + 2 * 8 * N) * 4           # coords / coords^T / mask (padded)
    outs = 2 * (tq * d_model * itemsize + nhead * tq * N * 4)   # o + attn output blocks
    temps = (n_feat + nhead + 4) * tq * N * 4             # live lane-dense planes
    return resident + outs + temps


def _pick_q_tile(N, d_model, nhead, n_feat, itemsize):
    for tq in (512, 256, 128, 64, 32, 16, 8):
        if N % tq == 0 and _attn_footprint(N, tq, d_model, nhead, n_feat,
                                           itemsize) <= _VMEM_BUDGET:
            return tq
    return N


def _attention(qkv, coords, coordsT, maskf, alpha, w1, b1, w2, b2, *,
               nhead, head_dim, scale, ns):
    B, N, three_dm = qkv.shape
    d_model = three_dm // 3
    dims = coords.shape[-1]
    n_feat = dims + 1 if dims > 1 else dims
    n_hidden = w1.shape[1]
    isz = qkv.dtype.itemsize
    tq = _pick_q_tile(N, d_model, nhead, n_feat, isz)

    kernel = functools.partial(
        _attention_kernel, nhead=nhead, head_dim=head_dim, d_model=d_model,
        dims=dims, n_feat=n_feat, n_hidden=n_hidden, scale=scale, ns=ns, tq=tq)

    flops = (4 * B * nhead * N * N * head_dim                       # q@k^T and attn@v
             + 2 * B * N * N * n_hidden * (n_feat + nhead))         # fused bias MLP
    transcendentals = B * N * N * (nhead + n_hidden)                 # exp rows + tanh planes
    bytes_accessed = ((B * N * 3 * d_model + B * N * d_model) * isz
                      + 4 * B * nhead * N * N + 4 * B * N * (2 * dims + 1))

    est = _attn_footprint(N, tq, d_model, nhead, n_feat, isz)
    cp_kwargs = {}
    if est > 20 * 1024 * 1024:   # be explicit once tiles get big (v7x has 64 MiB VMEM)
        cp_kwargs["vmem_limit_bytes"] = int(min(est * 1.5, 100 * 1024 * 1024))

    def _smem():
        return pl.BlockSpec(memory_space=pltpu.MemorySpace.SMEM)

    return pl.pallas_call(
        kernel,
        out_shape=(
            jax.ShapeDtypeStruct((B, N, d_model), qkv.dtype),        # context, (B,N,dm) layout
            jax.ShapeDtypeStruct((B, nhead, N, N), jnp.float32),     # attention probabilities
        ),
        grid_spec=pltpu.PrefetchScalarGridSpec(
            num_scalar_prefetch=0,
            grid=(B, N // tq),
            in_specs=[
                _smem(),                                                      # alpha (1,)
                _smem(),                                                      # w1 (F, 4H)
                _smem(),                                                      # b1 (4H,)
                _smem(),                                                      # w2 (4H, H)
                _smem(),                                                      # b2 (H,)
                pl.BlockSpec((None, 1, N), lambda b, i: (b, 0, 0)),           # key-padding mask
                pl.BlockSpec((None, tq, dims), lambda b, i: (b, i, 0)),       # coords (q rows)
                pl.BlockSpec((None, dims, N), lambda b, i: (b, 0, 0)),        # coords^T (k cols)
                pl.BlockSpec((None, N, 3 * d_model), lambda b, i: (b, 0, 0)),  # fused QKV
            ],
            out_specs=[
                pl.BlockSpec((None, tq, d_model), lambda b, i: (b, i, 0)),
                pl.BlockSpec((None, nhead, tq, N), lambda b, i: (b, 0, i, 0)),
            ],
        ),
        compiler_params=pltpu.CompilerParams(
            dimension_semantics=("parallel", "parallel"), **cp_kwargs),
        cost_estimate=pl.CostEstimate(flops=int(flops),
                                      transcendentals=int(transcendentals),
                                      bytes_accessed=int(bytes_accessed)),
    )(alpha, w1, b1, w2, b2, maskf, coords, coordsT, qkv)


# ---------------------------------------------------------------------------
# Full forward (matches RelPosSelfAttention.forward; returns (out, attn)).
# ---------------------------------------------------------------------------
def rel_pos_self_attention(x, coords, params, key_padding_mask=None, *,
                           nhead, num_special_tokens=1):
    B, N, d_model = x.shape
    H = nhead
    D = d_model // H
    scale = float(D) ** -0.5

    # 1) Fused QKV projection (Linear, bias=False) -> (B, N, 3*d_model); no transposes.
    qkv = _linear(x.reshape(B * N, d_model), params["w_qkv"]).reshape(B, N, 3 * d_model)

    # 2) Coords in both orientations (tiny) so the kernel builds lane-dense planes.
    coords_f = coords.astype(jnp.float32)
    coordsT = jnp.swapaxes(coords_f, 1, 2)            # (B, dims, N)

    if key_padding_mask is None:
        maskf = jnp.zeros((B, 1, N), jnp.float32)
    else:
        maskf = key_padding_mask.reshape(B, 1, N).astype(jnp.float32)
    alpha = params["alpha"].reshape(1).astype(jnp.float32)

    # 3) Fused rel-pos-bias + attention kernel; context comes out in (B, N, d_model).
    out_bnd, attn = _attention(
        qkv, coords_f, coordsT, maskf, alpha,
        params["w1"].astype(jnp.float32), params["b1"].astype(jnp.float32),
        params["w2"].astype(jnp.float32), params["b2"].astype(jnp.float32),
        nhead=H, head_dim=D, scale=scale, ns=num_special_tokens)

    # 4) Output projection (input is a free reshape of the kernel output).
    out = _linear(out_bnd.reshape(B * N, d_model), params["w_out"],
                  params["b_out"].reshape(1, d_model)).reshape(B, N, d_model)
    return out, attn


# ---------------------------------------------------------------------------
# Pure-JAX reference (same math as the PyTorch module, tanh-GELU).
# ---------------------------------------------------------------------------
def _reference_forward(x, coords, params, key_padding_mask, nhead, ns):
    B, N, dm = x.shape
    H = nhead
    D = dm // H
    scale = float(D) ** -0.5
    qkv = (x @ params["w_qkv"]).reshape(B, N, 3, H, D)
    q = jnp.transpose(qkv[:, :, 0], (0, 2, 1, 3))
    k = jnp.transpose(qkv[:, :, 1], (0, 2, 1, 3))
    v = jnp.transpose(qkv[:, :, 2], (0, 2, 1, 3))
    dpos = coords[:, :, None, :] - coords[:, None, :, :]
    if dpos.shape[-1] > 1:
        dist = jnp.sqrt(jnp.sum(dpos * dpos, axis=-1, keepdims=True))
        dpos = jnp.concatenate([dpos, dist], axis=-1)
    hid = _gelu_tanh(dpos @ params["w1"] + params["b1"])
    bias = hid @ params["w2"] + params["b2"]                      # (B, N, N, H)
    bias = jnp.transpose(bias, (0, 3, 1, 2))
    if ns > 0:
        bias = bias.at[:, :, :ns, :].set(0.0)
        bias = bias.at[:, :, :, :ns].set(0.0)
    dots = jnp.einsum("bhid,bhjd->bhij", q, k) * scale
    logits = dots + params["alpha"] * bias
    if key_padding_mask is not None:
        logits = jnp.where(key_padding_mask[:, None, None, :], -jnp.inf, logits)
    attn = jax.nn.softmax(logits, axis=-1)
    out = jnp.einsum("bhij,bhjd->bhid", attn, v)
    out = jnp.transpose(out, (0, 2, 1, 3)).reshape(B, N, dm)
    out = out @ params["w_out"] + params["b_out"]
    return out, attn


if __name__ == "__main__":
    key = jax.random.PRNGKey(0)
    ks = jax.random.split(key, 10)

    B, N = 2, 8
    d_model, nhead, num_dims, ns = 32, 4, 3, 1
    F = num_dims + 1 if num_dims > 1 else num_dims

    x = jax.random.normal(ks[0], (B, N, d_model), jnp.float32)
    coords = jax.random.normal(ks[1], (B, N, num_dims), jnp.float32)
    params = {
        # weights stored in (in, out) orientation (== transposed torch Linear weights)
        "w_qkv": 0.15 * jax.random.normal(ks[2], (d_model, 3 * d_model), jnp.float32),
        "w_out": 0.15 * jax.random.normal(ks[3], (d_model, d_model), jnp.float32),
        "b_out": 0.05 * jax.random.normal(ks[4], (d_model,), jnp.float32),
        "w1": 0.3 * jax.random.normal(ks[5], (F, 4 * nhead), jnp.float32),
        "b1": 0.1 * jax.random.normal(ks[6], (4 * nhead,), jnp.float32),
        "w2": 0.3 * jax.random.normal(ks[7], (4 * nhead, nhead), jnp.float32),
        "b2": 0.1 * jax.random.normal(ks[8], (nhead,), jnp.float32),
        "alpha": jnp.array([0.5], jnp.float32),  # nonzero so the bias path is exercised
    }
    key_padding_mask = jnp.array([[False] * N, [False] * (N - 1) + [True]], dtype=bool)

    fwd = jax.jit(functools.partial(
        rel_pos_self_attention, nhead=nhead, num_special_tokens=ns))

    out, attn = fwd(x, coords, params, key_padding_mask)
    out = jax.block_until_ready(out)
    attn = jax.block_until_ready(attn)

    ref_out, ref_attn = _reference_forward(x, coords, params, key_padding_mask, nhead, ns)
    assert jnp.allclose(attn, ref_attn, atol=1e-4, rtol=1e-4), "attn mismatch"
    assert jnp.allclose(out, ref_out, atol=1e-4, rtol=1e-4), "out mismatch"

    # Also exercise the key_padding_mask=None path.
    out2, attn2 = fwd(x, coords, params, None)
    out2 = jax.block_until_ready(out2)
    ref_out2, ref_attn2 = _reference_forward(x, coords, params, None, nhead, ns)
    assert jnp.allclose(attn2, ref_attn2, atol=1e-4, rtol=1e-4), "attn mismatch (no mask)"
    assert jnp.allclose(out2, ref_out2, atol=1e-4, rtol=1e-4), "out mismatch (no mask)"

    print("KERNEL_OK")
</pallas_src>

<mosaic_0001>
module attributes {stable_mosaic.version = 11 : i64} {
  func.func @_linear_nobias_kernel(%arg0: i32, %arg1: memref<16x32xf32, #tpu.memory_space<vmem>>, %arg2: memref<32x96xf32, #tpu.memory_space<vmem>>, %arg3: memref<16x96xf32, #tpu.memory_space<vmem>>) attributes {dimension_semantics = [#tpu.dimension_semantics<parallel>], iteration_bounds = array<i64: 1>, scalar_prefetch = 0 : i64, scratch_operands = 0 : i64, tpu.core_type = #tpu.core_type<tc>, window_params = [{transform_indices = @transform_0, window_bounds = array<i64: 16, 32>}, {pipeline_mode = #tpu.pipeline_mode<synchronous>, transform_indices = @transform_1, window_bounds = array<i64: 32, 96>}, {transform_indices = @transform_2, window_bounds = array<i64: 16, 96>}]} {
    %c0 = arith.constant 0 : index
    %c0_0 = arith.constant 0 : index
    %0 = vector.load %arg1[%c0, %c0_0] : memref<16x32xf32, #tpu.memory_space<vmem>>, vector<16x32xf32>
    %c0_1 = arith.constant 0 : index
    %c0_2 = arith.constant 0 : index
    %1 = vector.load %arg2[%c0_1, %c0_2] : memref<32x96xf32, #tpu.memory_space<vmem>>, vector<32x96xf32>
    %cst = arith.constant dense<0.000000e+00> : vector<16x96xf32>
    %2 = tpu.matmul %0, %1, %cst {dimension_numbers = #tpu.dot_dimension_numbers<[1], [0], [0], [1], [0, 0, 1, 1], [], []>} : vector<16x32xf32>, vector<32x96xf32>, vector<16x96xf32> -> vector<16x96xf32>
    %c0_3 = arith.constant 0 : index
    %c0_4 = arith.constant 0 : index
    %3 = vector.load %arg3[%c0_3, %c0_4] : memref<16x96xf32, #tpu.memory_space<vmem>>, vector<16x96xf32>
    tpu.vector_store %arg3[%c0_3, %c0_4], %2 {strides = array<i32>} : memref<16x96xf32, #tpu.memory_space<vmem>>, vector<16x96xf32>,
    return
  }
  func.func @transform_0(%arg0: i32) -> (i32, i32) {
    %c0_i32 = arith.constant 0 : i32
    %c0_i32_0 = arith.constant 0 : i32
    return %arg0, %c0_i32 : i32, i32
  }
  func.func @transform_1(%arg0: i32) -> (i32, i32) {
    %c0_i32 = arith.constant 0 : i32
    %c0_i32_0 = arith.constant 0 : i32
    %c0_i32_1 = arith.constant 0 : i32
    return %c0_i32, %c0_i32_0 : i32, i32
  }
  func.func @transform_2(%arg0: i32) -> (i32, i32) {
    %c0_i32 = arith.constant 0 : i32
    %c0_i32_0 = arith.constant 0 : i32
    return %arg0, %c0_i32 : i32, i32
  }
}

module attributes {stable_mosaic.version = 11 : i64} {
  func.func @_linear_bias_kernel(%arg0: i32, %arg1: memref<16x32xf32, #tpu.memory_space<vmem>>, %arg2: memref<32x32xf32, #tpu.memory_space<vmem>>, %arg3: memref<1x32xf32, #tpu.memory_space<vmem>>, %arg4: memref<16x32xf32, #tpu.memory_space<vmem>>) attributes {dimension_semantics = [#tpu.dimension_semantics<parallel>], iteration_bounds = array<i64: 1>, scalar_prefetch = 0 : i64, scratch_operands = 0 : i64, tpu.core_type = #tpu.core_type<tc>, window_params = [{transform_indices = @transform_0, window_bounds = array<i64: 16, 32>}, {pipeline_mode = #tpu.pipeline_mode<synchronous>, transform_indices = @transform_1, window_bounds = array<i64: 32, 32>}, {pipeline_mode = #tpu.pipeline_mode<synchronous>, transform_indices = @transform_2, window_bounds = array<i64: 1, 32>}, {transform_indices = @transform_3, window_bounds = array<i64: 16, 32>}]} {
    %c0 = arith.constant 0 : index
    %c0_0 = arith.constant 0 : index
    %0 = vector.load %arg1[%c0, %c0_0] : memref<16x32xf32, #tpu.memory_space<vmem>>, vector<16x32xf32>
    %c0_1 = arith.constant 0 : index
    %c0_2 = arith.constant 0 : index
    %1 = vector.load %arg2[%c0_1, %c0_2] : memref<32x32xf32, #tpu.memory_space<vmem>>, vector<32x32xf32>
    %cst = arith.constant dense<0.000000e+00> : vector<16x32xf32>
    %2 = tpu.matmul %0, %1, %cst {dimension_numbers = #tpu.dot_dimension_numbers<[1], [0], [0], [1], [0, 0, 1, 1], [], []>} : vector<16x32xf32>, vector<32x32xf32>, vector<16x32xf32> -> vector<16x32xf32>
    %c0_3 = arith.constant 0 : index
    %c0_4 = arith.constant 0 : index
    %3 = vector.load %arg3[%c0_3, %c0_4] : memref<1x32xf32, #tpu.memory_space<vmem>>, vector<1x32xf32>
    %4 = vector.broadcast %3 : vector<1x32xf32> to vector<16x32xf32>
    %5 = arith.addf %2, %4 : vector<16x32xf32>
    %c0_5 = arith.constant 0 : index
    %c0_6 = arith.constant 0 : index
    %6 = vector.load %arg4[%c0_5, %c0_6] : memref<16x32xf32, #tpu.memory_space<vmem>>, vector<16x32xf32>
    tpu.vector_store %arg4[%c0_5, %c0_6], %5 {strides = array<i32>} : memref<16x32xf32, #tpu.memory_space<vmem>>, vector<16x32xf32>,
    return
  }
  func.func @transform_0(%arg0: i32) -> (i32, i32) {
    %c0_i32 = arith.constant 0 : i32
    %c0_i32_0 = arith.constant 0 : i32
    return %arg0, %c0_i32 : i32, i32
  }
  func.func @transform_1(%arg0: i32) -> (i32, i32) {
    %c0_i32 = arith.constant 0 : i32
    %c0_i32_0 = arith.constant 0 : i32
    %c0_i32_1 = arith.constant 0 : i32
    return %c0_i32, %c0_i32_0 : i32, i32
  }
  func.func @transform_2(%arg0: i32) -> (i32, i32) {
    %c0_i32 = arith.constant 0 : i32
    %c0_i32_0 = arith.constant 0 : i32
    %c0_i32_1 = arith.constant 0 : i32
    return %c0_i32, %c0_i32_0 : i32, i32
  }
  func.func @transform_3(%arg0: i32) -> (i32, i32) {
    %c0_i32 = arith.constant 0 : i32
    %c0_i32_0 = arith.constant 0 : i32
    return %arg0, %c0_i32 : i32, i32
  }
}

module attributes {stable_mosaic.version = 11 : i64} {
  func.func @_attention_kernel(%arg0: i32, %arg1: i32, %arg2: memref<1xf32, #tpu.memory_space<smem>>, %arg3: memref<4x16xf32, #tpu.memory_space<smem>>, %arg4: memref<16xf32, #tpu.memory_space<smem>>, %arg5: memref<16x4xf32, #tpu.memory_space<smem>>, %arg6: memref<4xf32, #tpu.memory_space<smem>>, %arg7: memref<1x1x8xf32, #tpu.memory_space<vmem>>, %arg8: memref<1x8x3xf32, #tpu.memory_space<vmem>>, %arg9: memref<1x3x8xf32, #tpu.memory_space<vmem>>, %arg10: memref<1x8x96xf32, #tpu.memory_space<vmem>>, %arg11: memref<1x8x32xf32, #tpu.memory_space<vmem>>, %arg12: memref<1x4x8x8xf32, #tpu.memory_space<vmem>>) attributes {dimension_semantics = [#tpu.dimension_semantics<parallel>, #tpu.dimension_semantics<parallel>], iteration_bounds = array<i64: 2, 1>, scalar_prefetch = 0 : i64, scratch_operands = 0 : i64, tpu.core_type = #tpu.core_type<tc>, window_params = [{transform_indices = @transform_0, window_bounds = array<i64: 1>}, {transform_indices = @transform_1, window_bounds = array<i64: 4, 16>}, {transform_indices = @transform_2, window_bounds = array<i64: 16>}, {transform_indices = @transform_3, window_bounds = array<i64: 16, 4>}, {transform_indices = @transform_4, window_bounds = array<i64: 4>}, {transform_indices = @transform_5, window_bounds = array<i64: 1, 1, 8>}, {transform_indices = @transform_6, window_bounds = array<i64: 1, 8, 3>}, {transform_indices = @transform_7, window_bounds = array<i64: 1, 3, 8>}, {transform_indices = @transform_8, window_bounds = array<i64: 1, 8, 96>}, {transform_indices = @transform_9, window_bounds = array<i64: 1, 8, 32>}, {transform_indices = @transform_10, window_bounds = array<i64: 1, 4, 8, 8>}]} {
    %c8_i32 = arith.constant 8 : i32
    %0 = arith.muli %arg1, %c8_i32 : i32
    %1 = tpu.assume_multiple %0, 8 : i32
    %c0 = arith.constant 0 : index
    %c0_0 = arith.constant 0 : index
    %c0_1 = arith.constant 0 : index
    %2 = vector.load %arg8[%c0, %c0_0, %c0_1] : memref<1x8x3xf32, #tpu.memory_space<vmem>>, vector<1x8x3xf32>
    %3 = vector.shape_cast %2 : vector<1x8x3xf32> to vector<8x3xf32>
    %c0_2 = arith.constant 0 : index
    %c0_3 = arith.constant 0 : index
    %c0_4 = arith.constant 0 : index
    %4 = vector.load %arg9[%c0_2, %c0_3, %c0_4] : memref<1x3x8xf32, #tpu.memory_space<vmem>>, vector<1x3x8xf32>
    %5 = vector.shape_cast %4 : vector<1x3x8xf32> to vector<3x8xf32>
    %6 = vector.extract_strided_slice %3 {offsets = [0, 0], sizes = [8, 1], strides = [1, 1]} : vector<8x3xf32> to vector<8x1xf32>
    %7 = vector.extract_strided_slice %5 {offsets = [0, 0], sizes = [1, 8], strides = [1, 1]} : vector<3x8xf32> to vector<1x8xf32>
    %8 = vector.broadcast %6 : vector<8x1xf32> to vector<8x8xf32>
    %9 = vector.broadcast %7 : vector<1x8xf32> to vector<8x8xf32>
    %10 = arith.subf %8, %9 : vector<8x8xf32>
    %11 = vector.extract_strided_slice %3 {offsets = [0, 1], sizes = [8, 1], strides = [1, 1]} : vector<8x3xf32> to vector<8x1xf32>
    %12 = vector.extract_strided_slice %5 {offsets = [1, 0], sizes = [1, 8], strides = [1, 1]} : vector<3x8xf32> to vector<1x8xf32>
    %13 = vector.broadcast %11 : vector<8x1xf32> to vector<8x8xf32>
    %14 = vector.broadcast %12 : vector<1x8xf32> to vector<8x8xf32>
    %15 = arith.subf %13, %14 : vector<8x8xf32>
    %16 = vector.extract_strided_slice %3 {offsets = [0, 2], sizes = [8, 1], strides = [1, 1]} : vector<8x3xf32> to vector<8x1xf32>
    %17 = vector.extract_strided_slice %5 {offsets = [2, 0], sizes = [1, 8], strides = [1, 1]} : vector<3x8xf32> to vector<1x8xf32>
    %18 = vector.broadcast %16 : vector<8x1xf32> to vector<8x8xf32>
    %19 = vector.broadcast %17 : vector<1x8xf32> to vector<8x8xf32>
    %20 = arith.subf %18, %19 : vector<8x8xf32>
    %21 = arith.mulf %10, %10 : vector<8x8xf32>
    %22 = arith.mulf %15, %15 : vector<8x8xf32>
    %23 = arith.addf %21, %22 : vector<8x8xf32>
    %24 = arith.mulf %20, %20 : vector<8x8xf32>
    %25 = arith.addf %23, %24 : vector<8x8xf32>
    %26 = math.sqrt %25 : vector<8x8xf32>
    %c0_5 = arith.constant 0 : index
    %c0_6 = arith.constant 0 : index
    %27 = memref.load %arg3[%c0_5, %c0_6] : memref<4x16xf32, #tpu.memory_space<smem>>
    %28 = vector.broadcast %27 : f32 to vector<8x8xf32>
    %29 = arith.mulf %10, %28 : vector<8x8xf32>
    %c1 = arith.constant 1 : index
    %c0_7 = arith.constant 0 : index
    %30 = memref.load %arg3[%c1, %c0_7] : memref<4x16xf32, #tpu.memory_space<smem>>
    %31 = vector.broadcast %30 : f32 to vector<8x8xf32>
    %32 = arith.mulf %15, %31 : vector<8x8xf32>
    %33 = arith.addf %29, %32 : vector<8x8xf32>
    %c2 = arith.constant 2 : index
    %c0_8 = arith.constant 0 : index
    %34 = memref.load %arg3[%c2, %c0_8] : memref<4x16xf32, #tpu.memory_space<smem>>
    %35 = vector.broadcast %34 : f32 to vector<8x8xf32>
    %36 = arith.mulf %20, %35 : vector<8x8xf32>
    %37 = arith.addf %33, %36 : vector<8x8xf32>
    %c3 = arith.constant 3 : index
    %c0_9 = arith.constant 0 : index
    %38 = memref.load %arg3[%c3, %c0_9] : memref<4x16xf32, #tpu.memory_space<smem>>
    %39 = vector.broadcast %38 : f32 to vector<8x8xf32>
    %40 = arith.mulf %26, %39 : vector<8x8xf32>
    %41 = arith.addf %37, %40 : vector<8x8xf32>
    %c0_10 = arith.constant 0 : index
    %42 = memref.load %arg4[%c0_10] : memref<16xf32, #tpu.memory_space<smem>>
    %43 = vector.broadcast %42 : f32 to vector<8x8xf32>
    %44 = arith.addf %41, %43 : vector<8x8xf32>
    %cst = arith.constant 5.000000e-01 : f32
    %45 = vector.broadcast %cst : f32 to vector<8x8xf32>
    %46 = arith.mulf %45, %44 : vector<8x8xf32>
    %47 = arith.mulf %44, %44 : vector<8x8xf32>
    %48 = arith.mulf %47, %44 : vector<8x8xf32>
    %cst_11 = arith.constant 4.471500e-02 : f32
    %49 = vector.broadcast %cst_11 : f32 to vector<8x8xf32>
    %50 = arith.mulf %49, %48 : vector<8x8xf32>
    %51 = arith.addf %44, %50 : vector<8x8xf32>
    %cst_12 = arith.constant 0.797884583 : f32
    %52 = vector.broadcast %cst_12 : f32 to vector<8x8xf32>
    %53 = arith.mulf %52, %51 : vector<8x8xf32>
    %54 = math.tanh %53 : vector<8x8xf32>
    %cst_13 = arith.constant 1.000000e+00 : f32
    %55 = vector.broadcast %cst_13 : f32 to vector<8x8xf32>
    %56 = arith.addf %55, %54 : vector<8x8xf32>
    %57 = arith.mulf %46, %56 : vector<8x8xf32>
    %c0_14 = arith.constant 0 : index
    %c0_15 = arith.constant 0 : index
    %58 = memref.load %arg5[%c0_14, %c0_15] : memref<16x4xf32, #tpu.memory_space<smem>>
    %59 = vector.broadcast %58 : f32 to vector<8x8xf32>
    %60 = arith.mulf %57, %59 : vector<8x8xf32>
    %c0_16 = arith.constant 0 : index
    %c1_17 = arith.constant 1 : index
    %61 = memref.load %arg5[%c0_16, %c1_17] : memref<16x4xf32, #tpu.memory_space<smem>>
    %62 = vector.broadcast %61 : f32 to vector<8x8xf32>
    %63 = arith.mulf %57, %62 : vector<8x8xf32>
    %c0_18 = arith.constant 0 : index
    %c2_19 = arith.constant 2 : index
    %64 = memref.load %arg5[%c0_18, %c2_19] : memref<16x4xf32, #tpu.memory_space<smem>>
    %65 = vector.broadcast %64 : f32 to vector<8x8xf32>
    %66 = arith.mulf %57, %65 : vector<8x8xf32>
    %c0_20 = arith.constant 0 : index
    %c3_21 = arith.constant 3 : index
    %67 = memref.load %arg5[%c0_20, %c3_21] : memref<16x4xf32, #tpu.memory_space<smem>>
    %68 = vector.broadcast %67 : f32 to vector<8x8xf32>
    %69 = arith.mulf %57, %68 : vector<8x8xf32>
    %c0_22 = arith.constant 0 : index
    %c1_23 = arith.constant 1 : index
    %70 = memref.load %arg3[%c0_22, %c1_23] : memref<4x16xf32, #tpu.memory_space<smem>>
    %71 = vector.broadcast %70 : f32 to vector<8x8xf32>
    %72 = arith.mulf %10, %71 : vector<8x8xf32>
    %c1_24 = arith.constant 1 : index
    %c1_25 = arith.constant 1 : index
    %73 = memref.load %arg3[%c1_24, %c1_25] : memref<4x16xf32, #tpu.memory_space<smem>>
    %74 = vector.broadcast %73 : f32 to vector<8x8xf32>
    %75 = arith.mulf %15, %74 : vector<8x8xf32>
    %76 = arith.addf %72, %75 : vector<8x8xf32>
    %c2_26 = arith.constant 2 : index
    %c1_27 = arith.constant 1 : index
    %77 = memref.load %arg3[%c2_26, %c1_27] : memref<4x16xf32, #tpu.memory_space<smem>>
    %78 = vector.broadcast %77 : f32 to vector<8x8xf32>
    %79 = arith.mulf %20, %78 : vector<8x8xf32>
    %80 = arith.addf %76, %79 : vector<8x8xf32>
    %c3_28 = arith.constant 3 : index
    %c1_29 = arith.constant 1 : index
    %81 = memref.load %arg3[%c3_28, %c1_29] : memref<4x16xf32, #tpu.memory_space<smem>>
    %82 = vector.broadcast %81 : f32 to vector<8x8xf32>
    %83 = arith.mulf %26, %82 : vector<8x8xf32>
    %84 = arith.addf %80, %83 : vector<8x8xf32>
    %c1_30 = arith.constant 1 : index
    %85 = memref.load %arg4[%c1_30] : memref<16xf32, #tpu.memory_space<smem>>
    %86 = vector.broadcast %85 : f32 to vector<8x8xf32>
    %87 = arith.addf %84, %86 : vector<8x8xf32>
    %cst_31 = arith.constant 5.000000e-01 : f32
    %88 = vector.broadcast %cst_31 : f32 to vector<8x8xf32>
    %89 = arith.mulf %88, %87 : vector<8x8xf32>
    %90 = arith.mulf %87, %87 : vector<8x8xf32>
    %91 = arith.mulf %90, %87 : vector<8x8xf32>
    %cst_32 = arith.constant 4.471500e-02 : f32
    %92 = vector.broadcast %cst_32 : f32 to vector<8x8xf32>
    %93 = arith.mulf %92, %91 : vector<8x8xf32>
    %94 = arith.addf %87, %93 : vector<8x8xf32>
    %cst_33 = arith.constant 0.797884583 : f32
    %95 = vector.broadcast %cst_33 : f32 to vector<8x8xf32>
    %96 = arith.mulf %95, %94 : vector<8x8xf32>
    %97 = math.tanh %96 : vector<8x8xf32>
    %cst_34 = arith.constant 1.000000e+00 : f32
    %98 = vector.broadcast %cst_34 : f32 to vector<8x8xf32>
    %99 = arith.addf %98, %97 : vector<8x8xf32>
    %100 = arith.mulf %89, %99 : vector<8x8xf32>
    %c1_35 = arith.constant 1 : index
    %c0_36 = arith.constant 0 : index
    %101 = memref.load %arg5[%c1_35, %c0_36] : memref<16x4xf32, #tpu.memory_space<smem>>
    %102 = vector.broadcast %101 : f32 to vector<8x8xf32>
    %103 = arith.mulf %100, %102 : vector<8x8xf32>
    %104 = arith.addf %60, %103 : vector<8x8xf32>
    %c1_37 = arith.constant 1 : index
    %c1_38 = arith.constant 1 : index
    %105 = memref.load %arg5[%c1_37, %c1_38] : memref<16x4xf32, #tpu.memory_space<smem>>
    %106 = vector.broadcast %105 : f32 to vector<8x8xf32>
    %107 = arith.mulf %100, %106 : vector<8x8xf32>
    %108 = arith.addf %63, %107 : vector<8x8xf32>
    %c1_39 = arith.constant 1 : index
    %c2_40 = arith.constant 2 : index
    %109 = memref.load %arg5[%c1_39, %c2_40] : memref<16x4xf32, #tpu.memory_space<smem>>
    %110 = vector.broadcast %109 : f32 to vector<8x8xf32>
    %111 = arith.mulf %100, %110 : vector<8x8xf32>
    %112 = arith.addf %66, %111 : vector<8x8xf32>
    %c1_41 = arith.constant 1 : index
    %c3_42 = arith.constant 3 : index
    %113 = memref.load %arg5[%c1_41, %c3_42] : memref<16x4xf32, #tpu.memory_space<smem>>
    %114 = vector.broadcast %113 : f32 to vector<8x8xf32>
    %115 = arith.mulf %100, %114 : vector<8x8xf32>
    %116 = arith.addf %69, %115 : vector<8x8xf32>
    %c0_43 = arith.constant 0 : index
    %c2_44 = arith.constant 2 : index
    %117 = memref.load %arg3[%c0_43, %c2_44] : memref<4x16xf32, #tpu.memory_space<smem>>
    %118 = vector.broadcast %117 : f32 to vector<8x8xf32>
    %119 = arith.mulf %10, %118 : vector<8x8xf32>
    %c1_45 = arith.constant 1 : index
    %c2_46 = arith.constant 2 : index
    %120 = memref.load %arg3[%c1_45, %c2_46] : memref<4x16xf32, #tpu.memory_space<smem>>
    %121 = vector.broadcast %120 : f32 to vector<8x8xf32>
    %122 = arith.mulf %15, %121 : vector<8x8xf32>
    %123 = arith.addf %119, %122 : vector<8x8xf32>
    %c2_47 = arith.constant 2 : index
    %c2_48 = arith.constant 2 : index
    %124 = memref.load %arg3[%c2_47, %c2_48] : memref<4x16xf32, #tpu.memory_space<smem>>
    %125 = vector.broadcast %124 : f32 to vector<8x8xf32>
    %126 = arith.mulf %20, %125 : vector<8x8xf32>
    %127 = arith.addf %123, %126 : vector<8x8xf32>
    %c3_49 = arith.constant 3 : index
    %c2_50 = arith.constant 2 : index
    %128 = memref.load %arg3[%c3_49, %c2_50] : memref<4x16xf32, #tpu.memory_space<smem>>
    %129 = vector.broadcast %128 : f32 to vector<8x8xf32>
    %130 = arith.mulf %26, %129 : vector<8x8xf32>
    %131 = arith.addf %127, %130 : vector<8x8xf32>
    %c2_51 = arith.constant 2 : index
    %132 = memref.load %arg4[%c2_51] : memref<16xf32, #tpu.memory_space<smem>>
    %133 = vector.broadcast %132 : f32 to vector<8x8xf32>
    %134 = arith.addf %131, %133 : vector<8x8xf32>
    %cst_52 = arith.constant 5.000000e-01 : f32
    %135 = vector.broadcast %cst_52 : f32 to vector<8x8xf32>
    %136 = arith.mulf %135, %134 : vector<8x8xf32>
    %137 = arith.mulf %134, %134 : vector<8x8xf32>
    %138 = arith.mulf %137, %134 : vector<8x8xf32>
    %cst_53 = arith.constant 4.471500e-02 : f32
    %139 = vector.broadcast %cst_53 : f32 to vector<8x8xf32>
    %140 = arith.mulf %139, %138 : vector<8x8xf32>
    %141 = arith.addf %134, %140 : vector<8x8xf32>
    %cst_54 = arith.constant 0.797884583 : f32
    %142 = vector.broadcast %cst_54 : f32 to vector<8x8xf32>
    %143 = arith.mulf %142, %141 : vector<8x8xf32>
    %144 = math.tanh %143 : vector<8x8xf32>
    %cst_55 = arith.constant 1.000000e+00 : f32
    %145 = vector.broadcast %cst_55 : f32 to vector<8x8xf32>
    %146 = arith.addf %145, %144 : vector<8x8xf32>
    %147 = arith.mulf %136, %146 : vector<8x8xf32>
    %c2_56 = arith.constant 2 : index
    %c0_57 = arith.constant 0 : index
    %148 = memref.load %arg5[%c2_56, %c0_57] : memref<16x4xf32, #tpu.memory_space<smem>>
    %149 = vector.broadcast %148 : f32 to vector<8x8xf32>
    %150 = arith.mulf %147, %149 : vector<8x8xf32>
    %151 = arith.addf %104, %150 : vector<8x8xf32>
    %c2_58 = arith.constant 2 : index
    %c1_59 = arith.constant 1 : index
    %152 = memref.load %arg5[%c2_58, %c1_59] : memref<16x4xf32, #tpu.memory_space<smem>>
    %153 = vector.broadcast %152 : f32 to vector<8x8xf32>
    %154 = arith.mulf %147, %153 : vector<8x8xf32>
    %155 = arith.addf %108, %154 : vector<8x8xf32>
    %c2_60 = arith.constant 2 : index
    %c2_61 = arith.constant 2 : index
    %156 = memref.load %arg5[%c2_60, %c2_61] : memref<16x4xf32, #tpu.memory_space<smem>>
    %157 = vector.broadcast %156 : f32 to vector<8x8xf32>
    %158 = arith.mulf %147, %157 : vector<8x8xf32>
    %159 = arith.addf %112, %158 : vector<8x8xf32>
    %c2_62 = arith.constant 2 : index
    %c3_63 = arith.constant 3 : index
    %160 = memref.load %arg5[%c2_62, %c3_63] : memref<16x4xf32, #tpu.memory_space<smem>>
    %161 = vector.broadcast %160 : f32 to vector<8x8xf32>
    %162 = arith.mulf %147, %161 : vector<8x8xf32>
    %163 = arith.addf %116, %162 : vector<8x8xf32>
    %c0_64 = arith.constant 0 : index
    %c3_65 = arith.constant 3 : index
    %164 = memref.load %arg3[%c0_64, %c3_65] : memref<4x16xf32, #tpu.memory_space<smem>>
    %165 = vector.broadcast %164 : f32 to vector<8x8xf32>
    %166 = arith.mulf %10, %165 : vector<8x8xf32>
    %c1_66 = arith.constant 1 : index
    %c3_67 = arith.constant 3 : index
    %167 = memref.load %arg3[%c1_66, %c3_67] : memref<4x16xf32, #tpu.memory_space<smem>>
    %168 = vector.broadcast %167 : f32 to vector<8x8xf32>
    %169 = arith.mulf %15, %168 : vector<8x8xf32>
    %170 = arith.addf %166, %169 : vector<8x8xf32>
    %c2_68 = arith.constant 2 : index
    %c3_69 = arith.constant 3 : index
    %171 = memref.load %arg3[%c2_68, %c3_69] : memref<4x16xf32, #tpu.memory_space<smem>>
    %172 = vector.broadcast %171 : f32 to vector<8x8xf32>
    %173 = arith.mulf %20, %172 : vector<8x8xf32>
    %174 = arith.addf %170, %173 : vector<8x8xf32>
    %c3_70 = arith.constant 3 : index
    %c3_71 = arith.constant 3 : index
    %175 = memref.load %arg3[%c3_70, %c3_71] : memref<4x16xf32, #tpu.memory_space<smem>>
    %176 = vector.broadcast %175 : f32 to vector<8x8xf32>
    %177 = arith.mulf %26, %176 : vector<8x8xf32>
    %178 = arith.addf %174, %177 : vector<8x8xf32>
    %c3_72 = arith.constant 3 : index
    %179 = memref.load %arg4[%c3_72] : memref<16xf32, #tpu.memory_space<smem>>
    %180 = vector.broadcast %179 : f32 to vector<8x8xf32>
    %181 = arith.addf %178, %180 : vector<8x8xf32>
    %cst_73 = arith.constant 5.000000e-01 : f32
    %182 = vector.broadcast %cst_73 : f32 to vector<8x8xf32>
    %183 = arith.mulf %182, %181 : vector<8x8xf32>
    %184 = arith.mulf %181, %181 : vector<8x8xf32>
    %185 = arith.mulf %184, %181 : vector<8x8xf32>
    %cst_74 = arith.constant 4.471500e-02 : f32
    %186 = vector.broadcast %cst_74 : f32 to vector<8x8xf32>
    %187 = arith.mulf %186, %185 : vector<8x8xf32>
    %188 = arith.addf %181, %187 : vector<8x8xf32>
    %cst_75 = arith.constant 0.797884583 : f32
    %189 = vector.broadcast %cst_75 : f32 to vector<8x8xf32>
    %190 = arith.mulf %189, %188 : vector<8x8xf32>
    %191 = math.tanh %190 : vector<8x8xf32>
    %cst_76 = arith.constant 1.000000e+00 : f32
    %192 = vector.broadcast %cst_76 : f32 to vector<8x8xf32>
    %193 = arith.addf %192, %191 : vector<8x8xf32>
    %194 = arith.mulf %183, %193 : vector<8x8xf32>
    %c3_77 = arith.constant 3 : index
    %c0_78 = arith.constant 0 : index
    %195 = memref.load %arg5[%c3_77, %c0_78] : memref<16x4xf32, #tpu.memory_space<smem>>
    %196 = vector.broadcast %195 : f32 to vector<8x8xf32>
    %197 = arith.mulf %194, %196 : vector<8x8xf32>
    %198 = arith.addf %151, %197 : vector<8x8xf32>
    %c3_79 = arith.constant 3 : index
    %c1_80 = arith.constant 1 : index
    %199 = memref.load %arg5[%c3_79, %c1_80] : memref<16x4xf32, #tpu.memory_space<smem>>
    %200 = vector.broadcast %199 : f32 to vector<8x8xf32>
    %201 = arith.mulf %194, %200 : vector<8x8xf32>
    %202 = arith.addf %155, %201 : vector<8x8xf32>
    %c3_81 = arith.constant 3 : index
    %c2_82 = arith.constant 2 : index
    %203 = memref.load %arg5[%c3_81, %c2_82] : memref<16x4xf32, #tpu.memory_space<smem>>
    %204 = vector.broadcast %203 : f32 to vector<8x8xf32>
    %205 = arith.mulf %194, %204 : vector<8x8xf32>
    %206 = arith.addf %159, %205 : vector<8x8xf32>
    %c3_83 = arith.constant 3 : index
    %c3_84 = arith.constant 3 : index
    %207 = memref.load %arg5[%c3_83, %c3_84] : memref<16x4xf32, #tpu.memory_space<smem>>
    %208 = vector.broadcast %207 : f32 to vector<8x8xf32>
    %209 = arith.mulf %194, %208 : vector<8x8xf32>
    %210 = arith.addf %163, %209 : vector<8x8xf32>
    %c0_85 = arith.constant 0 : index
    %c4 = arith.constant 4 : index
    %211 = memref.load %arg3[%c0_85, %c4] : memref<4x16xf32, #tpu.memory_space<smem>>
    %212 = vector.broadcast %211 : f32 to vector<8x8xf32>
    %213 = arith.mulf %10, %212 : vector<8x8xf32>
    %c1_86 = arith.constant 1 : index
    %c4_87 = arith.constant 4 : index
    %214 = memref.load %arg3[%c1_86, %c4_87] : memref<4x16xf32, #tpu.memory_space<smem>>
    %215 = vector.broadcast %214 : f32 to vector<8x8xf32>
    %216 = arith.mulf %15, %215 : vector<8x8xf32>
    %217 = arith.addf %213, %216 : vector<8x8xf32>
    %c2_88 = arith.constant 2 : index
    %c4_89 = arith.constant 4 : index
    %218 = memref.load %arg3[%c2_88, %c4_89] : memref<4x16xf32, #tpu.memory_space<smem>>
    %219 = vector.broadcast %218 : f32 to vector<8x8xf32>
    %220 = arith.mulf %20, %219 : vector<8x8xf32>
    %221 = arith.addf %217, %220 : vector<8x8xf32>
    %c3_90 = arith.constant 3 : index
    %c4_91 = arith.constant 4 : index
    %222 = memref.load %arg3[%c3_90, %c4_91] : memref<4x16xf32, #tpu.memory_space<smem>>
    %223 = vector.broadcast %222 : f32 to vector<8x8xf32>
    %224 = arith.mulf %26, %223 : vector<8x8xf32>
    %225 = arith.addf %221, %224 : vector<8x8xf32>
    %c4_92 = arith.constant 4 : index
    %226 = memref.load %arg4[%c4_92] : memref<16xf32, #tpu.memory_space<smem>>
    %227 = vector.broadcast %226 : f32 to vector<8x8xf32>
    %228 = arith.addf %225, %227 : vector<8x8xf32>
    %cst_93 = arith.constant 5.000000e-01 : f32
    %229 = vector.broadcast %cst_93 : f32 to vector<8x8xf32>
    %230 = arith.mulf %229, %228 : vector<8x8xf32>
    %231 = arith.mulf %228, %228 : vector<8x8xf32>
    %232 = arith.mulf %231, %228 : vector<8x8xf32>
    %cst_94 = arith.constant 4.471500e-02 : f32
    %233 = vector.broadcast %cst_94 : f32 to vector<8x8xf32>
    %234 = arith.mulf %233, %232 : vector<8x8xf32>
    %235 = arith.addf %228, %234 : vector<8x8xf32>
    %cst_95 = arith.constant 0.797884583 : f32
    %236 = vector.broadcast %cst_95 : f32 to vector<8x8xf32>
    %237 = arith.mulf %236, %235 : vector<8x8xf32>
    %238 = math.tanh %237 : vector<8x8xf32>
    %cst_96 = arith.constant 1.000000e+00 : f32
    %239 = vector.broadcast %cst_96 : f32 to vector<8x8xf32>
    %240 = arith.addf %239, %238 : vector<8x8xf32>
    %241 = arith.mulf %230, %240 : vector<8x8xf32>
    %c4_97 = arith.constant 4 : index
    %c0_98 = arith.constant 0 : index
    %242 = memref.load %arg5[%c4_97, %c0_98] : memref<16x4xf32, #tpu.memory_space<smem>>
    %243 = vector.broadcast %242 : f32 to vector<8x8xf32>
    %244 = arith.mulf %241, %243 : vector<8x8xf32>
    %245 = arith.addf %198, %244 : vector<8x8xf32>
    %c4_99 = arith.constant 4 : index
    %c1_100 = arith.constant 1 : index
    %246 = memref.load %arg5[%c4_99, %c1_100] : memref<16x4xf32, #tpu.memory_space<smem>>
    %247 = vector.broadcast %246 : f32 to vector<8x8xf32>
    %248 = arith.mulf %241, %247 : vector<8x8xf32>
    %249 = arith.addf %202, %248 : vector<8x8xf32>
    %c4_101 = arith.constant 4 : index
    %c2_102 = arith.constant 2 : index
    %250 = memref.load %arg5[%c4_101, %c2_102] : memref<16x4xf32, #tpu.memory_space<smem>>
    %251 = vector.broadcast %250 : f32 to vector<8x8xf32>
    %252 = arith.mulf %241, %251 : vector<8x8xf32>
    %253 = arith.addf %206, %252 : vector<8x8xf32>
    %c4_103 = arith.constant 4 : index
    %c3_104 = arith.constant 3 : index
    %254 = memref.load %arg5[%c4_103, %c3_104] : memref<16x4xf32, #tpu.memory_space<smem>>
    %255 = vector.broadcast %254 : f32 to vector<8x8xf32>
    %256 = arith.mulf %241, %255 : vector<8x8xf32>
    %257 = arith.addf %210, %256 : vector<8x8xf32>
    %c0_105 = arith.constant 0 : index
    %c5 = arith.constant 5 : index
    %258 = memref.load %arg3[%c0_105, %c5] : memref<4x16xf32, #tpu.memory_space<smem>>
    %259 = vector.broadcast %258 : f32 to vector<8x8xf32>
    %260 = arith.mulf %10, %259 : vector<8x8xf32>
    %c1_106 = arith.constant 1 : index
    %c5_107 = arith.constant 5 : index
    %261 = memref.load %arg3[%c1_106, %c5_107] : memref<4x16xf32, #tpu.memory_space<smem>>
    %262 = vector.broadcast %261 : f32 to vector<8x8xf32>
    %263 = arith.mulf %15, %262 : vector<8x8xf32>
    %264 = arith.addf %260, %263 : vector<8x8xf32>
    %c2_108 = arith.constant 2 : index
    %c5_109 = arith.constant 5 : index
    %265 = memref.load %arg3[%c2_108, %c5_109] : memref<4x16xf32, #tpu.memory_space<smem>>
    %266 = vector.broadcast %265 : f32 to vector<8x8xf32>
    %267 = arith.mulf %20, %266 : vector<8x8xf32>
    %268 = arith.addf %264, %267 : vector<8x8xf32>
    %c3_110 = arith.constant 3 : index
    %c5_111 = arith.constant 5 : index
    %269 = memref.load %arg3[%c3_110, %c5_111] : memref<4x16xf32, #tpu.memory_space<smem>>
    %270 = vector.broadcast %269 : f32 to vector<8x8xf32>
    %271 = arith.mulf %26, %270 : vector<8x8xf32>
    %272 = arith.addf %268, %271 : vector<8x8xf32>
    %c5_112 = arith.constant 5 : index
    %273 = memref.load %arg4[%c5_112] : memref<16xf32, #tpu.memory_space<smem>>
    %274 = vector.broadcast %273 : f32 to vector<8x8xf32>
    %275 = arith.addf %272, %274 : vector<8x8xf32>
    %cst_113 = arith.constant 5.000000e-01 : f32
    %276 = vector.broadcast %cst_113 : f32 to vector<8x8xf32>
    %277 = arith.mulf %276, %275 : vector<8x8xf32>
    %278 = arith.mulf %275, %275 : vector<8x8xf32>
    %279 = arith.mulf %278, %275 : vector<8x8xf32>
    %cst_114 = arith.constant 4.471500e-02 : f32
    %280 = vector.broadcast %cst_114 : f32 to vector<8x8xf32>
    %281 = arith.mulf %280, %279 : vector<8x8xf32>
    %282 = arith.addf %275, %281 : vector<8x8xf32>
    %cst_115 = arith.constant 0.797884583 : f32
    %283 = vector.broadcast %cst_115 : f32 to vector<8x8xf32>
    %284 = arith.mulf %283, %282 : vector<8x8xf32>
    %285 = math.tanh %284 : vector<8x8xf32>
    %cst_116 = arith.constant 1.000000e+00 : f32
    %286 = vector.broadcast %cst_116 : f32 to vector<8x8xf32>
    %287 = arith.addf %286, %285 : vector<8x8xf32>
    %288 = arith.mulf %277, %287 : vector<8x8xf32>
    %c5_117 = arith.constant 5 : index
    %c0_118 = arith.constant 0 : index
    %289 = memref.load %arg5[%c5_117, %c0_118] : memref<16x4xf32, #tpu.memory_space<smem>>
    %290 = vector.broadcast %289 : f32 to vector<8x8xf32>
    %291 = arith.mulf %288, %290 : vector<8x8xf32>
    %292 = arith.addf %245, %291 : vector<8x8xf32>
    %c5_119 = arith.constant 5 : index
    %c1_120 = arith.constant 1 : index
    %293 = memref.load %arg5[%c5_119, %c1_120] : memref<16x4xf32, #tpu.memory_space<smem>>
    %294 = vector.broadcast %293 : f32 to vector<8x8xf32>
    %295 = arith.mulf %288, %294 : vector<8x8xf32>
    %296 = arith.addf %249, %295 : vector<8x8xf32>
    %c5_121 = arith.constant 5 : index
    %c2_122 = arith.constant 2 : index
    %297 = memref.load %arg5[%c5_121, %c2_122] : memref<16x4xf32, #tpu.memory_space<smem>>
    %298 = vector.broadcast %297 : f32 to vector<8x8xf32>
    %299 = arith.mulf %288, %298 : vector<8x8xf32>
    %300 = arith.addf %253, %299 : vector<8x8xf32>
    %c5_123 = arith.constant 5 : index
    %c3_124 = arith.constant 3 : index
    %301 = memref.load %arg5[%c5_123, %c3_124] : memref<16x4xf32, #tpu.memory_space<smem>>
    %302 = vector.broadcast %301 : f32 to vector<8x8xf32>
    %303 = arith.mulf %288, %302 : vector<8x8xf32>
    %304 = arith.addf %257, %303 : vector<8x8xf32>
    %c0_125 = arith.constant 0 : index
    %c6 = arith.constant 6 : index
    %305 = memref.load %arg3[%c0_125, %c6] : memref<4x16xf32, #tpu.memory_space<smem>>
    %306 = vector.broadcast %305 : f32 to vector<8x8xf32>
    %307 = arith.mulf %10, %306 : vector<8x8xf32>
    %c1_126 = arith.constant 1 : index
    %c6_127 = arith.constant 6 : index
    %308 = memref.load %arg3[%c1_126, %c6_127] : memref<4x16xf32, #tpu.memory_space<smem>>
    %309 = vector.broadcast %308 : f32 to vector<8x8xf32>
    %310 = arith.mulf %15, %309 : vector<8x8xf32>
    %311 = arith.addf %307, %310 : vector<8x8xf32>
    %c2_128 = arith.constant 2 : index
    %c6_129 = arith.constant 6 : index
    %312 = memref.load %arg3[%c2_128, %c6_129] : memref<4x16xf32, #tpu.memory_space<smem>>
    %313 = vector.broadcast %312 : f32 to vector<8x8xf32>
    %314 = arith.mulf %20, %313 : vector<8x8xf32>
    %315 = arith.addf %311, %314 : vector<8x8xf32>
    %c3_130 = arith.constant 3 : index
    %c6_131 = arith.constant 6 : index
    %316 = memref.load %arg3[%c3_130, %c6_131] : memref<4x16xf32, #tpu.memory_space<smem>>
    %317 = vector.broadcast %316 : f32 to vector<8x8xf32>
    %318 = arith.mulf %26, %317 : vector<8x8xf32>
    %319 = arith.addf %315, %318 : vector<8x8xf32>
    %c6_132 = arith.constant 6 : index
    %320 = memref.load %arg4[%c6_132] : memref<16xf32, #tpu.memory_space<smem>>
    %321 = vector.broadcast %320 : f32 to vector<8x8xf32>
    %322 = arith.addf %319, %321 : vector<8x8xf32>
    %cst_133 = arith.constant 5.000000e-01 : f32
    %323 = vector.broadcast %cst_133 : f32 to vector<8x8xf32>
    %324 = arith.mulf %323, %322 : vector<8x8xf32>
    %325 = arith.mulf %322, %322 : vector<8x8xf32>
    %326 = arith.mulf %325, %322 : vector<8x8xf32>
    %cst_134 = arith.constant 4.471500e-02 : f32
    %327 = vector.broadcast %cst_134 : f32 to vector<8x8xf32>
    %328 = arith.mulf %327, %326 : vector<8x8xf32>
    %329 = arith.addf %322, %328 : vector<8x8xf32>
    %cst_135 = arith.constant 0.797884583 : f32
    %330 = vector.broadcast %cst_135 : f32 to vector<8x8xf32>
    %331 = arith.mulf %330, %329 : vector<8x8xf32>
    %332 = math.tanh %331 : vector<8x8xf32>
    %cst_136 = arith.constant 1.000000e+00 : f32
    %333 = vector.broadcast %cst_136 : f32 to vector<8x8xf32>
    %334 = arith.addf %333, %332 : vector<8x8xf32>
    %335 = arith.mulf %324, %334 : vector<8x8xf32>
    %c6_137 = arith.constant 6 : index
    %c0_138 = arith.constant 0 : index
    %336 = memref.load %arg5[%c6_137, %c0_138] : memref<16x4xf32, #tpu.memory_space<smem>>
    %337 = vector.broadcast %336 : f32 to vector<8x8xf32>
    %338 = arith.mulf %335, %337 : vector<8x8xf32>
    %339 = arith.addf %292, %338 : vector<8x8xf32>
    %c6_139 = arith.constant 6 : index
    %c1_140 = arith.constant 1 : index
    %340 = memref.load %arg5[%c6_139, %c1_140] : memref<16x4xf32, #tpu.memory_space<smem>>
    %341 = vector.broadcast %340 : f32 to vector<8x8xf32>
    %342 = arith.mulf %335, %341 : vector<8x8xf32>
    %343 = arith.addf %296, %342 : vector<8x8xf32>
    %c6_141 = arith.constant 6 : index
    %c2_142 = arith.constant 2 : index
    %344 = memref.load %arg5[%c6_141, %c2_142] : memref<16x4xf32, #tpu.memory_space<smem>>
    %345 = vector.broadcast %344 : f32 to vector<8x8xf32>
    %346 = arith.mulf %335, %345 : vector<8x8xf32>
    %347 = arith.addf %300, %346 : vector<8x8xf32>
    %c6_143 = arith.constant 6 : index
    %c3_144 = arith.constant 3 : index
    %348 = memref.load %arg5[%c6_143, %c3_144] : memref<16x4xf32, #tpu.memory_space<smem>>
    %349 = vector.broadcast %348 : f32 to vector<8x8xf32>
    %350 = arith.mulf %335, %349 : vector<8x8xf32>
    %351 = arith.addf %304, %350 : vector<8x8xf32>
    %c0_145 = arith.constant 0 : index
    %c7 = arith.constant 7 : index
    %352 = memref.load %arg3[%c0_145, %c7] : memref<4x16xf32, #tpu.memory_space<smem>>
    %353 = vector.broadcast %352 : f32 to vector<8x8xf32>
    %354 = arith.mulf %10, %353 : vector<8x8xf32>
    %c1_146 = arith.constant 1 : index
    %c7_147 = arith.constant 7 : index
    %355 = memref.load %arg3[%c1_146, %c7_147] : memref<4x16xf32, #tpu.memory_space<smem>>
    %356 = vector.broadcast %355 : f32 to vector<8x8xf32>
    %357 = arith.mulf %15, %356 : vector<8x8xf32>
    %358 = arith.addf %354, %357 : vector<8x8xf32>
    %c2_148 = arith.constant 2 : index
    %c7_149 = arith.constant 7 : index
    %359 = memref.load %arg3[%c2_148, %c7_149] : memref<4x16xf32, #tpu.memory_space<smem>>
    %360 = vector.broadcast %359 : f32 to vector<8x8xf32>
    %361 = arith.mulf %20, %360 : vector<8x8xf32>
    %362 = arith.addf %358, %361 : vector<8x8xf32>
    %c3_150 = arith.constant 3 : index
    %c7_151 = arith.constant 7 : index
    %363 = memref.load %arg3[%c3_150, %c7_151] : memref<4x16xf32, #tpu.memory_space<smem>>
    %364 = vector.broadcast %363 : f32 to vector<8x8xf32>
    %365 = arith.mulf %26, %364 : vector<8x8xf32>
    %366 = arith.addf %362, %365 : vector<8x8xf32>
    %c7_152 = arith.constant 7 : index
    %367 = memref.load %arg4[%c7_152] : memref<16xf32, #tpu.memory_space<smem>>
    %368 = vector.broadcast %367 : f32 to vector<8x8xf32>
    %369 = arith.addf %366, %368 : vector<8x8xf32>
    %cst_153 = arith.constant 5.000000e-01 : f32
    %370 = vector.broadcast %cst_153 : f32 to vector<8x8xf32>
    %371 = arith.mulf %370, %369 : vector<8x8xf32>
    %372 = arith.mulf %369, %369 : vector<8x8xf32>
    %373 = arith.mulf %372, %369 : vector<8x8xf32>
    %cst_154 = arith.constant 4.471500e-02 : f32
    %374 = vector.broadcast %cst_154 : f32 to vector<8x8xf32>
    %375 = arith.mulf %374, %373 : vector<8x8xf32>
    %376 = arith.addf %369, %375 : vector<8x8xf32>
    %cst_155 = arith.constant 0.797884583 : f32
    %377 = vector.broadcast %cst_155 : f32 to vector<8x8xf32>
    %378 = arith.mulf %377, %376 : vector<8x8xf32>
    %379 = math.tanh %378 : vector<8x8xf32>
    %cst_156 = arith.constant 1.000000e+00 : f32
    %380 = vector.broadcast %cst_156 : f32 to vector<8x8xf32>
    %381 = arith.addf %380, %379 : vector<8x8xf32>
    %382 = arith.mulf %371, %381 : vector<8x8xf32>
    %c7_157 = arith.constant 7 : index
    %c0_158 = arith.constant 0 : index
    %383 = memref.load %arg5[%c7_157, %c0_158] : memref<16x4xf32, #tpu.memory_space<smem>>
    %384 = vector.broadcast %383 : f32 to vector<8x8xf32>
    %385 = arith.mulf %382, %384 : vector<8x8xf32>
    %386 = arith.addf %339, %385 : vector<8x8xf32>
    %c7_159 = arith.constant 7 : index
    %c1_160 = arith.constant 1 : index
    %387 = memref.load %arg5[%c7_159, %c1_160] : memref<16x4xf32, #tpu.memory_space<smem>>
    %388 = vector.broadcast %387 : f32 to vector<8x8xf32>
    %389 = arith.mulf %382, %388 : vector<8x8xf32>
    %390 = arith.addf %343, %389 : vector<8x8xf32>
    %c7_161 = arith.constant 7 : index
    %c2_162 = arith.constant 2 : index
    %391 = memref.load %arg5[%c7_161, %c2_162] : memref<16x4xf32, #tpu.memory_space<smem>>
    %392 = vector.broadcast %391 : f32 to vector<8x8xf32>
    %393 = arith.mulf %382, %392 : vector<8x8xf32>
    %394 = arith.addf %347, %393 : vector<8x8xf32>
    %c7_163 = arith.constant 7 : index
    %c3_164 = arith.constant 3 : index
    %395 = memref.load %arg5[%c7_163, %c3_164] : memref<16x4xf32, #tpu.memory_space<smem>>
    %396 = vector.broadcast %395 : f32 to vector<8x8xf32>
    %397 = arith.mulf %382, %396 : vector<8x8xf32>
    %398 = arith.addf %351, %397 : vector<8x8xf32>
    %c0_165 = arith.constant 0 : index
    %c8 = arith.constant 8 : index
    %399 = memref.load %arg3[%c0_165, %c8] : memref<4x16xf32, #tpu.memory_space<smem>>
    %400 = vector.broadcast %399 : f32 to vector<8x8xf32>
    %401 = arith.mulf %10, %400 : vector<8x8xf32>
    %c1_166 = arith.constant 1 : index
    %c8_167 = arith.constant 8 : index
    %402 = memref.load %arg3[%c1_166, %c8_167] : memref<4x16xf32, #tpu.memory_space<smem>>
    %403 = vector.broadcast %402 : f32 to vector<8x8xf32>
    %404 = arith.mulf %15, %403 : vector<8x8xf32>
    %405 = arith.addf %401, %404 : vector<8x8xf32>
    %c2_168 = arith.constant 2 : index
    %c8_169 = arith.constant 8 : index
    %406 = memref.load %arg3[%c2_168, %c8_169] : memref<4x16xf32, #tpu.memory_space<smem>>
    %407 = vector.broadcast %406 : f32 to vector<8x8xf32>
    %408 = arith.mulf %20, %407 : vector<8x8xf32>
    %409 = arith.addf %405, %408 : vector<8x8xf32>
    %c3_170 = arith.constant 3 : index
    %c8_171 = arith.constant 8 : index
    %410 = memref.load %arg3[%c3_170, %c8_171] : memref<4x16xf32, #tpu.memory_space<smem>>
    %411 = vector.broadcast %410 : f32 to vector<8x8xf32>
    %412 = arith.mulf %26, %411 : vector<8x8xf32>
    %413 = arith.addf %409, %412 : vector<8x8xf32>
    %c8_172 = arith.constant 8 : index
    %414 = memref.load %arg4[%c8_172] : memref<16xf32, #tpu.memory_space<smem>>
    %415 = vector.broadcast %414 : f32 to vector<8x8xf32>
    %416 = arith.addf %413, %415 : vector<8x8xf32>
    %cst_173 = arith.constant 5.000000e-01 : f32
    %417 = vector.broadcast %cst_173 : f32 to vector<8x8xf32>
    %418 = arith.mulf %417, %416 : vector<8x8xf32>
    %419 = arith.mulf %416, %416 : vector<8x8xf32>
    %420 = arith.mulf %419, %416 : vector<8x8xf32>
    %cst_174 = arith.constant 4.471500e-02 : f32
    %421 = vector.broadcast %cst_174 : f32 to vector<8x8xf32>
    %422 = arith.mulf %421, %420 : vector<8x8xf32>
    %423 = arith.addf %416, %422 : vector<8x8xf32>
    %cst_175 = arith.constant 0.797884583 : f32
    %424 = vector.broadcast %cst_175 : f32 to vector<8x8xf32>
    %425 = arith.mulf %424, %423 : vector<8x8xf32>
    %426 = math.tanh %425 : vector<8x8xf32>
    %cst_176 = arith.constant 1.000000e+00 : f32
    %427 = vector.broadcast %cst_176 : f32 to vector<8x8xf32>
    %428 = arith.addf %427, %426 : vector<8x8xf32>
    %429 = arith.mulf %418, %428 : vector<8x8xf32>
    %c8_177 = arith.constant 8 : index
    %c0_178 = arith.constant 0 : index
    %430 = memref.load %arg5[%c8_177, %c0_178] : memref<16x4xf32, #tpu.memory_space<smem>>
    %431 = vector.broadcast %430 : f32 to vector<8x8xf32>
    %432 = arith.mulf %429, %431 : vector<8x8xf32>
    %433 = arith.addf %386, %432 : vector<8x8xf32>
    %c8_179 = arith.constant 8 : index
    %c1_180 = arith.constant 1 : index
    %434 = memref.load %arg5[%c8_179, %c1_180] : memref<16x4xf32, #tpu.memory_space<smem>>
    %435 = vector.broadcast %434 : f32 to vector<8x8xf32>
    %436 = arith.mulf %429, %435 : vector<8x8xf32>
    %437 = arith.addf %390, %436 : vector<8x8xf32>
    %c8_181 = arith.constant 8 : index
    %c2_182 = arith.constant 2 : index
    %438 = memref.load %arg5[%c8_181, %c2_182] : memref<16x4xf32, #tpu.memory_space<smem>>
    %439 = vector.broadcast %438 : f32 to vector<8x8xf32>
    %440 = arith.mulf %429, %439 : vector<8x8xf32>
    %441 = arith.addf %394, %440 : vector<8x8xf32>
    %c8_183 = arith.constant 8 : index
    %c3_184 = arith.constant 3 : index
    %442 = memref.load %arg5[%c8_183, %c3_184] : memref<16x4xf32, #tpu.memory_space<smem>>
    %443 = vector.broadcast %442 : f32 to vector<8x8xf32>
    %444 = arith.mulf %429, %443 : vector<8x8xf32>
    %445 = arith.addf %398, %444 : vector<8x8xf32>
    %c0_185 = arith.constant 0 : index
    %c9 = arith.constant 9 : index
    %446 = memref.load %arg3[%c0_185, %c9] : memref<4x16xf32, #tpu.memory_space<smem>>
    %447 = vector.broadcast %446 : f32 to vector<8x8xf32>
    %448 = arith.mulf %10, %447 : vector<8x8xf32>
    %c1_186 = arith.constant 1 : index
    %c9_187 = arith.constant 9 : index
    %449 = memref.load %arg3[%c1_186, %c9_187] : memref<4x16xf32, #tpu.memory_space<smem>>
    %450 = vector.broadcast %449 : f32 to vector<8x8xf32>
    %451 = arith.mulf %15, %450 : vector<8x8xf32>
    %452 = arith.addf %448, %451 : vector<8x8xf32>
    %c2_188 = arith.constant 2 : index
    %c9_189 = arith.constant 9 : index
    %453 = memref.load %arg3[%c2_188, %c9_189] : memref<4x16xf32, #tpu.memory_space<smem>>
    %454 = vector.broadcast %453 : f32 to vector<8x8xf32>
    %455 = arith.mulf %20, %454 : vector<8x8xf32>
    %456 = arith.addf %452, %455 : vector<8x8xf32>
    %c3_190 = arith.constant 3 : index
    %c9_191 = arith.constant 9 : index
    %457 = memref.load %arg3[%c3_190, %c9_191] : memref<4x16xf32, #tpu.memory_space<smem>>
    %458 = vector.broadcast %457 : f32 to vector<8x8xf32>
    %459 = arith.mulf %26, %458 : vector<8x8xf32>
    %460 = arith.addf %456, %459 : vector<8x8xf32>
    %c9_192 = arith.constant 9 : index
    %461 = memref.load %arg4[%c9_192] : memref<16xf32, #tpu.memory_space<smem>>
    %462 = vector.broadcast %461 : f32 to vector<8x8xf32>
    %463 = arith.addf %460, %462 : vector<8x8xf32>
    %cst_193 = arith.constant 5.000000e-01 : f32
    %464 = vector.broadcast %cst_193 : f32 to vector<8x8xf32>
    %465 = arith.mulf %464, %463 : vector<8x8xf32>
    %466 = arith.mulf %463, %463 : vector<8x8xf32>
    %467 = arith.mulf %466, %463 : vector<8x8xf32>
    %cst_194 = arith.constant 4.471500e-02 : f32
    %468 = vector.broadcast %cst_194 : f32 to vector<8x8xf32>
    %469 = arith.mulf %468, %467 : vector<8x8xf32>
    %470 = arith.addf %463, %469 : vector<8x8xf32>
    %cst_195 = arith.constant 0.797884583 : f32
    %471 = vector.broadcast %cst_195 : f32 to vector<8x8xf32>
    %472 = arith.mulf %471, %470 : vector<8x8xf32>
    %473 = math.tanh %472 : vector<8x8xf32>
    %cst_196 = arith.constant 1.000000e+00 : f32
    %474 = vector.broadcast %cst_196 : f32 to vector<8x8xf32>
    %475 = arith.addf %474, %473 : vector<8x8xf32>
    %476 = arith.mulf %465, %475 : vector<8x8xf32>
    %c9_197 = arith.constant 9 : index
    %c0_198 = arith.constant 0 : index
    %477 = memref.load %arg5[%c9_197, %c0_198] : memref<16x4xf32, #tpu.memory_space<smem>>
    %478 = vector.broadcast %477 : f32 to vector<8x8xf32>
    %479 = arith.mulf %476, %478 : vector<8x8xf32>
    %480 = arith.addf %433, %479 : vector<8x8xf32>
    %c9_199 = arith.constant 9 : index
    %c1_200 = arith.constant 1 : index
    %481 = memref.load %arg5[%c9_199, %c1_200] : memref<16x4xf32, #tpu.memory_space<smem>>
    %482 = vector.broadcast %481 : f32 to vector<8x8xf32>
    %483 = arith.mulf %476, %482 : vector<8x8xf32>
    %484 = arith.addf %437, %483 : vector<8x8xf32>
    %c9_201 = arith.constant 9 : index
    %c2_202 = arith.constant 2 : index
    %485 = memref.load %arg5[%c9_201, %c2_202] : memref<16x4xf32, #tpu.memory_space<smem>>
    %486 = vector.broadcast %485 : f32 to vector<8x8xf32>
    %487 = arith.mulf %476, %486 : vector<8x8xf32>
    %488 = arith.addf %441, %487 : vector<8x8xf32>
    %c9_203 = arith.constant 9 : index
    %c3_204 = arith.constant 3 : index
    %489 = memref.load %arg5[%c9_203, %c3_204] : memref<16x4xf32, #tpu.memory_space<smem>>
    %490 = vector.broadcast %489 : f32 to vector<8x8xf32>
    %491 = arith.mulf %476, %490 : vector<8x8xf32>
    %492 = arith.addf %445, %491 : vector<8x8xf32>
    %c0_205 = arith.constant 0 : index
    %c10 = arith.constant 10 : index
    %493 = memref.load %arg3[%c0_205, %c10] : memref<4x16xf32, #tpu.memory_space<smem>>
    %494 = vector.broadcast %493 : f32 to vector<8x8xf32>
    %495 = arith.mulf %10, %494 : vector<8x8xf32>
    %c1_206 = arith.constant 1 : index
    %c10_207 = arith.constant 10 : index
    %496 = memref.load %arg3[%c1_206, %c10_207] : memref<4x16xf32, #tpu.memory_space<smem>>
    %497 = vector.broadcast %496 : f32 to vector<8x8xf32>
    %498 = arith.mulf %15, %497 : vector<8x8xf32>
    %499 = arith.addf %495, %498 : vector<8x8xf32>
    %c2_208 = arith.constant 2 : index
    %c10_209 = arith.constant 10 : index
    %500 = memref.load %arg3[%c2_208, %c10_209] : memref<4x16xf32, #tpu.memory_space<smem>>
    %501 = vector.broadcast %500 : f32 to vector<8x8xf32>
    %502 = arith.mulf %20, %501 : vector<8x8xf32>
    %503 = arith.addf %499, %502 : vector<8x8xf32>
    %c3_210 = arith.constant 3 : index
    %c10_211 = arith.constant 10 : index
    %504 = memref.load %arg3[%c3_210, %c10_211] : memref<4x16xf32, #tpu.memory_space<smem>>
    %505 = vector.broadcast %504 : f32 to vector<8x8xf32>
    %506 = arith.mulf %26, %505 : vector<8x8xf32>
    %507 = arith.addf %503, %506 : vector<8x8xf32>
    %c10_212 = arith.constant 10 : index
    %508 = memref.load %arg4[%c10_212] : memref<16xf32, #tpu.memory_space<smem>>
    %509 = vector.broadcast %508 : f32 to vector<8x8xf32>
    %510 = arith.addf %507, %509 : vector<8x8xf32>
    %cst_213 = arith.constant 5.000000e-01 : f32
    %511 = vector.broadcast %cst_213 : f32 to vector<8x8xf32>
    %512 = arith.mulf %511, %510 : vector<8x8xf32>
    %513 = arith.mulf %510, %510 : vector<8x8xf32>
    %514 = arith.mulf %513, %510 : vector<8x8xf32>
    %cst_214 = arith.constant 4.471500e-02 : f32
    %515 = vector.broadcast %cst_214 : f32 to vector<8x8xf32>
    %516 = arith.mulf %515, %514 : vector<8x8xf32>
    %517 = arith.addf %510, %516 : vector<8x8xf32>
    %cst_215 = arith.constant 0.797884583 : f32
    %518 = vector.broadcast %cst_215 : f32 to vector<8x8xf32>
    %519 = arith.mulf %518, %517 : vector<8x8xf32>
    %520 = math.tanh %519 : vector<8x8xf32>
    %cst_216 = arith.constant 1.000000e+00 : f32
    %521 = vector.broadcast %cst_216 : f32 to vector<8x8xf32>
    %522 = arith.addf %521, %520 : vector<8x8xf32>
    %523 = arith.mulf %512, %522 : vector<8x8xf32>
    %c10_217 = arith.constant 10 : index
    %c0_218 = arith.constant 0 : index
    %524 = memref.load %arg5[%c10_217, %c0_218] : memref<16x4xf32, #tpu.memory_space<smem>>
    %525 = vector.broadcast %524 : f32 to vector<8x8xf32>
    %526 = arith.mulf %523, %525 : vector<8x8xf32>
    %527 = arith.addf %480, %526 : vector<8x8xf32>
    %c10_219 = arith.constant 10 : index
    %c1_220 = arith.constant 1 : index
    %528 = memref.load %arg5[%c10_219, %c1_220] : memref<16x4xf32, #tpu.memory_space<smem>>
    %529 = vector.broadcast %528 : f32 to vector<8x8xf32>
    %530 = arith.mulf %523, %529 : vector<8x8xf32>
    %531 = arith.addf %484, %530 : vector<8x8xf32>
    %c10_221 = arith.constant 10 : index
    %c2_222 = arith.constant 2 : index
    %532 = memref.load %arg5[%c10_221, %c2_222] : memref<16x4xf32, #tpu.memory_space<smem>>
    %533 = vector.broadcast %532 : f32 to vector<8x8xf32>
    %534 = arith.mulf %523, %533 : vector<8x8xf32>
    %535 = arith.addf %488, %534 : vector<8x8xf32>
    %c10_223 = arith.constant 10 : index
    %c3_224 = arith.constant 3 : index
    %536 = memref.load %arg5[%c10_223, %c3_224] : memref<16x4xf32, #tpu.memory_space<smem>>
    %537 = vector.broadcast %536 : f32 to vector<8x8xf32>
    %538 = arith.mulf %523, %537 : vector<8x8xf32>
    %539 = arith.addf %492, %538 : vector<8x8xf32>
    %c0_225 = arith.constant 0 : index
    %c11 = arith.constant 11 : index
    %540 = memref.load %arg3[%c0_225, %c11] : memref<4x16xf32, #tpu.memory_space<smem>>
    %541 = vector.broadcast %540 : f32 to vector<8x8xf32>
    %542 = arith.mulf %10, %541 : vector<8x8xf32>
    %c1_226 = arith.constant 1 : index
    %c11_227 = arith.constant 11 : index
    %543 = memref.load %arg3[%c1_226, %c11_227] : memref<4x16xf32, #tpu.memory_space<smem>>
    %544 = vector.broadcast %543 : f32 to vector<8x8xf32>
    %545 = arith.mulf %15, %544 : vector<8x8xf32>
    %546 = arith.addf %542, %545 : vector<8x8xf32>
    %c2_228 = arith.constant 2 : index
    %c11_229 = arith.constant 11 : index
    %547 = memref.load %arg3[%c2_228, %c11_229] : memref<4x16xf32, #tpu.memory_space<smem>>
    %548 = vector.broadcast %547 : f32 to vector<8x8xf32>
    %549 = arith.mulf %20, %548 : vector<8x8xf32>
    %550 = arith.addf %546, %549 : vector<8x8xf32>
    %c3_230 = arith.constant 3 : index
    %c11_231 = arith.constant 11 : index
    %551 = memref.load %arg3[%c3_230, %c11_231] : memref<4x16xf32, #tpu.memory_space<smem>>
    %552 = vector.broadcast %551 : f32 to vector<8x8xf32>
    %553 = arith.mulf %26, %552 : vector<8x8xf32>
    %554 = arith.addf %550, %553 : vector<8x8xf32>
    %c11_232 = arith.constant 11 : index
    %555 = memref.load %arg4[%c11_232] : memref<16xf32, #tpu.memory_space<smem>>
    %556 = vector.broadcast %555 : f32 to vector<8x8xf32>
    %557 = arith.addf %554, %556 : vector<8x8xf32>
    %cst_233 = arith.constant 5.000000e-01 : f32
    %558 = vector.broadcast %cst_233 : f32 to vector<8x8xf32>
    %559 = arith.mulf %558, %557 : vector<8x8xf32>
    %560 = arith.mulf %557, %557 : vector<8x8xf32>
    %561 = arith.mulf %560, %557 : vector<8x8xf32>
    %cst_234 = arith.constant 4.471500e-02 : f32
    %562 = vector.broadcast %cst_234 : f32 to vector<8x8xf32>
    %563 = arith.mulf %562, %561 : vector<8x8xf32>
    %564 = arith.addf %557, %563 : vector<8x8xf32>
    %cst_235 = arith.constant 0.797884583 : f32
    %565 = vector.broadcast %cst_235 : f32 to vector<8x8xf32>
    %566 = arith.mulf %565, %564 : vector<8x8xf32>
    %567 = math.tanh %566 : vector<8x8xf32>
    %cst_236 = arith.constant 1.000000e+00 : f32
    %568 = vector.broadcast %cst_236 : f32 to vector<8x8xf32>
    %569 = arith.addf %568, %567 : vector<8x8xf32>
    %570 = arith.mulf %559, %569 : vector<8x8xf32>
    %c11_237 = arith.constant 11 : index
    %c0_238 = arith.constant 0 : index
    %571 = memref.load %arg5[%c11_237, %c0_238] : memref<16x4xf32, #tpu.memory_space<smem>>
    %572 = vector.broadcast %571 : f32 to vector<8x8xf32>
    %573 = arith.mulf %570, %572 : vector<8x8xf32>
    %574 = arith.addf %527, %573 : vector<8x8xf32>
    %c11_239 = arith.constant 11 : index
    %c1_240 = arith.constant 1 : index
    %575 = memref.load %arg5[%c11_239, %c1_240] : memref<16x4xf32, #tpu.memory_space<smem>>
    %576 = vector.broadcast %575 : f32 to vector<8x8xf32>
    %577 = arith.mulf %570, %576 : vector<8x8xf32>
    %578 = arith.addf %531, %577 : vector<8x8xf32>
    %c11_241 = arith.constant 11 : index
    %c2_242 = arith.constant 2 : index
    %579 = memref.load %arg5[%c11_241, %c2_242] : memref<16x4xf32, #tpu.memory_space<smem>>
    %580 = vector.broadcast %579 : f32 to vector<8x8xf32>
    %581 = arith.mulf %570, %580 : vector<8x8xf32>
    %582 = arith.addf %535, %581 : vector<8x8xf32>
    %c11_243 = arith.constant 11 : index
    %c3_244 = arith.constant 3 : index
    %583 = memref.load %arg5[%c11_243, %c3_244] : memref<16x4xf32, #tpu.memory_space<smem>>
    %584 = vector.broadcast %583 : f32 to vector<8x8xf32>
    %585 = arith.mulf %570, %584 : vector<8x8xf32>
    %586 = arith.addf %539, %585 : vector<8x8xf32>
    %c0_245 = arith.constant 0 : index
    %c12 = arith.constant 12 : index
    %587 = memref.load %arg3[%c0_245, %c12] : memref<4x16xf32, #tpu.memory_space<smem>>
    %588 = vector.broadcast %587 : f32 to vector<8x8xf32>
    %589 = arith.mulf %10, %588 : vector<8x8xf32>
    %c1_246 = arith.constant 1 : index
    %c12_247 = arith.constant 12 : index
    %590 = memref.load %arg3[%c1_246, %c12_247] : memref<4x16xf32, #tpu.memory_space<smem>>
    %591 = vector.broadcast %590 : f32 to vector<8x8xf32>
    %592 = arith.mulf %15, %591 : vector<8x8xf32>
    %593 = arith.addf %589, %592 : vector<8x8xf32>
    %c2_248 = arith.constant 2 : index
    %c12_249 = arith.constant 12 : index
    %594 = memref.load %arg3[%c2_248, %c12_249] : memref<4x16xf32, #tpu.memory_space<smem>>
    %595 = vector.broadcast %594 : f32 to vector<8x8xf32>
    %596 = arith.mulf %20, %595 : vector<8x8xf32>
    %597 = arith.addf %593, %596 : vector<8x8xf32>
    %c3_250 = arith.constant 3 : index
    %c12_251 = arith.constant 12 : index
    %598 = memref.load %arg3[%c3_250, %c12_251] : memref<4x16xf32, #tpu.memory_space<smem>>
    %599 = vector.broadcast %598 : f32 to vector<8x8xf32>
    %600 = arith.mulf %26, %599 : vector<8x8xf32>
    %601 = arith.addf %597, %600 : vector<8x8xf32>
    %c12_252 = arith.constant 12 : index
    %602 = memref.load %arg4[%c12_252] : memref<16xf32, #tpu.memory_space<smem>>
    %603 = vector.broadcast %602 : f32 to vector<8x8xf32>
    %604 = arith.addf %601, %603 : vector<8x8xf32>
    %cst_253 = arith.constant 5.000000e-01 : f32
    %605 = vector.broadcast %cst_253 : f32 to vector<8x8xf32>
    %606 = arith.mulf %605, %604 : vector<8x8xf32>
    %607 = arith.mulf %604, %604 : vector<8x8xf32>
    %608 = arith.mulf %607, %604 : vector<8x8xf32>
    %cst_254 = arith.constant 4.471500e-02 : f32
    %609 = vector.broadcast %cst_254 : f32 to vector<8x8xf32>
    %610 = arith.mulf %609, %608 : vector<8x8xf32>
    %611 = arith.addf %604, %610 : vector<8x8xf32>
    %cst_255 = arith.constant 0.797884583 : f32
    %612 = vector.broadcast %cst_255 : f32 to vector<8x8xf32>
    %613 = arith.mulf %612, %611 : vector<8x8xf32>
    %614 = math.tanh %613 : vector<8x8xf32>
    %cst_256 = arith.constant 1.000000e+00 : f32
    %615 = vector.broadcast %cst_256 : f32 to vector<8x8xf32>
    %616 = arith.addf %615, %614 : vector<8x8xf32>
    %617 = arith.mulf %606, %616 : vector<8x8xf32>
    %c12_257 = arith.constant 12 : index
    %c0_258 = arith.constant 0 : index
    %618 = memref.load %arg5[%c12_257, %c0_258] : memref<16x4xf32, #tpu.memory_space<smem>>
    %619 = vector.broadcast %618 : f32 to vector<8x8xf32>
    %620 = arith.mulf %617, %619 : vector<8x8xf32>
    %621 = arith.addf %574, %620 : vector<8x8xf32>
    %c12_259 = arith.constant 12 : index
    %c1_260 = arith.constant 1 : index
    %622 = memref.load %arg5[%c12_259, %c1_260] : memref<16x4xf32, #tpu.memory_space<smem>>
    %623 = vector.broadcast %622 : f32 to vector<8x8xf32>
    %624 = arith.mulf %617, %623 : vector<8x8xf32>
    %625 = arith.addf %578, %624 : vector<8x8xf32>
    %c12_261 = arith.constant 12 : index
    %c2_262 = arith.constant 2 : index
    %626 = memref.load %arg5[%c12_261, %c2_262] : memref<16x4xf32, #tpu.memory_space<smem>>
    %627 = vector.broadcast %626 : f32 to vector<8x8xf32>
    %628 = arith.mulf %617, %627 : vector<8x8xf32>
    %629 = arith.addf %582, %628 : vector<8x8xf32>
    %c12_263 = arith.constant 12 : index
    %c3_264 = arith.constant 3 : index
    %630 = memref.load %arg5[%c12_263, %c3_264] : memref<16x4xf32, #tpu.memory_space<smem>>
    %631 = vector.broadcast %630 : f32 to vector<8x8xf32>
    %632 = arith.mulf %617, %631 : vector<8x8xf32>
    %633 = arith.addf %586, %632 : vector<8x8xf32>
    %c0_265 = arith.constant 0 : index
    %c13 = arith.constant 13 : index
    %634 = memref.load %arg3[%c0_265, %c13] : memref<4x16xf32, #tpu.memory_space<smem>>
    %635 = vector.broadcast %634 : f32 to vector<8x8xf32>
    %636 = arith.mulf %10, %635 : vector<8x8xf32>
    %c1_266 = arith.constant 1 : index
    %c13_267 = arith.constant 13 : index
    %637 = memref.load %arg3[%c1_266, %c13_267] : memref<4x16xf32, #tpu.memory_space<smem>>
    %638 = vector.broadcast %637 : f32 to vector<8x8xf32>
    %639 = arith.mulf %15, %638 : vector<8x8xf32>
    %640 = arith.addf %636, %639 : vector<8x8xf32>
    %c2_268 = arith.constant 2 : index
    %c13_269 = arith.constant 13 : index
    %641 = memref.load %arg3[%c2_268, %c13_269] : memref<4x16xf32, #tpu.memory_space<smem>>
    %642 = vector.broadcast %641 : f32 to vector<8x8xf32>
    %643 = arith.mulf %20, %642 : vector<8x8xf32>
    %644 = arith.addf %640, %643 : vector<8x8xf32>
    %c3_270 = arith.constant 3 : index
    %c13_271 = arith.constant 13 : index
    %645 = memref.load %arg3[%c3_270, %c13_271] : memref<4x16xf32, #tpu.memory_space<smem>>
    %646 = vector.broadcast %645 : f32 to vector<8x8xf32>
    %647 = arith.mulf %26, %646 : vector<8x8xf32>
    %648 = arith.addf %644, %647 : vector<8x8xf32>
    %c13_272 = arith.constant 13 : index
    %649 = memref.load %arg4[%c13_272] : memref<16xf32, #tpu.memory_space<smem>>
    %650 = vector.broadcast %649 : f32 to vector<8x8xf32>
    %651 = arith.addf %648, %650 : vector<8x8xf32>
    %cst_273 = arith.constant 5.000000e-01 : f32
    %652 = vector.broadcast %cst_273 : f32 to vector<8x8xf32>
    %653 = arith.mulf %652, %651 : vector<8x8xf32>
    %654 = arith.mulf %651, %651 : vector<8x8xf32>
    %655 = arith.mulf %654, %651 : vector<8x8xf32>
    %cst_274 = arith.constant 4.471500e-02 : f32
    %656 = vector.broadcast %cst_274 : f32 to vector<8x8xf32>
    %657 = arith.mulf %656, %655 : vector<8x8xf32>
    %658 = arith.addf %651, %657 : vector<8x8xf32>
    %cst_275 = arith.constant 0.797884583 : f32
    %659 = vector.broadcast %cst_275 : f32 to vector<8x8xf32>
    %660 = arith.mulf %659, %658 : vector<8x8xf32>
    %661 = math.tanh %660 : vector<8x8xf32>
    %cst_276 = arith.constant 1.000000e+00 : f32
    %662 = vector.broadcast %cst_276 : f32 to vector<8x8xf32>
    %663 = arith.addf %662, %661 : vector<8x8xf32>
    %664 = arith.mulf %653, %663 : vector<8x8xf32>
    %c13_277 = arith.constant 13 : index
    %c0_278 = arith.constant 0 : index
    %665 = memref.load %arg5[%c13_277, %c0_278] : memref<16x4xf32, #tpu.memory_space<smem>>
    %666 = vector.broadcast %665 : f32 to vector<8x8xf32>
    %667 = arith.mulf %664, %666 : vector<8x8xf32>
    %668 = arith.addf %621, %667 : vector<8x8xf32>
    %c13_279 = arith.constant 13 : index
    %c1_280 = arith.constant 1 : index
    %669 = memref.load %arg5[%c13_279, %c1_280] : memref<16x4xf32, #tpu.memory_space<smem>>
    %670 = vector.broadcast %669 : f32 to vector<8x8xf32>
    %671 = arith.mulf %664, %670 : vector<8x8xf32>
    %672 = arith.addf %625, %671 : vector<8x8xf32>
    %c13_281 = arith.constant 13 : index
    %c2_282 = arith.constant 2 : index
    %673 = memref.load %arg5[%c13_281, %c2_282] : memref<16x4xf32, #tpu.memory_space<smem>>
    %674 = vector.broadcast %673 : f32 to vector<8x8xf32>
    %675 = arith.mulf %664, %674 : vector<8x8xf32>
    %676 = arith.addf %629, %675 : vector<8x8xf32>
    %c13_283 = arith.constant 13 : index
    %c3_284 = arith.constant 3 : index
    %677 = memref.load %arg5[%c13_283, %c3_284] : memref<16x4xf32, #tpu.memory_space<smem>>
    %678 = vector.broadcast %677 : f32 to vector<8x8xf32>
    %679 = arith.mulf %664, %678 : vector<8x8xf32>
    %680 = arith.addf %633, %679 : vector<8x8xf32>
    %c0_285 = arith.constant 0 : index
    %c14 = arith.constant 14 : index
    %681 = memref.load %arg3[%c0_285, %c14] : memref<4x16xf32, #tpu.memory_space<smem>>
    %682 = vector.broadcast %681 : f32 to vector<8x8xf32>
    %683 = arith.mulf %10, %682 : vector<8x8xf32>
    %c1_286 = arith.constant 1 : index
    %c14_287 = arith.constant 14 : index
    %684 = memref.load %arg3[%c1_286, %c14_287] : memref<4x16xf32, #tpu.memory_space<smem>>
    %685 = vector.broadcast %684 : f32 to vector<8x8xf32>
    %686 = arith.mulf %15, %685 : vector<8x8xf32>
    %687 = arith.addf %683, %686 : vector<8x8xf32>
    %c2_288 = arith.constant 2 : index
    %c14_289 = arith.constant 14 : index
    %688 = memref.load %arg3[%c2_288, %c14_289] : memref<4x16xf32, #tpu.memory_space<smem>>
    %689 = vector.broadcast %688 : f32 to vector<8x8xf32>
    %690 = arith.mulf %20, %689 : vector<8x8xf32>
    %691 = arith.addf %687, %690 : vector<8x8xf32>
    %c3_290 = arith.constant 3 : index
    %c14_291 = arith.constant 14 : index
    %692 = memref.load %arg3[%c3_290, %c14_291] : memref<4x16xf32, #tpu.memory_space<smem>>
    %693 = vector.broadcast %692 : f32 to vector<8x8xf32>
    %694 = arith.mulf %26, %693 : vector<8x8xf32>
    %695 = arith.addf %691, %694 : vector<8x8xf32>
    %c14_292 = arith.constant 14 : index
    %696 = memref.load %arg4[%c14_292] : memref<16xf32, #tpu.memory_space<smem>>
    %697 = vector.broadcast %696 : f32 to vector<8x8xf32>
    %698 = arith.addf %695, %697 : vector<8x8xf32>
    %cst_293 = arith.constant 5.000000e-01 : f32
    %699 = vector.broadcast %cst_293 : f32 to vector<8x8xf32>
    %700 = arith.mulf %699, %698 : vector<8x8xf32>
    %701 = arith.mulf %698, %698 : vector<8x8xf32>
    %702 = arith.mulf %701, %698 : vector<8x8xf32>
    %cst_294 = arith.constant 4.471500e-02 : f32
    %703 = vector.broadcast %cst_294 : f32 to vector<8x8xf32>
    %704 = arith.mulf %703, %702 : vector<8x8xf32>
    %705 = arith.addf %698, %704 : vector<8x8xf32>
    %cst_295 = arith.constant 0.797884583 : f32
    %706 = vector.broadcast %cst_295 : f32 to vector<8x8xf32>
    %707 = arith.mulf %706, %705 : vector<8x8xf32>
    %708 = math.tanh %707 : vector<8x8xf32>
    %cst_296 = arith.constant 1.000000e+00 : f32
    %709 = vector.broadcast %cst_296 : f32 to vector<8x8xf32>
    %710 = arith.addf %709, %708 : vector<8x8xf32>
    %711 = arith.mulf %700, %710 : vector<8x8xf32>
    %c14_297 = arith.constant 14 : index
    %c0_298 = arith.constant 0 : index
    %712 = memref.load %arg5[%c14_297, %c0_298] : memref<16x4xf32, #tpu.memory_space<smem>>
    %713 = vector.broadcast %712 : f32 to vector<8x8xf32>
    %714 = arith.mulf %711, %713 : vector<8x8xf32>
    %715 = arith.addf %668, %714 : vector<8x8xf32>
    %c14_299 = arith.constant 14 : index
    %c1_300 = arith.constant 1 : index
    %716 = memref.load %arg5[%c14_299, %c1_300] : memref<16x4xf32, #tpu.memory_space<smem>>
    %717 = vector.broadcast %716 : f32 to vector<8x8xf32>
    %718 = arith.mulf %711, %717 : vector<8x8xf32>
    %719 = arith.addf %672, %718 : vector<8x8xf32>
    %c14_301 = arith.constant 14 : index
    %c2_302 = arith.constant 2 : index
    %720 = memref.load %arg5[%c14_301, %c2_302] : memref<16x4xf32, #tpu.memory_space<smem>>
    %721 = vector.broadcast %720 : f32 to vector<8x8xf32>
    %722 = arith.mulf %711, %721 : vector<8x8xf32>
    %723 = arith.addf %676, %722 : vector<8x8xf32>
    %c14_303 = arith.constant 14 : index
    %c3_304 = arith.constant 3 : index
    %724 = memref.load %arg5[%c14_303, %c3_304] : memref<16x4xf32, #tpu.memory_space<smem>>
    %725 = vector.broadcast %724 : f32 to vector<8x8xf32>
    %726 = arith.mulf %711, %725 : vector<8x8xf32>
    %727 = arith.addf %680, %726 : vector<8x8xf32>
    %c0_305 = arith.constant 0 : index
    %c15 = arith.constant 15 : index
    %728 = memref.load %arg3[%c0_305, %c15] : memref<4x16xf32, #tpu.memory_space<smem>>
    %729 = vector.broadcast %728 : f32 to vector<8x8xf32>
    %730 = arith.mulf %10, %729 : vector<8x8xf32>
    %c1_306 = arith.constant 1 : index
    %c15_307 = arith.constant 15 : index
    %731 = memref.load %arg3[%c1_306, %c15_307] : memref<4x16xf32, #tpu.memory_space<smem>>
    %732 = vector.broadcast %731 : f32 to vector<8x8xf32>
    %733 = arith.mulf %15, %732 : vector<8x8xf32>
    %734 = arith.addf %730, %733 : vector<8x8xf32>
    %c2_308 = arith.constant 2 : index
    %c15_309 = arith.constant 15 : index
    %735 = memref.load %arg3[%c2_308, %c15_309] : memref<4x16xf32, #tpu.memory_space<smem>>
    %736 = vector.broadcast %735 : f32 to vector<8x8xf32>
    %737 = arith.mulf %20, %736 : vector<8x8xf32>
    %738 = arith.addf %734, %737 : vector<8x8xf32>
    %c3_310 = arith.constant 3 : index
    %c15_311 = arith.constant 15 : index
    %739 = memref.load %arg3[%c3_310, %c15_311] : memref<4x16xf32, #tpu.memory_space<smem>>
    %740 = vector.broadcast %739 : f32 to vector<8x8xf32>
    %741 = arith.mulf %26, %740 : vector<8x8xf32>
    %742 = arith.addf %738, %741 : vector<8x8xf32>
    %c15_312 = arith.constant 15 : index
    %743 = memref.load %arg4[%c15_312] : memref<16xf32, #tpu.memory_space<smem>>
    %744 = vector.broadcast %743 : f32 to vector<8x8xf32>
    %745 = arith.addf %742, %744 : vector<8x8xf32>
    %cst_313 = arith.constant 5.000000e-01 : f32
    %746 = vector.broadcast %cst_313 : f32 to vector<8x8xf32>
    %747 = arith.mulf %746, %745 : vector<8x8xf32>
    %748 = arith.mulf %745, %745 : vector<8x8xf32>
    %749 = arith.mulf %748, %745 : vector<8x8xf32>
    %cst_314 = arith.constant 4.471500e-02 : f32
    %750 = vector.broadcast %cst_314 : f32 to vector<8x8xf32>
    %751 = arith.mulf %750, %749 : vector<8x8xf32>
    %752 = arith.addf %745, %751 : vector<8x8xf32>
    %cst_315 = arith.constant 0.797884583 : f32
    %753 = vector.broadcast %cst_315 : f32 to vector<8x8xf32>
    %754 = arith.mulf %753, %752 : vector<8x8xf32>
    %755 = math.tanh %754 : vector<8x8xf32>
    %cst_316 = arith.constant 1.000000e+00 : f32
    %756 = vector.broadcast %cst_316 : f32 to vector<8x8xf32>
    %757 = arith.addf %756, %755 : vector<8x8xf32>
    %758 = arith.mulf %747, %757 : vector<8x8xf32>
    %c15_317 = arith.constant 15 : index
    %c0_318 = arith.constant 0 : index
    %759 = memref.load %arg5[%c15_317, %c0_318] : memref<16x4xf32, #tpu.memory_space<smem>>
    %760 = vector.broadcast %759 : f32 to vector<8x8xf32>
    %761 = arith.mulf %758, %760 : vector<8x8xf32>
    %762 = arith.addf %715, %761 : vector<8x8xf32>
    %c15_319 = arith.constant 15 : index
    %c1_320 = arith.constant 1 : index
    %763 = memref.load %arg5[%c15_319, %c1_320] : memref<16x4xf32, #tpu.memory_space<smem>>
    %764 = vector.broadcast %763 : f32 to vector<8x8xf32>
    %765 = arith.mulf %758, %764 : vector<8x8xf32>
    %766 = arith.addf %719, %765 : vector<8x8xf32>
    %c15_321 = arith.constant 15 : index
    %c2_322 = arith.constant 2 : index
    %767 = memref.load %arg5[%c15_321, %c2_322] : memref<16x4xf32, #tpu.memory_space<smem>>
    %768 = vector.broadcast %767 : f32 to vector<8x8xf32>
    %769 = arith.mulf %758, %768 : vector<8x8xf32>
    %770 = arith.addf %723, %769 : vector<8x8xf32>
    %c15_323 = arith.constant 15 : index
    %c3_324 = arith.constant 3 : index
    %771 = memref.load %arg5[%c15_323, %c3_324] : memref<16x4xf32, #tpu.memory_space<smem>>
    %772 = vector.broadcast %771 : f32 to vector<8x8xf32>
    %773 = arith.mulf %758, %772 : vector<8x8xf32>
    %774 = arith.addf %727, %773 : vector<8x8xf32>
    %775 = tpu.iota {dimensions = array<i32: 1>} : vector<1x8xi32>
    %c1_i32 = arith.constant 1 : i32
    %776 = vector.broadcast %c1_i32 : i32 to vector<1x8xi32>
    %777 = arith.cmpi sge, %775, %776 : vector<1x8xi32>
    %778 = tpu.iota {dimensions = array<i32: 0>} : vector<8x1xi32>
    %779 = vector.broadcast %1 : i32 to vector<8x1xi32>
    %780 = arith.addi %779, %778 : vector<8x1xi32>
    %c1_i32_325 = arith.constant 1 : i32
    %781 = vector.broadcast %c1_i32_325 : i32 to vector<8x1xi32>
    %782 = arith.cmpi sge, %780, %781 : vector<8x1xi32>
    %783 = vector.broadcast %782 : vector<8x1xi1> to vector<8x8xi1>
    %784 = vector.broadcast %777 : vector<1x8xi1> to vector<8x8xi1>
    %785 = arith.andi %783, %784 : vector<8x8xi1>
    %c0_326 = arith.constant 0 : index
    %786 = memref.load %arg2[%c0_326] : memref<1xf32, #tpu.memory_space<smem>>
    %c0_327 = arith.constant 0 : index
    %c0_328 = arith.constant 0 : index
    %c0_329 = arith.constant 0 : index
    %787 = vector.load %arg7[%c0_327, %c0_328, %c0_329] : memref<1x1x8xf32, #tpu.memory_space<vmem>>, vector<1x1x8xf32>
    %788 = vector.shape_cast %787 : vector<1x1x8xf32> to vector<1x8xf32>
    %cst_330 = arith.constant 5.000000e-01 : f32
    %789 = vector.broadcast %cst_330 : f32 to vector<1x8xf32>
    %790 = arith.cmpf ogt, %788, %789 : vector<1x8xf32>
    %c0_331 = arith.constant 0 : index
    %791 = memref.load %arg6[%c0_331] : memref<4xf32, #tpu.memory_space<smem>>
    %792 = vector.broadcast %791 : f32 to vector<8x8xf32>
    %793 = arith.addf %762, %792 : vector<8x8xf32>
    %cst_332 = arith.constant 0.000000e+00 : f32
    %794 = vector.broadcast %cst_332 : f32 to vector<8x8xf32>
    %795 = arith.select %785, %793, %794 : vector<8x8xi1>, vector<8x8xf32>
    %c0_333 = arith.constant 0 : index
    %796 = arith.index_cast %1 : i32 to index
    %c0_334 = arith.constant 0 : index
    %797 = vector.load %arg10[%c0_333, %796, %c0_334] : memref<1x8x96xf32, #tpu.memory_space<vmem>>, vector<1x8x8xf32>
    %798 = vector.shape_cast %797 : vector<1x8x8xf32> to vector<8x8xf32>
    %c0_335 = arith.constant 0 : index
    %c0_336 = arith.constant 0 : index
    %c32 = arith.constant 32 : index
    %799 = vector.load %arg10[%c0_335, %c0_336, %c32] : memref<1x8x96xf32, #tpu.memory_space<vmem>>, vector<1x8x8xf32>
    %800 = vector.shape_cast %799 : vector<1x8x8xf32> to vector<8x8xf32>
    %c0_337 = arith.constant 0 : index
    %c0_338 = arith.constant 0 : index
    %c64 = arith.constant 64 : index
    %801 = vector.load %arg10[%c0_337, %c0_338, %c64] : memref<1x8x96xf32, #tpu.memory_space<vmem>>, vector<1x8x8xf32>
    %802 = vector.shape_cast %801 : vector<1x8x8xf32> to vector<8x8xf32>
    %cst_339 = arith.constant dense<0.000000e+00> : vector<8x8xf32>
    %803 = tpu.matmul %798, %800, %cst_339 {dimension_numbers = #tpu.dot_dimension_numbers<[1], [1], [0], [0], [0, 0, 1, 0], [], []>} : vector<8x8xf32>, vector<8x8xf32>, vector<8x8xf32> -> vector<8x8xf32>
    %cst_340 = arith.constant 0.353553385 : f32
    %804 = vector.broadcast %cst_340 : f32 to vector<8x8xf32>
    %805 = arith.mulf %803, %804 : vector<8x8xf32>
    %806 = vector.broadcast %786 : f32 to vector<8x8xf32>
    %807 = arith.mulf %806, %795 : vector<8x8xf32>
    %808 = arith.addf %805, %807 : vector<8x8xf32>
    %cst_341 = arith.constant 0xFF800000 : f32
    %809 = vector.shape_cast %790 : vector<1x8xi1> to vector<1x8xi1>
    %810 = vector.broadcast %809 : vector<1x8xi1> to vector<8x8xi1>
    %811 = vector.broadcast %cst_341 : f32 to vector<8x8xf32>
    %812 = arith.select %810, %811, %808 : vector<8x8xi1>, vector<8x8xf32>
    %cst_342 = arith.constant dense<0xFF800000> : vector<8xf32>
    %813 = vector.multi_reduction <maximumf>, %812, %cst_342 [1] : vector<8x8xf32> to vector<8xf32>
    %814 = vector.shape_cast %813 : vector<8xf32> to vector<8x1xf32>
    %815 = vector.broadcast %814 : vector<8x1xf32> to vector<8x8xf32>
    %816 = arith.subf %812, %815 : vector<8x8xf32>
    %817 = math.exp %816 : vector<8x8xf32>
    %cst_343 = arith.constant dense<0.000000e+00> : vector<8xf32>
    %818 = vector.multi_reduction <add>, %817, %cst_343 [1] : vector<8x8xf32> to vector<8xf32>
    %819 = vector.shape_cast %818 : vector<8xf32> to vector<8x1xf32>
    %820 = tpu.reciprocal %819 : vector<8x1xf32> -> vector<8x1xf32>
    %821 = vector.broadcast %820 : vector<8x1xf32> to vector<8x8xf32>
    %822 = arith.mulf %817, %821 : vector<8x8xf32>
    %c0_344 = arith.constant 0 : index
    %c0_345 = arith.constant 0 : index
    %c0_346 = arith.constant 0 : index
    %c0_347 = arith.constant 0 : index
    %823 = vector.load %arg12[%c0_344, %c0_345, %c0_346, %c0_347] : memref<1x4x8x8xf32, #tpu.memory_space<vmem>>, vector<1x1x8x8xf32>
    %824 = vector.shape_cast %823 : vector<1x1x8x8xf32> to vector<8x8xf32>
    %825 = vector.shape_cast %822 : vector<8x8xf32> to vector<1x1x8x8xf32>
    tpu.vector_store %arg12[%c0_344, %c0_345, %c0_346, %c0_347], %825 {strides = array<i32>} : memref<1x4x8x8xf32, #tpu.memory_space<vmem>>, vector<1x1x8x8xf32>,
    %cst_348 = arith.constant dense<0.000000e+00> : vector<8x8xf32>
    %826 = tpu.matmul %822, %802, %cst_348 {dimension_numbers = #tpu.dot_dimension_numbers<[1], [0], [0], [1], [0, 0, 1, 1], [], []>} : vector<8x8xf32>, vector<8x8xf32>, vector<8x8xf32> -> vector<8x8xf32>
    %c1_349 = arith.constant 1 : index
    %827 = memref.load %arg6[%c1_349] : memref<4xf32, #tpu.memory_space<smem>>
    %828 = vector.broadcast %827 : f32 to vector<8x8xf32>
    %829 = arith.addf %766, %828 : vector<8x8xf32>
    %cst_350 = arith.constant 0.000000e+00 : f32
    %830 = vector.broadcast %cst_350 : f32 to vector<8x8xf32>
    %831 = arith.select %785, %829, %830 : vector<8x8xi1>, vector<8x8xf32>
    %c0_351 = arith.constant 0 : index
    %832 = arith.index_cast %1 : i32 to index
    %c8_352 = arith.constant 8 : index
    %833 = vector.load %arg10[%c0_351, %832, %c8_352] : memref<1x8x96xf32, #tpu.memory_space<vmem>>, vector<1x8x8xf32>
    %834 = vector.shape_cast %833 : vector<1x8x8xf32> to vector<8x8xf32>
    %c0_353 = arith.constant 0 : index
    %c0_354 = arith.constant 0 : index
    %c40 = arith.constant 40 : index
    %835 = vector.load %arg10[%c0_353, %c0_354, %c40] : memref<1x8x96xf32, #tpu.memory_space<vmem>>, vector<1x8x8xf32>
    %836 = vector.shape_cast %835 : vector<1x8x8xf32> to vector<8x8xf32>
    %c0_355 = arith.constant 0 : index
    %c0_356 = arith.constant 0 : index
    %c72 = arith.constant 72 : index
    %837 = vector.load %arg10[%c0_355, %c0_356, %c72] : memref<1x8x96xf32, #tpu.memory_space<vmem>>, vector<1x8x8xf32>
    %838 = vector.shape_cast %837 : vector<1x8x8xf32> to vector<8x8xf32>
    %cst_357 = arith.constant dense<0.000000e+00> : vector<8x8xf32>
    %839 = tpu.matmul %834, %836, %cst_357 {dimension_numbers = #tpu.dot_dimension_numbers<[1], [1], [0], [0], [0, 0, 1, 0], [], []>} : vector<8x8xf32>, vector<8x8xf32>, vector<8x8xf32> -> vector<8x8xf32>
    %cst_358 = arith.constant 0.353553385 : f32
    %840 = vector.broadcast %cst_358 : f32 to vector<8x8xf32>
    %841 = arith.mulf %839, %840 : vector<8x8xf32>
    %842 = vector.broadcast %786 : f32 to vector<8x8xf32>
    %843 = arith.mulf %842, %831 : vector<8x8xf32>
    %844 = arith.addf %841, %843 : vector<8x8xf32>
    %cst_359 = arith.constant 0xFF800000 : f32
    %845 = vector.shape_cast %790 : vector<1x8xi1> to vector<1x8xi1>
    %846 = vector.broadcast %845 : vector<1x8xi1> to vector<8x8xi1>
    %847 = vector.broadcast %cst_359 : f32 to vector<8x8xf32>
    %848 = arith.select %846, %847, %844 : vector<8x8xi1>, vector<8x8xf32>
    %cst_360 = arith.constant dense<0xFF800000> : vector<8xf32>
    %849 = vector.multi_reduction <maximumf>, %848, %cst_360 [1] : vector<8x8xf32> to vector<8xf32>
    %850 = vector.shape_cast %849 : vector<8xf32> to vector<8x1xf32>
    %851 = vector.broadcast %850 : vector<8x1xf32> to vector<8x8xf32>
    %852 = arith.subf %848, %851 : vector<8x8xf32>
    %853 = math.exp %852 : vector<8x8xf32>
    %cst_361 = arith.constant dense<0.000000e+00> : vector<8xf32>
    %854 = vector.multi_reduction <add>, %853, %cst_361 [1] : vector<8x8xf32> to vector<8xf32>
    %855 = vector.shape_cast %854 : vector<8xf32> to vector<8x1xf32>
    %856 = tpu.reciprocal %855 : vector<8x1xf32> -> vector<8x1xf32>
    %857 = vector.broadcast %856 : vector<8x1xf32> to vector<8x8xf32>
    %858 = arith.mulf %853, %857 : vector<8x8xf32>
    %c0_362 = arith.constant 0 : index
    %c1_363 = arith.constant 1 : index
    %c0_364 = arith.constant 0 : index
    %c0_365 = arith.constant 0 : index
    %859 = vector.load %arg12[%c0_362, %c1_363, %c0_364, %c0_365] : memref<1x4x8x8xf32, #tpu.memory_space<vmem>>, vector<1x1x8x8xf32>
    %860 = vector.shape_cast %859 : vector<1x1x8x8xf32> to vector<8x8xf32>
    %861 = vector.shape_cast %858 : vector<8x8xf32> to vector<1x1x8x8xf32>
    tpu.vector_store %arg12[%c0_362, %c1_363, %c0_364, %c0_365], %861 {strides = array<i32>} : memref<1x4x8x8xf32, #tpu.memory_space<vmem>>, vector<1x1x8x8xf32>,
    %cst_366 = arith.constant dense<0.000000e+00> : vector<8x8xf32>
    %862 = tpu.matmul %858, %838, %cst_366 {dimension_numbers = #tpu.dot_dimension_numbers<[1], [0], [0], [1], [0, 0, 1, 1], [], []>} : vector<8x8xf32>, vector<8x8xf32>, vector<8x8xf32> -> vector<8x8xf32>
    %c2_367 = arith.constant 2 : index
    %863 = memref.load %arg6[%c2_367] : memref<4xf32, #tpu.memory_space<smem>>
    %864 = vector.broadcast %863 : f32 to vector<8x8xf32>
    %865 = arith.addf %770, %864 : vector<8x8xf32>
    %cst_368 = arith.constant 0.000000e+00 : f32
    %866 = vector.broadcast %cst_368 : f32 to vector<8x8xf32>
    %867 = arith.select %785, %865, %866 : vector<8x8xi1>, vector<8x8xf32>
    %c0_369 = arith.constant 0 : index
    %868 = arith.index_cast %1 : i32 to index
    %c16 = arith.constant 16 : index
    %869 = vector.load %arg10[%c0_369, %868, %c16] : memref<1x8x96xf32, #tpu.memory_space<vmem>>, vector<1x8x8xf32>
    %870 = vector.shape_cast %869 : vector<1x8x8xf32> to vector<8x8xf32>
    %c0_370 = arith.constant 0 : index
    %c0_371 = arith.constant 0 : index
    %c48 = arith.constant 48 : index
    %871 = vector.load %arg10[%c0_370, %c0_371, %c48] : memref<1x8x96xf32, #tpu.memory_space<vmem>>, vector<1x8x8xf32>
    %872 = vector.shape_cast %871 : vector<1x8x8xf32> to vector<8x8xf32>
    %c0_372 = arith.constant 0 : index
    %c0_373 = arith.constant 0 : index
    %c80 = arith.constant 80 : index
    %873 = vector.load %arg10[%c0_372, %c0_373, %c80] : memref<1x8x96xf32, #tpu.memory_space<vmem>>, vector<1x8x8xf32>
    %874 = vector.shape_cast %873 : vector<1x8x8xf32> to vector<8x8xf32>
    %cst_374 = arith.constant dense<0.000000e+00> : vector<8x8xf32>
    %875 = tpu.matmul %870, %872, %cst_374 {dimension_numbers = #tpu.dot_dimension_numbers<[1], [1], [0], [0], [0, 0, 1, 0], [], []>} : vector<8x8xf32>, vector<8x8xf32>, vector<8x8xf32> -> vector<8x8xf32>
    %cst_375 = arith.constant 0.353553385 : f32
    %876 = vector.broadcast %cst_375 : f32 to vector<8x8xf32>
    %877 = arith.mulf %875, %876 : vector<8x8xf32>
    %878 = vector.broadcast %786 : f32 to vector<8x8xf32>
    %879 = arith.mulf %878, %867 : vector<8x8xf32>
    %880 = arith.addf %877, %879 : vector<8x8xf32>
    %cst_376 = arith.constant 0xFF800000 : f32
    %881 = vector.shape_cast %790 : vector<1x8xi1> to vector<1x8xi1>
    %882 = vector.broadcast %881 : vector<1x8xi1> to vector<8x8xi1>
    %883 = vector.broadcast %cst_376 : f32 to vector<8x8xf32>
    %884 = arith.select %882, %883, %880 : vector<8x8xi1>, vector<8x8xf32>
    %cst_377 = arith.constant dense<0xFF800000> : vector<8xf32>
    %885 = vector.multi_reduction <maximumf>, %884, %cst_377 [1] : vector<8x8xf32> to vector<8xf32>
    %886 = vector.shape_cast %885 : vector<8xf32> to vector<8x1xf32>
    %887 = vector.broadcast %886 : vector<8x1xf32> to vector<8x8xf32>
    %888 = arith.subf %884, %887 : vector<8x8xf32>
    %889 = math.exp %888 : vector<8x8xf32>
    %cst_378 = arith.constant dense<0.000000e+00> : vector<8xf32>
    %890 = vector.multi_reduction <add>, %889, %cst_378 [1] : vector<8x8xf32> to vector<8xf32>
    %891 = vector.shape_cast %890 : vector<8xf32> to vector<8x1xf32>
    %892 = tpu.reciprocal %891 : vector<8x1xf32> -> vector<8x1xf32>
    %893 = vector.broadcast %892 : vector<8x1xf32> to vector<8x8xf32>
    %894 = arith.mulf %889, %893 : vector<8x8xf32>
    %c0_379 = arith.constant 0 : index
    %c2_380 = arith.constant 2 : index
    %c0_381 = arith.constant 0 : index
    %c0_382 = arith.constant 0 : index
    %895 = vector.load %arg12[%c0_379, %c2_380, %c0_381, %c0_382] : memref<1x4x8x8xf32, #tpu.memory_space<vmem>>, vector<1x1x8x8xf32>
    %896 = vector.shape_cast %895 : vector<1x1x8x8xf32> to vector<8x8xf32>
    %897 = vector.shape_cast %894 : vector<8x8xf32> to vector<1x1x8x8xf32>
    tpu.vector_store %arg12[%c0_379, %c2_380, %c0_381, %c0_382], %897 {strides = array<i32>} : memref<1x4x8x8xf32, #tpu.memory_space<vmem>>, vector<1x1x8x8xf32>,
    %cst_383 = arith.constant dense<0.000000e+00> : vector<8x8xf32>
    %898 = tpu.matmul %894, %874, %cst_383 {dimension_numbers = #tpu.dot_dimension_numbers<[1], [0], [0], [1], [0, 0, 1, 1], [], []>} : vector<8x8xf32>, vector<8x8xf32>, vector<8x8xf32> -> vector<8x8xf32>
    %c3_384 = arith.constant 3 : index
    %899 = memref.load %arg6[%c3_384] : memref<4xf32, #tpu.memory_space<smem>>
    %900 = vector.broadcast %899 : f32 to vector<8x8xf32>
    %901 = arith.addf %774, %900 : vector<8x8xf32>
    %cst_385 = arith.constant 0.000000e+00 : f32
    %902 = vector.broadcast %cst_385 : f32 to vector<8x8xf32>
    %903 = arith.select %785, %901, %902 : vector<8x8xi1>, vector<8x8xf32>
    %c0_386 = arith.constant 0 : index
    %904 = arith.index_cast %1 : i32 to index
    %c24 = arith.constant 24 : index
    %905 = vector.load %arg10[%c0_386, %904, %c24] : memref<1x8x96xf32, #tpu.memory_space<vmem>>, vector<1x8x8xf32>
    %906 = vector.shape_cast %905 : vector<1x8x8xf32> to vector<8x8xf32>
    %c0_387 = arith.constant 0 : index
    %c0_388 = arith.constant 0 : index
    %c56 = arith.constant 56 : index
    %907 = vector.load %arg10[%c0_387, %c0_388, %c56] : memref<1x8x96xf32, #tpu.memory_space<vmem>>, vector<1x8x8xf32>
    %908 = vector.shape_cast %907 : vector<1x8x8xf32> to vector<8x8xf32>
    %c0_389 = arith.constant 0 : index
    %c0_390 = arith.constant 0 : index
    %c88 = arith.constant 88 : index
    %909 = vector.load %arg10[%c0_389, %c0_390, %c88] : memref<1x8x96xf32, #tpu.memory_space<vmem>>, vector<1x8x8xf32>
    %910 = vector.shape_cast %909 : vector<1x8x8xf32> to vector<8x8xf32>
    %cst_391 = arith.constant dense<0.000000e+00> : vector<8x8xf32>
    %911 = tpu.matmul %906, %908, %cst_391 {dimension_numbers = #tpu.dot_dimension_numbers<[1], [1], [0], [0], [0, 0, 1, 0], [], []>} : vector<8x8xf32>, vector<8x8xf32>, vector<8x8xf32> -> vector<8x8xf32>
    %cst_392 = arith.constant 0.353553385 : f32
    %912 = vector.broadcast %cst_392 : f32 to vector<8x8xf32>
    %913 = arith.mulf %911, %912 : vector<8x8xf32>
    %914 = vector.broadcast %786 : f32 to vector<8x8xf32>
    %915 = arith.mulf %914, %903 : vector<8x8xf32>
    %916 = arith.addf %913, %915 : vector<8x8xf32>
    %cst_393 = arith.constant 0xFF800000 : f32
    %917 = vector.shape_cast %790 : vector<1x8xi1> to vector<1x8xi1>
    %918 = vector.broadcast %917 : vector<1x8xi1> to vector<8x8xi1>
    %919 = vector.broadcast %cst_393 : f32 to vector<8x8xf32>
    %920 = arith.select %918, %919, %916 : vector<8x8xi1>, vector<8x8xf32>
    %cst_394 = arith.constant dense<0xFF800000> : vector<8xf32>
    %921 = vector.multi_reduction <maximumf>, %920, %cst_394 [1] : vector<8x8xf32> to vector<8xf32>
    %922 = vector.shape_cast %921 : vector<8xf32> to vector<8x1xf32>
    %923 = vector.broadcast %922 : vector<8x1xf32> to vector<8x8xf32>
    %924 = arith.subf %920, %923 : vector<8x8xf32>
    %925 = math.exp %924 : vector<8x8xf32>
    %cst_395 = arith.constant dense<0.000000e+00> : vector<8xf32>
    %926 = vector.multi_reduction <add>, %925, %cst_395 [1] : vector<8x8xf32> to vector<8xf32>
    %927 = vector.shape_cast %926 : vector<8xf32> to vector<8x1xf32>
    %928 = tpu.reciprocal %927 : vector<8x1xf32> -> vector<8x1xf32>
    %929 = vector.broadcast %928 : vector<8x1xf32> to vector<8x8xf32>
    %930 = arith.mulf %925, %929 : vector<8x8xf32>
    %c0_396 = arith.constant 0 : index
    %c3_397 = arith.constant 3 : index
    %c0_398 = arith.constant 0 : index
    %c0_399 = arith.constant 0 : index
    %931 = vector.load %arg12[%c0_396, %c3_397, %c0_398, %c0_399] : memref<1x4x8x8xf32, #tpu.memory_space<vmem>>, vector<1x1x8x8xf32>
    %932 = vector.shape_cast %931 : vector<1x1x8x8xf32> to vector<8x8xf32>
    %933 = vector.shape_cast %930 : vector<8x8xf32> to vector<1x1x8x8xf32>
    tpu.vector_store %arg12[%c0_396, %c3_397, %c0_398, %c0_399], %933 {strides = array<i32>} : memref<1x4x8x8xf32, #tpu.memory_space<vmem>>, vector<1x1x8x8xf32>,
    %cst_400 = arith.constant dense<0.000000e+00> : vector<8x8xf32>
    %934 = tpu.matmul %930, %910, %cst_400 {dimension_numbers = #tpu.dot_dimension_numbers<[1], [0], [0], [1], [0, 0, 1, 1], [], []>} : vector<8x8xf32>, vector<8x8xf32>, vector<8x8xf32> -> vector<8x8xf32>
    %935 = tpu.concatenate %826, %862, %898, %934 in 1 : vector<8x8xf32>, vector<8x8xf32>, vector<8x8xf32>, vector<8x8xf32> -> vector<8x32xf32>
    %c0_401 = arith.constant 0 : index
    %c0_402 = arith.constant 0 : index
    %c0_403 = arith.constant 0 : index
    %936 = vector.load %arg11[%c0_401, %c0_402, %c0_403] : memref<1x8x32xf32, #tpu.memory_space<vmem>>, vector<1x8x32xf32>
    %937 = vector.shape_cast %936 : vector<1x8x32xf32> to vector<8x32xf32>
    %938 = vector.shape_cast %935 : vector<8x32xf32> to vector<1x8x32xf32>
    tpu.vector_store %arg11[%c0_401, %c0_402, %c0_403], %938 {strides = array<i32>} : memref<1x8x32xf32, #tpu.memory_space<vmem>>, vector<1x8x32xf32>,
    return
  }
  func.func @transform_0(%arg0: i32, %arg1: i32) -> i32 {
    %c0_i32 = arith.constant 0 : i32
    %c0_i32_0 = arith.constant 0 : i32
    return %c0_i32 : i32
  }
  func.func @transform_1(%arg0: i32, %arg1: i32) -> (i32, i32) {
    %c0_i32 = arith.constant 0 : i32
    %c0_i32_0 = arith.constant 0 : i32
    %c0_i32_1 = arith.constant 0 : i32
    return %c0_i32, %c0_i32_0 : i32, i32
  }
  func.func @transform_2(%arg0: i32, %arg1: i32) -> i32 {
    %c0_i32 = arith.constant 0 : i32
    %c0_i32_0 = arith.constant 0 : i32
    return %c0_i32 : i32
  }
  func.func @transform_3(%arg0: i32, %arg1: i32) -> (i32, i32) {
    %c0_i32 = arith.constant 0 : i32
    %c0_i32_0 = arith.constant 0 : i32
    %c0_i32_1 = arith.constant 0 : i32
    return %c0_i32, %c0_i32_0 : i32, i32
  }
  func.func @transform_4(%arg0: i32, %arg1: i32) -> i32 {
    %c0_i32 = arith.constant 0 : i32
    %c0_i32_0 = arith.constant 0 : i32
    return %c0_i32 : i32
  }
  func.func @transform_5(%arg0: i32, %arg1: i32) -> (i32, i32, i32) {
    %c0_i32 = arith.constant 0 : i32
    %c0_i32_0 = arith.constant 0 : i32
    %c0_i32_1 = arith.constant 0 : i32
    return %arg0, %c0_i32, %c0_i32_0 : i32, i32, i32
  }
  func.func @transform_6(%arg0: i32, %arg1: i32) -> (i32, i32, i32) {
    %c0_i32 = arith.constant 0 : i32
    %c0_i32_0 = arith.constant 0 : i32
    return %arg0, %arg1, %c0_i32 : i32, i32, i32
  }
  func.func @transform_7(%arg0: i32, %arg1: i32) -> (i32, i32, i32) {
    %c0_i32 = arith.constant 0 : i32
    %c0_i32_0 = arith.constant 0 : i32
    %c0_i32_1 = arith.constant 0 : i32
    return %arg0, %c0_i32, %c0_i32_0 : i32, i32, i32
  }
  func.func @transform_8(%arg0: i32, %arg1: i32) -> (i32, i32, i32) {
    %c0_i32 = arith.constant 0 : i32
    %c0_i32_0 = arith.constant 0 : i32
    %c0_i32_1 = arith.constant 0 : i32
    return %arg0, %c0_i32, %c0_i32_0 : i32, i32, i32
  }
  func.func @transform_9(%arg0: i32, %arg1: i32) -> (i32, i32, i32) {
    %c0_i32 = arith.constant 0 : i32
    %c0_i32_0 = arith.constant 0 : i32
    return %arg0, %arg1, %c0_i32 : i32, i32, i32
  }
  func.func @transform_10(%arg0: i32, %arg1: i32) -> (i32, i32, i32, i32) {
    %c0_i32 = arith.constant 0 : i32
    %c0_i32_0 = arith.constant 0 : i32
    %c0_i32_1 = arith.constant 0 : i32
    return %arg0, %c0_i32, %arg1, %c0_i32_0 : i32, i32, i32, i32
  }
}

</mosaic_0001>

<bundles_post_ra>
// kernel: rel_pos_self_attention.5
= control target key start
LH: loop header
LB: loop body
LE: loop exit
PB: predicated region body
PF: predicated region fallthrough
CT: control target
= control target key end

     0   :  { %vm28_vm0 = vcmask 261120   ;;  %s224_s0 = inlined_call_operand.vmem [shape: f32[16,32], index: 0, kind: input, shape index: {}]   ;;  %s225_s1 = inlined_call_operand.vmem [shape: f32[32,32], index: 1, kind: input, shape index: {}]   ;;  %s226_s2 = inlined_call_operand.vmem [shape: f32[1,32], index: 2, kind: input, shape index: {}]   ;;  %s227_s3 = inlined_call_operand.hbm [shape: f32[16,32], index: 3, kind: output, shape index: {}]  }
   0x1   :  { %v20_v0 = vld [vmem:[%s225_s1 + $0x18] sm:$0xff]  ;;  %v19_v1 = vld [vmem:[%s225_s1 + $0x10] sm:$0xff]  ;;  %v15_v2 = vld [vmem:[%s224_s0] sm:$0xff] }
   0x2   :  { %137 = vmatprep.subr.mxu0 %v20_v0  ;;  %v18_v3 = vld [vmem:[%s225_s1 + $0x8] sm:$0xff]  ;;  %145 = vmatprep.mubr.msk.f32.mxu0 %vm28_vm0, %v15_v2 }
   0x3   :  { %138 = vmatpush3.msra.mxu0 %v20_v0 }
   0x4   :  { %8 = vsyncpa [#allocation3], 0  ;;  %139 = vmatprep.subr.mxu0 %v19_v1  ;;  %v17_v4 = vld [vmem:[%s225_s1] sm:$0xff]  ;;  %v16_v5 = vld [vmem:[%s224_s0 + $0x8] sm:$0xff]  ;;  %s173_s26 = smov [#allocation2]  }
   0x5   :  { %140 = vmatpush3.msra.mxu0 %v19_v1  ;;  %v128_v6 = vld [vmem:[%s226_s2] ss:$0 sm:$0xff]  ;;  %s117_s27 = sshll.u32 %s173_s26, 4  ;;  %s118_s27 = int_to_ptr.vmem [resolvable:$true] %s117_s27 }
   0x6   :  { %141 = vmatprep.subr.mxu0 %v18_v3  ;;  %s151_s0 = scalar_lea.vmem %s118_s27, 256  ;;  %p156_p1 = scmp.lt.s32.totalorder %s118_s27, %s118_s27 }
   0x7   :  { %142 = vmatpush3.msra.mxu0 %v18_v3  ;;  %p152_p0 = scmp.ne.s32.totalorder %s118_s27, %s151_s0  ;;  %p157_p2 = scmp.lt.s32.totalorder %s151_s0, %s151_s0 }
   0x8   :  { %143 = vmatprep.subr.mxu0 %v17_v4 }
   0x9   :  { %144 = vmatpush3.msra.mxu0 %v17_v4  ;;  %p158_p3 = por %p157_p2, %p156_p1 }
   0xa   :  { %146 = vmatmul.mubr.msk.f32.vlgmr.msra.gmra.mxu0 %vm28_vm0, %v16_v5 }
   0xb   :  { %p159_p4 = pnand %p158_p3, %p152_p0 }
  0xca   :  { %v147_v7 = vpop.f32.mrf.mxu0 }
  0xcb   :  { %v107_v8 = vadd.f32 %v147_v7, %v128_v6 }
  0xcc   :  { %v101_v9 = vpop.f32.mrf.mxu0 }
  0xcd   :  { %111 = vst.msk [vmem:[#allocation2 + $0x8] sm:$0xff] %vm28_vm0, %v107_v8  ;;  %v102_v10 = vadd.f32 %v128_v6, %v101_v9 }
  0xcf   :  { %110 = vst.msk [vmem:[#allocation2] sm:$0xff] %vm28_vm0, %v102_v10 }
  0xd0   :  { %162 = shalt.err (!%p159_p4)
}
  0xd1   :  { %s174_s1 = smov 128   ;;  %s175_s2 = smov 8  }
  0xd2   :  { %123 = dma.vmem_to_hbm [thread:$0]  %s118_s27, 256, %s227_s3, [#allocation3], %s174_s1, %s174_s1, %s175_s2  }
  0xd3   :  { %171 = dma.done.wait [#allocation3], 256  }
  0xd4   :  { %172 = vsyncadd [#allocation3], 4294967040 }
  0xd5   :  { %127 = vsyncpa [#allocation3], 1 }

// kernel: rel_pos_self_attention.3
= control target key start
LH: loop header
LB: loop body
LE: loop exit
PB: predicated region body
PF: predicated region fallthrough
CT: control target
= control target key end

     0   :  { %7 = vsyncpa [#allocation3], 0  ;;  %s165_s9 = smov [#allocation2]   ;;  %s206_s0 = inlined_call_operand.hbm [shape: f32[16,32], index: 0, kind: input, shape index: {}]   ;;  %s207_s1 = inlined_call_operand.vmem [shape: f32[32,96], index: 1, kind: input, shape index: {}]   ;;  %s208_s2 = inlined_call_operand.vmem [shape: f32[16,96], index: 2, kind: output, shape index: {}]  }
   0x1   :  { %s13_s10 = sshll.u32 %s165_s9, 4  ;;  %s14_s10 = int_to_ptr.vmem [resolvable:$true] %s13_s10 }
   0x2   :  { %s151_s11 = scalar_lea.vmem %s14_s10, 256  ;;  %p156_p1 = scmp.lt.s32.totalorder %s14_s10, %s14_s10 }
   0x3   :  { %p152_p0 = scmp.ne.s32.totalorder %s14_s10, %s151_s11  ;;  %p157_p2 = scmp.lt.s32.totalorder %s151_s11, %s151_s11 }
   0x5   :  { %p158_p3 = por %p157_p2, %p156_p1 }
   0x7   :  { %p159_p4 = pnand %p158_p3, %p152_p0 }
   0x9   :  { %162 = shalt.err (!%p159_p4)
}
   0xa   :  { %s166_s12 = smov 128   ;;  %s167_s13 = smov 8  }
   0xb   :  { %19 = dma.hbm_to_vmem [thread:$0]  %s206_s0, 256, %s14_s10, [#allocation3], %s166_s12, %s166_s12, %s167_s13  }
   0xc   :  { %163 = dma.done.wait [#allocation3], 256  }
   0xd   :  { %164 = vsyncadd [#allocation3], 4294967040  ;;  %vm31_vm0 = vcmask 261120   ;;  %v30_v0 = vld [vmem:[%s207_s1 + $0x18] sm:$0xff]  ;;  %v29_v1 = vld [vmem:[%s207_s1 + $0x10] sm:$0xff]  ;;  %vm113_vm1 = vcmask 785408  }
   0xe   :  { %129 = vmatprep.subr.mxu0 %v30_v0  ;;  %v25_v2 = vld [vmem:[#allocation2] sm:$0xff]  ;;  %v28_v3 = vld [vmem:[%s207_s1 + $0x8] sm:$0xff] }
   0xf   :  { %130 = vmatpush3.msra.mxu0 %v30_v0  ;;  %137 = vmatprep.mubr.msk.f32.mxu0 %vm31_vm0, %v25_v2  ;;  %v27_v4 = vld [vmem:[%s207_s1] sm:$0xff]  ;;  %v26_v5 = vld [vmem:[#allocation2 + $0x8] sm:$0xff] }
  0x10   :  { %131 = vmatprep.subr.mxu0 %v29_v1 }
  0x11   :  { %132 = vmatpush3.msra.mxu0 %v29_v1 }
  0x12   :  { %133 = vmatprep.subr.mxu0 %v28_v3 }
  0x13   :  { %134 = vmatpush3.msra.mxu0 %v28_v3 }
  0x14   :  { %135 = vmatprep.subr.mxu0 %v27_v4 }
  0x15   :  { %136 = vmatpush3.msra.mxu0 %v27_v4 }
  0x16   :  { %138 = vmatmul.mubr.msk.f32.vlgmr.msra.gmra.mxu0 %vm31_vm0, %v26_v5 }
  0xd6   :  { %v139_v6 = vpop.f32.mrf.mxu0 }
  0xd7   :  { %115 = vst.msk [vmem:[%s208_s2 + $0x8] sm:$0xff] %vm113_vm1, %v139_v6 }
  0xd8   :  { %v104_v7 = vpop.f32.mrf.mxu0 }
  0xd9   :  { %114 = vst.msk [vmem:[%s208_s2] sm:$0xff] %vm113_vm1, %v104_v7 }
  0xda   :  { %120 = vsyncpa [#allocation3], 1 }

// kernel: rel_pos_self_attention.4
= control target key start
LH: loop header
LB: loop body
LE: loop exit
PB: predicated region body
PF: predicated region fallthrough
CT: control target
= control target key end

     0   :  { %s4079_s0 = inlined_call_operand.<no memory space> [shape: f32[1], index: 0, kind: input, shape index: {}]   ;;  %s4080_s1 = inlined_call_operand.vmem [shape: f32[4,16], index: 1, kind: input, shape index: {}]   ;;  %s4081_s2 = inlined_call_operand.vmem [shape: f32[16], index: 2, kind: input, shape index: {}]   ;;  %s4082_s3 = inlined_call_operand.vmem [shape: f32[16,4], index: 3, kind: input, shape index: {}]   ;;  %s4083_s4 = inlined_call_operand.vmem [shape: f32[4], index: 4, kind: input, shape index: {}]   ;;  %s4084_s5 = inlined_call_operand.vmem [shape: f32[2,1,8], index: 5, kind: input, shape index: {}]   ;;  %s4085_s6 = inlined_call_operand.vmem [shape: f32[2,8,3], index: 6, kind: input, shape index: {}]   ;;  %s4086_s7 = inlined_call_operand.vmem [shape: f32[2,3,8], index: 7, kind: input, shape index: {}]   ;;  %s4087_s8 = inlined_call_operand.vmem [shape: f32[2,8,96], index: 8, kind: input, shape index: {}]   ;;  %s4088_s9 = inlined_call_operand.vmem [shape: f32[2,8,32], index: 9, kind: output, shape index: {0}]   ;;  %s4089_s10 = inlined_call_operand.hbm [shape: f32[2,4,8,8], index: 10, kind: output, shape index: {1}]  }
   0x1   :  { %4182 = sst [smem:[#allocation94_spill]] %s4080_s1 }
   0x2   :  { %4183 = sst [smem:[#allocation95_spill]] %s4081_s2 }
   0x3   :  { %4184 = sst [smem:[#allocation96_spill]] %s4082_s3 }
   0x4   :  { %4185 = sst [smem:[#allocation97_spill]] %s4083_s4 }
   0x5   :  { %4186 = sst [smem:[#allocation98_spill]] %s4084_s5 }
   0x6   :  { %4187 = sst [smem:[#allocation99_spill]] %s4085_s6 }
   0x7   :  { %4188 = sst [smem:[#allocation100_spill]] %s4086_s7 }
   0x8   :  { %4189 = sst [smem:[#allocation101_spill]] %s4087_s8 }
   0x9   :  { %4190 = sst [smem:[#allocation102_spill]] %s4088_s9 }
   0xa   :  { %4191 = sst [smem:[#allocation103_spill]] %s4089_s10 }
   0xb   :  { %16 = sst [smem:[#allocation2]] %s4079_s0 }
   0xc   :  { %17 = vsyncpa [#allocation5], 0 }
   0xd   :  { %18 = vsyncpa [#allocation7], 0 }
   0xe   :  { %19 = vsyncpa [#allocation10], 0 }
   0xf   :  { %20 = vsyncpa [#allocation4], 0 }
  0x10   :  { %22 = vsyncpa [#allocation4 + $0x1], 0  ;;  %s2840_s15 = smov 0   ;;  %s2842_s16 = smov 0  }
  0x11   :  { %s2844_s17 = smov 0   ;;  %s2846_s18 = smov 0  }
  0x12   :  { %s2848_s19 = smov 0   ;;  %s2850_s20 = smov 0  }
  0x13 LB: > { %4192 = sst [smem:[#allocation16_spill]] %s2733_s15  ;;  %s2193_s0 = sadd.s32 4294967295, %s2753_s20   ;;  %s2753_s20 = sphi %s2850_s20, %s28_s20   ;;  %s2749_s19 = sphi %s2848_s19, %s4442_s19   ;;  %s2745_s18 = sphi %s2846_s18, %s4441_s18   ;;  %s2741_s17 = sphi %s2844_s17, %s4440_s17   ;;  %s2737_s16 = sphi %s2842_s16, %s4439_s16   ;;  %s2733_s15 = sphi %s2840_s15, %s4438_s15  }
  0x14   : > { %4193 = sst [smem:[#allocation17_spill]] %s2737_s16  ;;  %s2194_s21 = sadd.s32 4294967294, %s2753_s20  }
  0x15   : > { %4194 = sst [smem:[#allocation18_spill]] %s2741_s17  ;;  %s40_s22 = sadd.s32 1, %s2749_s19 }
  0x16   : > { %4195 = sst [smem:[#allocation19_spill]] %s2745_s18  ;;  %s288_s23 = sadd.s32 1, %s2741_s17 }
  0x17   : > { %4196 = sst [smem:[#allocation20_spill]] %s2749_s19  ;;  %p42_p0 = scmp.ge.s32.totalorder %s40_s22, 2 }
  0x18   : > { %4197 = sst [smem:[#allocation21_spill]] %s2753_s20  ;;  %p298_p1 = scmp.ne.s32.totalorder %s2741_s17, %s2737_s16 }
  0x19   : > { %p299_p2 = scmp.eq.s32.totalorder %s2193_s0, 1  ;;  %p304_p3 = scmp.ne.s32.totalorder %s2737_s16, %s2733_s15 }
  0x1a   : > { %s4444_s22 = smov (%p42_p0, %s40_s22), 0  ;;  %p305_p5 = scmp.eq.s32.totalorder %s2194_s21, 1 }
  0x1b   : > { %4198 = sst [smem:[#allocation22_spill]] %s4444_s22  ;;  %p2880_p4 = por %p299_p2, %p298_p1 }
  0x1c   : > { %s283_s25 = ssub.s32 %s2749_s19, %s4444_s22  ;;  %p2195_p6 = scmp.ge.s32.totalorder %s2753_s20, 1 }
  0x1d   : > { %s4199_s24 = scalar_select %p2880_p4, 1, 0 }
  0x1e   : > { %p286_p7 = scmp.eq.s32.totalorder %s283_s25, 0  ;;  %p2887_p8 = por %p305_p5, %p304_p3 }
  0x1f   : > { %4200 = sst [smem:[#allocation23_spill]] %s4199_s24  ;;  %p312_p9 = scmp.lt.s32.totalorder %s2753_s20, 3 }
  0x20   : > { %s4201_s26 = scalar_select %p2887_p8, 1, 0 }
  0x21   : > { %s2893_s27 = scalar_select %p286_p7, %s2741_s17, %s288_s23  }
  0x22   : > { %4202 = sst [smem:[#allocation24_spill]] %s4201_s26  ;;  %p2895_p10 = pnand %p2195_p6, %p312_p9 }
  0x23   : > { %4203 = sst [smem:[#allocation25_spill]] %s2893_s27  ;;  %p2899_p11 = scmp.eq.s32.totalorder %s2193_s0, 0 }
  0x24   : > { %s4204_s28 = scalar_select %p2895_p10, 1, 0 }
  0x25   : > { %s4205_s29 = scalar_select %p2899_p11, 1, 0 }
  0x26   : > { %s4206_s2 = sld [smem:[#allocation95_spill]]  ;;  %p2450_p12 = pneg %p2895_p10 }
  0x27   : > { %s4207_s1 = sld [smem:[#allocation94_spill]] }
  0x28   : > { %p2913_p13 = pnand %p2899_p11, %p2450_p12  ;;  %s4209_s3 = sld [smem:[#allocation96_spill]] }
  0x2a   : > { %p2607_p1 = pneg %p2913_p13 }
  0x2c   : > { %s339_s12 = sshll.u32 %s4206_s2, 4  ;;  %s340_s12 = int_to_ptr.vmem [resolvable:$true] %s339_s12 }
  0x2d   : > { %s328_s21 = sshll.u32 %s4207_s1, 4  ;;  %s2605_s11 = scalar_lea.vmem %s340_s12, 16  ;;  %s329_s21 = int_to_ptr.vmem [resolvable:$true] %s328_s21 }
  0x2e   : > { %s349_s30 = sshll.u32 %s4209_s3, 4  ;;  %p2606_p0 = scmp.ne.s32.totalorder %s340_s12, %s2605_s11  ;;  %s350_s30 = int_to_ptr.vmem [resolvable:$true] %s349_s30 }
  0x2f   : > { %p2613_p5 = scmp.lt.s32.totalorder %s340_s12, %s340_s12  ;;  %p2614_p6 = scmp.lt.s32.totalorder %s2605_s11, %s2605_s11 }
  0x30   : > { %p2608_p2 = pnand %p2607_p1, %p2606_p0 }
  0x31   : > { %p2615_p7 = por %p2614_p6, %p2613_p5 }
  0x32   : > { %p2609_p3 = pneg %p2608_p2 }
  0x34   : > { %p2616_p9 = pnand %p2615_p7, %p2609_p3 }
  0x36   : > { %2619 = shalt.err (!%p2616_p9)
}
  0x37   : > { %s2755_s13 = smov [#allocation6]   ;;  %s2620_s14 = scalar_lea.vmem %s329_s21, 64 }
  0x38   : > { %2456 = dma.vmem_to_smem (!%p2913_p13), %s340_s12, 16, %s2755_s13, [#allocation7]  }
  0x39   : > { %p2621_p12 = scmp.ne.s32.totalorder %s329_s21, %s2620_s14  ;;  %p2628_p11 = scmp.lt.s32.totalorder %s329_s21, %s329_s21 }
  0x3a   : > { %p2629_p10 = scmp.lt.s32.totalorder %s2620_s14, %s2620_s14 }
  0x3b   : > { %p2623_p8 = pnand %p2621_p12, %p2607_p1 }
  0x3c   : > { %p2630_p0 = por %p2629_p10, %p2628_p11 }
  0x3d   : > { %p2624_p4 = pneg %p2623_p8 }
  0x3f   : > { %p2631_p2 = pnand %p2630_p0, %p2624_p4 }
  0x41   : > { %2634 = shalt.err (!%p2631_p2)
}
  0x42   : > { %s2756_s0 = smov [#allocation3]   ;;  %s2635_s25 = scalar_lea.vmem %s350_s30, 256 }
  0x43   : > { %2453 = dma.vmem_to_smem (!%p2913_p13), %s329_s21, 64, %s2756_s0, [#allocation5]  }
  0x44   : > { %p2636_p3 = scmp.ne.s32.totalorder %s350_s30, %s2635_s25  ;;  %p2643_p7 = scmp.lt.s32.totalorder %s350_s30, %s350_s30 }
  0x45   : > { %p2644_p9 = scmp.lt.s32.totalorder %s2635_s25, %s2635_s25 }
  0x46   : > { %p2638_p5 = pnand %p2636_p3, %p2607_p1 }
  0x47   : > { %p2645_p8 = por %p2644_p9, %p2643_p7 }
  0x48   : > { %p2639_p6 = pneg %p2638_p5 }
  0x4a   : > { %p2646_p12 = pnand %p2645_p8, %p2639_p6 }
  0x4c   : > { %2649 = shalt.err (!%p2646_p12)
}
  0x4d   : > { %s2757_s12 = smov [#allocation8]   ;;  %s2758_s11 = smov 128  }
  0x4e   : > { %s2759_s13 = smov 8   ;;  %s4210_s4 = sld [smem:[#allocation97_spill]] }
  0x4f   : > { %2459 = dma.vmem_to_smem (!%p2913_p13), %s350_s30, 256, %s2757_s12, [#allocation7], %s2758_s11, %s2758_s11, %s2759_s13  }
  0x54   : > { %s363_s0 = sshll.u32 %s4210_s4, 4  ;;  %s364_s0 = int_to_ptr.vmem [resolvable:$true] %s363_s0 }
  0x55   : > { %s2650_s1 = scalar_lea.vmem %s364_s0, 16  ;;  %p2658_p0 = scmp.lt.s32.totalorder %s364_s0, %s364_s0 }
  0x56   : > { %p2651_p4 = scmp.ne.s32.totalorder %s364_s0, %s2650_s1  ;;  %p2659_p2 = scmp.lt.s32.totalorder %s2650_s1, %s2650_s1 }
  0x58   : > { %p2653_p10 = pnand %p2651_p4, %p2607_p1  ;;  %p2660_p3 = por %p2659_p2, %p2658_p0 }
  0x5a   : > { %p2654_p11 = pneg %p2653_p10 }
  0x5c   : > { %p2661_p5 = pnand %p2660_p3, %p2654_p11 }
  0x5e   : > { %2664 = shalt.err (!%p2661_p5)
}
  0x5f   : > { %s2760_s25 = smov [#allocation9]   ;;  %p4211_p6 = scmp.ne.s32.totalorder %s4204_s28, 0 }
  0x60   : > { %2462 = dma.vmem_to_smem (!%p2913_p13), %s364_s0, 16, %s2760_s25, [#allocation10]  }
  0x61   : > { %406 = sbr.rel (%p4211_p6) target bundleno = 1590 (0x636), region = 56 }
  0x66   : > { %p4212_p7 = scmp.ne.s32.totalorder %s4205_s29, 0 }
  0x68   : > { %2716 = dma.done.wait (%p4212_p7), [#allocation5], 64  }
  0x69   : > { %2718 = vsyncadd (%p4212_p7), [#allocation5], 4294967232 }
  0x6a   : > { %2720 = dma.done.wait (%p4212_p7), [#allocation7], 272  }
  0x6b   : > { %2722 = vsyncadd (%p4212_p7), [#allocation7], 4294967024 }
  0x6c   : > { %2724 = dma.done.wait (%p4212_p7), [#allocation10], 16  }
  0x6d   : > { %2726 = vsyncadd (%p4212_p7), [#allocation10], 4294967280 }
  0x6e   : > { %424 = sfence }
  0x6f   : > { %p477_p13 = scmp.lt.s32.totalorder %s2745_s18, 1  ;;  %v4171_v0 = vlaneseq  ;;  %v2761_v1 = vmov 1   ;;  %v2762_v2 = vmov 0   ;;  %v4169_v4 = vmov 0.0   ;;  %s4214_s5 = sld [smem:[#allocation98_spill]] }
  0x70   : > { %2551 = vset.pattern.permute.xlu1 %v2761_v1  ;;  %2550 = vset.pattern.permute.xlu0 %v2762_v2  ;;  %vm2764_vm0 = vmmov 0   ;;  %s4215_s8 = sld [smem:[#allocation101_spill]]  ;;  %s2765_s25 = smov 96   ;;  %v2766_v11 = vmov 2   ;;  %vm1255_vm2 = vcmask 64512  }
  0x71   : > { %s2961_s1 = scalar_select %p477_p13, %s2745_s18, 1  ;;  %v2964_v3 = vshrl.u32 %v4171_v0, 7  ;;  %2392 = vmatprep.subr.mxu0 %v4169_v4  ;;  %2394 = vmatprep.mubr.msk.f32.mxu0 %vm2764_vm0, %v4169_v4 }
  0x72   : > { %2397 = vmatprep.subr.mxu1 %v4169_v4  ;;  %2399 = vmatprep.mubr.msk.f32.mxu1 %vm2764_vm0, %v4169_v4  ;;  %s4217_s6 = sld [smem:[#allocation99_spill]] }
  0x73   : > { %s2973_s28 = sshll.u32 %s2961_s1, 3  ;;  %v512_v8 = vsub.s32 0, %v2964_v3  ;;  %s2998_s29 = sld [smem:[#allocation3]]  ;;  %v521_v12 = vsub.s32 1, %v2964_v3  ;;  %v530_v14 = vsub.s32 2, %v2964_v3  ;;  %vm1236_vm6 = vcmp.ge.s32.totalorder %v2964_v3, 1 }
  0x74   : > { %4213 = sst [smem:[#allocation26_spill]] %s2973_s28 }
  0x75   : > { %s479_s30 = scalar_lea.vmem %s4214_s5, %s2961_s1  ;;  %s3000_s23 = sld [smem:[#allocation3 + $0x80]] }
  0x76   : > { %s2983_s13 = scalar_lea.vmem %s4215_s8, %s2973_s28  ;;  %v1243_v5 = vld [vmem:[%s479_s30] sm:$0x1]  ;;  %s3002_s30 = sld [smem:[#allocation3 + $0x100]] }
  0x77   : > { %4216 = sst [smem:[#allocation27_spill]] %s2983_s13  ;;  %v2990_v6 = vld [vmem:[%s2983_s13] sm:$0xff]  ;;  %vm1244_vm1 = vcmp.gt.f32.partialorder %v1243_v5, 0.5 }
  0x78   : > { %s486_s0 = scalar_lea.vmem %s4217_s6, %s2973_s28  ;;  %1253 = vrot.lane.b32.xlu0 %v2990_v6, %s2765_s25  ;;  %v1335_v9 = vsel %vm1244_vm1, 1, %v2762_v2  ;;  %s3004_s12 = sld [smem:[#allocation3 + $0x180]] }
  0x79   : > { %v503_v7 = vld [vmem:[%s486_s0] sm:$0xff]  ;;  %v2996_v10 = vrot.slane %v1335_v9, %v512_v8  ;;  %4218 = sst [smem:[#allocation28_spill]] %s2998_s29  ;;  %v546_v19 = vstv %s2998_s29 }
  0x7a   : > { %516 = vperm.xlu1 %2551, %v503_v7   ;;  %s3006_s11 = sld [smem:[#allocation6]] }
  0x7b   : > { %4219 = sst [smem:[#allocation29_spill]] %s3000_s23  ;;  %v549_v20 = vstv %s3000_s23  ;;  %vm1340_vm8 = vcmp.eq.s32.totalorder %v2996_v10, 1 }
  0x7c   : > { %507 = vperm.xlu0 %2550, %v503_v7   ;;  %4220 = sst [smem:[#allocation30_spill]] %s3002_s30  ;;  %v553_v21 = vstv %s3002_s30 }
  0x7d   : > { %s3008_s21 = sld [smem:[#allocation3 + $0x1]] }
  0x7e   : > { %2552 = vset.pattern.permute.xlu1 %v2766_v11  ;;  %4221 = sst [smem:[#allocation31_spill]] %s3004_s12  ;;  %v557_v22 = vstv %s3004_s12 }
  0x7f   : > { %525 = vperm.xlu1 %2552, %v503_v7   ;;  %s3010_s14 = sld [smem:[#allocation3 + $0x81]] }
  0x80   : > { %2553 = vset.pattern.permute.xlu0 %v2766_v11  ;;  %4222 = sst [smem:[#allocation32_spill]] %s3006_s11 }
  0x81   : > { %s3012_s0 = sld [smem:[#allocation3 + $0x101]] }
  0x82   : > { %s3014_s25 = sld [smem:[#allocation3 + $0x181]] }
  0x83   : > { %4223 = sst [smem:[#allocation33_spill]] %s3008_s21  ;;  %v585_v24 = vstv %s3008_s21 }
  0x84   : > { %s3016_s2 = sld [smem:[#allocation3 + $0x2]] }
  0x85   : > { %4224 = sst [smem:[#allocation34_spill]] %s3010_s14  ;;  %v588_v25 = vstv %s3010_s14 }
  0x86   : > { %s3018_s3 = sld [smem:[#allocation3 + $0x82]] }
  0x87   : > { %4225 = sst [smem:[#allocation35_spill]] %s3012_s0  ;;  %v592_v26 = vstv %s3012_s0 }
  0x88   : > { %4226 = sst [smem:[#allocation36_spill]] %s3014_s25  ;;  %v596_v27 = vstv %s3014_s25 }
  0x89   : > { %s3020_s4 = sld [smem:[#allocation6 + $0x1]] }
  0x8a   : > { %4227 = sst [smem:[#allocation37_spill]] %s3016_s2  ;;  %v628_v28 = vstv %s3016_s2 }
  0x8b   : > { %s3022_s5 = sld [smem:[#allocation3 + $0x102]] }
  0x8c   : > { %4228 = sst [smem:[#allocation38_spill]] %s3018_s3  ;;  %v631_v30 = vstv %s3018_s3 }
  0x8d   : > { %s3024_s6 = sld [smem:[#allocation3 + $0x182]] }
  0x8e   : > { %s3026_s8 = sld [smem:[#allocation6 + $0x2]] }
  0x8f   : > { %4229 = sst [smem:[#allocation39_spill]] %s3020_s4 }
  0x90   : > { %s3028_s22 = sld [smem:[#allocation3 + $0x3]] }
  0x91   : > { %4230 = sst [smem:[#allocation40_spill]] %s3022_s5  ;;  %v635_v31 = vstv %s3022_s5 }
  0x92   : > { %s3030_s19 = sld [smem:[#allocation3 + $0x83]] }
  0x93   : > { %4231 = sst [smem:[#allocation41_spill]] %s3024_s6  ;;  %v639_v32 = vstv %s3024_s6 }
  0x94   : > { %4232 = sst [smem:[#allocation42_spill]] %s3026_s8 }
  0x95   : > { %s3032_s27 = sld [smem:[#allocation3 + $0x103]] }
  0x96   : > { %4233 = sst [smem:[#allocation43_spill]] %s3028_s22  ;;  %v671_v34 = vstv %s3028_s22 }
  0x97   : > { %s3034_s17 = sld [smem:[#allocation3 + $0x183]] }
  0x98   : > { %4234 = sst [smem:[#allocation44_spill]] %s3030_s19  ;;  %v674_v35 = vstv %s3030_s19 }
  0x99   : > { %s3036_s26 = sld [smem:[#allocation6 + $0x3]] }
  0x9a   : > { %s3038_s15 = sld [smem:[#allocation3 + $0x4]] }
  0x9b   : > { %4235 = sst [smem:[#allocation45_spill]] %s3032_s27 }
  0x9c   : > { %s3040_s20 = sld [smem:[#allocation3 + $0x84]] }
  0x9d   : > { %4236 = sst [smem:[#allocation46_spill]] %s3034_s17 }
  0x9e   : > { %s3042_s9 = sld [smem:[#allocation3 + $0x104]] }
  0x9f   : > { %4237 = sst [smem:[#allocation47_spill]] %s3036_s26 }
  0xa0   : > { %4238 = sst [smem:[#allocation48_spill]] %s3038_s15 }
  0xa1   : > { %s3044_s28 = sld [smem:[#allocation3 + $0x184]] }
  0xa2   : > { %4239 = sst [smem:[#allocation49_spill]] %s3040_s20 }
  0xa3   : > { %s3046_s10 = sld [smem:[#allocation6 + $0x4]] }
  0xa4   : > { %4240 = sst [smem:[#allocation50_spill]] %s3042_s9 }
  0xa5   : > { %s3048_s24 = sld [smem:[#allocation3 + $0x5]] }
  0xa6   : > { %s3050_s18 = sld [smem:[#allocation3 + $0x85]] }
  0xa7   : > { %4241 = sst [smem:[#allocation51_spill]] %s3044_s28 }
  0xa8   : > { %s3052_s16 = sld [smem:[#allocation3 + $0x105]] }
  0xa9   : > { %4242 = sst [smem:[#allocation52_spill]] %s3046_s10 }
  0xaa   : > { %s3054_s13 = sld [smem:[#allocation3 + $0x185]] }
  0xab   : > { %4243 = sst [smem:[#allocation53_spill]] %s3048_s24 }
  0xac   : > { %4244 = sst [smem:[#allocation54_spill]] %s3050_s18 }
  0xad   : > { %s3056_s17 = sld [smem:[#allocation6 + $0x5]] }
  0xae   : > { %4245 = sst [smem:[#allocation55_spill]] %s3052_s16 }
  0xaf   : > { %s3058_s26 = sld [smem:[#allocation3 + $0x6]] }
  0xb0   : > { %4246 = sst [smem:[#allocation56_spill]] %s3054_s13 }
  0xb1   : > { %s3060_s15 = sld [smem:[#allocation3 + $0x86]] }
  0xb2   : > { %s3062_s20 = sld [smem:[#allocation3 + $0x106]] }
  0xb3   : > { %4247 = sst [smem:[#allocation57_spill]] %s3056_s17 }
  0xb4   : > { %s3064_s9 = sld [smem:[#allocation3 + $0x186]] }
  0xb5   : > { %4248 = sst [smem:[#allocation58_spill]] %s3058_s26 }
  0xb6   : > { %s3066_s28 = sld [smem:[#allocation6 + $0x6]] }
  0xb7   : > { %4249 = sst [smem:[#allocation59_spill]] %s3060_s15 }
  0xb8   : > { %4250 = sst [smem:[#allocation60_spill]] %s3062_s20 }
  0xb9   : > { %s3068_s10 = sld [smem:[#allocation3 + $0x7]] }
  0xba   : > { %4251 = sst [smem:[#allocation61_spill]] %s3064_s9 }
  0xbb   : > { %s3070_s24 = sld [smem:[#allocation3 + $0x87]] }
  0xbc   : > { %4252 = sst [smem:[#allocation62_spill]] %s3066_s28 }
  0xbd   : > { %s3072_s18 = sld [smem:[#allocation3 + $0x107]] }
  0xbe   : > { %s3074_s13 = sld [smem:[#allocation3 + $0x187]] }
  0xbf   : > { %4253 = sst [smem:[#allocation63_spill]] %s3068_s10 }
  0xc0   : > { %s3076_s17 = sld [smem:[#allocation6 + $0x7]] }
  0xc1   : > { %4254 = sst [smem:[#allocation64_spill]] %s3070_s24 }
  0xc2   : > { %s3078_s26 = sld [smem:[#allocation3 + $0x8]] }
  0xc3   : > { %4255 = sst [smem:[#allocation65_spill]] %s3072_s18 }
  0xc4   : > { %4256 = sst [smem:[#allocation66_spill]] %s3074_s13 }
  0xc5   : > { %s3080_s15 = sld [smem:[#allocation3 + $0x88]] }
  0xc6   : > { %4257 = sst [smem:[#allocation67_spill]] %s3076_s17 }
  0xc7   : > { %s3082_s20 = sld [smem:[#allocation3 + $0x108]] }
  0xc8   : > { %4258 = sst [smem:[#allocation68_spill]] %s3078_s26 }
  0xc9   : > { %s3084_s9 = sld [smem:[#allocation3 + $0x188]] }
  0xca   : > { %s3086_s28 = sld [smem:[#allocation6 + $0x8]] }
  0xcb   : > { %4259 = sst [smem:[#allocation69_spill]] %s3080_s15 }
  0xcc   : > { %s3088_s10 = sld [smem:[#allocation3 + $0x9]] }
  0xcd   : > { %4260 = sst [smem:[#allocation70_spill]] %s3082_s20  ;;  %s2208_s20 = sshll.u32 %s2961_s1, 2 }
  0xce   : > { %s3090_s24 = sld [smem:[#allocation3 + $0x89]] }
  0xcf   : > { %4261 = sst [smem:[#allocation71_spill]] %s3084_s9 }
  0xd0   : > { %4262 = sst [smem:[#allocation72_spill]] %s3086_s28 }
  0xd1   : > { %s3092_s18 = sld [smem:[#allocation3 + $0x109]] }
  0xd2   : > { %4263 = sst [smem:[#allocation73_spill]] %s3088_s10 }
  0xd3   : > { %s3094_s16 = sld [smem:[#allocation3 + $0x189]] }
  0xd4   : > { %4264 = sst [smem:[#allocation74_spill]] %s3090_s24 }
  0xd5   : > { %s3096_s13 = sld [smem:[#allocation6 + $0x9]] }
  0xd6   : > { %s3098_s17 = sld [smem:[#allocation3 + $0xa]] }
  0xd7   : > { %4265 = sst [smem:[#allocation75_spill]] %s3092_s18 }
  0xd8   : > { %s3100_s26 = sld [smem:[#allocation3 + $0x8a]] }
  0xd9   : > { %4266 = sst [smem:[#allocation76_spill]] %s3094_s16 }
  0xda   : > { %s3102_s15 = sld [smem:[#allocation3 + $0x10a]] }
  0xdb   : > { %4267 = sst [smem:[#allocation77_spill]] %s3096_s13 }
  0xdc   : > { %4268 = sst [smem:[#allocation78_spill]] %s3098_s17 }
  0xdd   : > { %s3105_s9 = sld [smem:[#allocation3 + $0x18a]] }
  0xde   : > { %s3107_s28 = sld [smem:[#allocation6 + $0xa]] }
  0xdf   : > { %s3109_s10 = sld [smem:[#allocation3 + $0xb]] }
  0xe0   : > { %4269 = sst [smem:[#allocation79_spill]] %s3102_s15 }
  0xe1   : > { %s4273_s7 = sld [smem:[#allocation100_spill]] }
  0xe2   : > { %s3114_s16 = sld [smem:[#allocation3 + $0x8b]] }
  0xe3   : > { %4270 = sst [smem:[#allocation80_spill]] %s3105_s9 }
  0xe4   : > { %4271 = sst [smem:[#allocation81_spill]] %s3107_s28 }
  0xe5   : > { %4272 = sst [smem:[#allocation82_spill]] %s3109_s10  ;;  %v1015_v2 = vstv %s3109_s10 }
  0xe6   : > { %s3116_s17 = sld [smem:[#allocation3 + $0x10b]] }
  0xe7   : > { %s490_s18 = scalar_lea.vmem %s4273_s7, %s2208_s20  ;;  %s3119_s15 = sld [smem:[#allocation3 + $0x18b]] }
  0xe8   : > { %v504_v13 = vld [vmem:[%s490_s18] sm:$0x7]  ;;  %s3122_s1 = sld [smem:[#allocation6 + $0xb]] }
  0xe9   : > { %s3124_s20 = sld [smem:[#allocation3 + $0xc]]  ;;  %v522_v15 = vrot.slane %v504_v13, %v521_v12  ;;  %v3132_v17 = vrot.slane %v504_v13, %v512_v8  ;;  %v3134_v18 = vrot.slane %v504_v13, %v530_v14  ;;  %v975_v13 = vstv %s3100_s26 }
  0xea   : > { %s3126_s24 = sld [smem:[#allocation3 + $0x8c]]  ;;  %v1254_v16 = vpop.permute.xlu0 %1253 }
  0xeb   : > { %s3128_s27 = sld [smem:[#allocation3 + $0x10c]]  ;;  %2393 = vmatpush3.xpose.msk.msra.mxu0 %vm1255_vm2, %v1254_v16 }
  0xec   : > { %4274 = sst [smem:[#allocation83_spill]] %s3116_s17  ;;  %2407 = vmatprep.subr.mxu0 %v4169_v4 }
  0xed   : > { %4275 = sst [smem:[#allocation84_spill]] %s3119_s15 }
  0xee   : > { %4276 = sst [smem:[#allocation85_spill]] %s3122_s1  ;;  %2395 = vmatmul.mubr.msk.f32.vlgmr.msra.gmra.mxu0 %vm1255_vm2, %v2990_v6 }
  0xef   : > { %4277 = sst [smem:[#allocation86_spill]] %s3124_s20  ;;  %2409 = vmatprep.mubr.msk.f32.mxu0 %vm2764_vm0, %v4169_v4 }
  0xf0   : > { %4278 = sst [smem:[#allocation87_spill]] %s3126_s24 }
  0xf1   : > { %4279 = sst [smem:[#allocation88_spill]] %s3128_s27 }
  0xf2   : > { %s3138_s18 = sld [smem:[#allocation3 + $0x18c]] }
  0xf3   : > { %s3145_s7 = sld [smem:[#allocation6 + $0xc]] }
  0xf4   : > { %s4282_s27 = sld [smem:[#allocation45_spill]] }
  0xf5   : > { %s4283_s29 = sld [smem:[#allocation46_spill]]  ;;  %v517_v53 = vpop.permute.xlu1 %516 }
  0xf6   : > { %s3151_s24 = sld [smem:[#allocation3 + $0xd]]  ;;  %v3200_v58 = vsub.f32 %v517_v53, %v522_v15 }
  0xf7   : > { %s4287_s30 = sld [smem:[#allocation49_spill]]  ;;  %v508_v9 = vpop.permute.xlu0 %507 }
  0xf8   : > { %4280 = sst [smem:[#allocation89_spill]] %s3138_s18  ;;  %v3226_v15 = vsub.f32 %v508_v9, %v3132_v17  ;;  %v534_v53 = vmul.f32 %v3200_v58, %v3200_v58  ;;  %v1018_v17 = vstv %s3114_s16  ;;  %v1022_v9 = vstv %s3116_s17 }
  0xf9   : > { %4281 = sst [smem:[#allocation90_spill]] %s3145_s7  ;;  %v550_v43 = vmul.f32 %v549_v20, %v3200_v58  ;;  %v632_v38 = vmul.f32 %v631_v30, %v3200_v58 }
  0xfa   : > { %s4285_s18 = sld [smem:[#allocation48_spill]]  ;;  %v678_v36 = vstv %s4282_s27  ;;  %v526_v16 = vpop.permute.xlu1 %525  ;;  %v533_v4 = vmul.f32 %v3226_v15, %v3226_v15  ;;  %v629_v20 = vmul.f32 %v628_v28, %v3226_v15 }
  0xfb   : > { %s4288_s11 = sld [smem:[#allocation50_spill]]  ;;  %v682_v37 = vstv %s4283_s29  ;;  %v3235_v11 = vsub.f32 %v526_v16, %v3134_v18 }
  0xfc   : > { %4286 = sst [smem:[#allocation91_spill]] %s3151_s24  ;;  %v535_v48 = vadd.f32 %v534_v53, %v533_v4  ;;  %v589_v53 = vmul.f32 %v588_v25, %v3200_v58  ;;  %v633_v4 = vadd.f32 %v632_v38, %v629_v20 }
  0xfd   : > { %s4289_s12 = sld [smem:[#allocation51_spill]]  ;;  %v717_v40 = vstv %s4287_s30  ;;  %v536_v18 = vmul.f32 %v3235_v11, %v3235_v11 }
  0xfe   : > { %s3158_s7 = sld [smem:[#allocation3 + $0x8d]] }
  0xff   : > { %s4292_s25 = sld [smem:[#allocation53_spill]]  ;;  %v3261_v59 = vadd.f32 %v536_v18, %v535_v48  ;;  %v547_v48 = vmul.f32 %v546_v19, %v3226_v15  ;;  %v586_v18 = vmul.f32 %v585_v24, %v3226_v15  ;;  %v675_v19 = vmul.f32 %v674_v35, %v3200_v58 }
 0x100   : > { %s4293_s0 = sld [smem:[#allocation54_spill]]  ;;  %v714_v39 = vstv %s4285_s18  ;;  %v718_v24 = vmul.f32 %v717_v40, %v3200_v58 }
 0x101   : > { %s4294_s2 = sld [smem:[#allocation55_spill]]  ;;  %v721_v41 = vstv %s4288_s11  ;;  %2554 = vrsqrt.f32 %v3261_v59  ;;  %v551_v40 = vadd.f32 %v550_v43, %v547_v48  ;;  %v590_v28 = vadd.f32 %v589_v53, %v586_v18 }
 0x102   : > { %s4295_s14 = sld [smem:[#allocation56_spill]]  ;;  %v976_v43 = vmul.f32 %v975_v13, %v3200_v58  ;;  %vm540_vm3 = vcmp.eq.f32.partialorder %v3261_v59, inf  ;;  %vm542_vm4 = vcmp.eq.f32.partialorder %v3261_v59, 0.0 }
 0x103   : > { %s3166_s3 = sld [smem:[#allocation3 + $0x10d]]  ;;  %v725_v42 = vstv %s4289_s12 }
 0x104   : > { %4291 = sst [smem:[#allocation92_spill]] %s3158_s7 }
 0x105   : > { %s4298_s5 = sld [smem:[#allocation58_spill]]  ;;  %v757_v44 = vstv %s4292_s25 }
 0x106   : > { %s4299_s6 = sld [smem:[#allocation59_spill]]  ;;  %v760_v45 = vstv %s4293_s0 }
 0x107   : > { %s4300_s7 = sld [smem:[#allocation60_spill]]  ;;  %v764_v46 = vstv %s4294_s2  ;;  %v761_v25 = vmul.f32 %v760_v45, %v3200_v58  ;;  %v554_v45 = vmul.f32 %v553_v21, %v3235_v11  ;;  %v758_v21 = vmul.f32 %v757_v44, %v3226_v15 }
 0x108   : > { %s4301_s24 = sld [smem:[#allocation61_spill]]  ;;  %v768_v47 = vstv %s4295_s14 }
 0x109   : > { %4297 = sst [smem:[#allocation93_spill]] %s3166_s3  ;;  %v555_v13 = vadd.f32 %v554_v45, %v551_v40  ;;  %v762_v18 = vadd.f32 %v761_v25, %v758_v21 }
 0x10a   : > { %s3172_s20 = sld [smem:[#allocation3 + $0x18d]] }
 0x10b   : > { %s4304_s27 = sld [smem:[#allocation63_spill]]  ;;  %v800_v49 = vstv %s4298_s5 }
 0x10c   : > { %s4305_s22 = sld [smem:[#allocation64_spill]]  ;;  %v803_v50 = vstv %s4299_s6 }
 0x10d   : > { %s4306_s29 = sld [smem:[#allocation65_spill]]  ;;  %v807_v51 = vstv %s4300_s7  ;;  %v804_v30 = vmul.f32 %v803_v50, %v3200_v58  ;;  %v593_v50 = vmul.f32 %v592_v26, %v3235_v11  ;;  %v1019_v26 = vmul.f32 %v1018_v17, %v3200_v58 }
 0x10e   : > { %s3180_s19 = sld [smem:[#allocation6 + $0xd]]  ;;  %v811_v52 = vstv %s4301_s24  ;;  %v808_v20 = vmul.f32 %v807_v51, %v3235_v11  ;;  %v2555_v51 = vpop.eup %2554 }
 0x10f   : > { %s4310_s30 = sld [smem:[#allocation68_spill]]  ;;  %v594_v17 = vadd.f32 %v593_v50, %v590_v28 }
 0x110   : > { %4302 = sst [smem:[#allocation59_spill]] %s3172_s20 }
 0x111   : > { %s3186_s20 = sld [smem:[#allocation3 + $0xe]]  ;;  %v843_v55 = vstv %s4304_s27 }
 0x112   : > { %s4312_s11 = sld [smem:[#allocation69_spill]]  ;;  %v846_v56 = vstv %s4305_s22 }
 0x113   : > { %s4313_s12 = sld [smem:[#allocation70_spill]]  ;;  %v850_v57 = vstv %s4306_s29  ;;  %v847_v33 = vmul.f32 %v846_v56, %v3200_v58  ;;  %v636_v56 = vmul.f32 %v635_v31, %v3235_v11  ;;  %v679_v31 = vmul.f32 %v678_v36, %v3235_v11 }
 0x114   : > { %4307 = sst [smem:[#allocation63_spill]] %s3180_s19 }
 0x115   : > { %s3192_s3 = sld [smem:[#allocation3 + $0x8e]]  ;;  %v886_v61 = vstv %s4310_s30  ;;  %v637_v36 = vadd.f32 %v636_v56, %v633_v4 }
 0x116   : > { %s4316_s0 = sld [smem:[#allocation73_spill]]  ;;  %v887_v44 = vmul.f32 %v886_v61, %v3226_v15  ;;  %v765_v61 = vmul.f32 %v764_v46, %v3235_v11  ;;  %v1016_v46 = vmul.f32 %v1015_v2, %v3226_v15 }
 0x117   : > { %4311 = sst [smem:[#allocation64_spill]] %s3186_s20 }
 0x118   : > { %s4317_s2 = sld [smem:[#allocation74_spill]]  ;;  %v889_v62 = vstv %s4312_s11  ;;  %v766_v2 = vadd.f32 %v765_v61, %v762_v18  ;;  %v1020_v56 = vadd.f32 %v1019_v26, %v1016_v46 }
 0x119   : > { %s4318_s14 = sld [smem:[#allocation75_spill]]  ;;  %v893_v63 = vstv %s4313_s12  ;;  %v890_v35 = vmul.f32 %v889_v62, %v3200_v58  ;;  %v672_v62 = vmul.f32 %v671_v34, %v3226_v15  ;;  %v801_v34 = vmul.f32 %v800_v49, %v3226_v15 }
 0x11a   : > { %s3198_s20 = sld [smem:[#allocation3 + $0x10e]]  ;;  %v894_v4 = vmul.f32 %v893_v63, %v3235_v11 }
 0x11b   : > { %s4320_s7 = sld [smem:[#allocation78_spill]]  ;;  %v1147_v54 = vstv %s3192_s3  ;;  %v676_v48 = vadd.f32 %v675_v19, %v672_v62  ;;  %v805_v28 = vadd.f32 %v804_v30, %v801_v34  ;;  %v891_v40 = vadd.f32 %v890_v35, %v887_v44 }
 0x11c   : > { %s4321_s24 = sld [smem:[#allocation79_spill]]  ;;  %v929_v5 = vstv %s4316_s0 }
 0x11d   : > { %s3205_s5 = sld [smem:[#allocation3 + $0x18e]]  ;;  %v930_v53 = vmul.f32 %v929_v5, %v3226_v15  ;;  %v809_v25 = vadd.f32 %v808_v20, %v805_v28  ;;  %v3381_v35 = vadd.f32 %v894_v4, %v891_v40 }
 0x11e   : > { %s3211_s8 = sld [smem:[#allocation6 + $0xe]]  ;;  %v932_v6 = vstv %s4317_s2 }
 0x11f   : > { %v936_v7 = vstv %s4318_s14  ;;  %s3217_s18 = sld [smem:[#allocation3 + $0xf]]  ;;  %v933_v29 = vmul.f32 %v932_v6, %v3200_v58  ;;  %v715_v6 = vmul.f32 %v714_v39, %v3226_v15  ;;  %v844_v39 = vmul.f32 %v843_v55, %v3226_v15 }
 0x120   : > { %s4324_s25 = sld [smem:[#allocation86_spill]]  ;;  %v937_v19 = vmul.f32 %v936_v7, %v3235_v11 }
 0x121   : > { %v972_v12 = vstv %s4320_s7  ;;  %s3223_s21 = sld [smem:[#allocation3 + $0x8f]]  ;;  %v719_v49 = vadd.f32 %v718_v24, %v715_v6  ;;  %v848_v5 = vadd.f32 %v847_v33, %v844_v39  ;;  %v543_v33 = vand.u32 2147483648, %v3261_v59 }
 0x122   : > { %v979_v14 = vstv %s4321_s24  ;;  %s4325_s2 = sld [smem:[#allocation87_spill]]  ;;  %v973_v55 = vmul.f32 %v972_v12, %v3226_v15  ;;  %v934_v12 = vadd.f32 %v933_v29, %v930_v53  ;;  %v539_v29 = vmul.f32 %v2555_v51, %v3261_v59 }
 0x123   : > { %4322 = sst [smem:[#allocation68_spill]] %s3205_s5  ;;  %v980_v63 = vmul.f32 %v979_v14, %v3235_v11  ;;  %v680_v24 = vadd.f32 %v679_v31, %v676_v48  ;;  %v1023_v14 = vmul.f32 %v1022_v9, %v3235_v11 }
 0x124   : > { %4323 = sst [smem:[#allocation69_spill]] %s3211_s8  ;;  %v541_v45 = vsel %vm540_vm3, %v3261_v59, %v539_v29  ;;  %v3389_v50 = vadd.f32 %v937_v19, %v934_v12 }
 0x125   : > { %s4326_s4 = sld [smem:[#allocation88_spill]]  ;;  %v3396_v6 = vsel %vm542_vm4, %v543_v33, %v541_v45 }
 0x126   : > { %s3232_s13 = sld [smem:[#allocation3 + $0x10f]]  ;;  %v1058_v1 = vstv %s4324_s25  ;;  %v558_v26 = vmul.f32 %v557_v22, %v3396_v6  ;;  %v640_v59 = vmul.f32 %v639_v32, %v3396_v6  ;;  %v769_v22 = vmul.f32 %v768_v47, %v3396_v6 }
 0x127   : > { %s4329_s24 = sld [smem:[#allocation91_spill]]  ;;  %v1059_v62 = vmul.f32 %v1058_v1, %v3226_v15  ;;  %v597_v1 = vmul.f32 %v596_v27, %v3396_v6  ;;  %v812_v27 = vmul.f32 %v811_v52, %v3396_v6 }
 0x128   : > { %s4330_s12 = sld [smem:[#allocation92_spill]]  ;;  %v1061_v16 = vstv %s4325_s2  ;;  %v559_v32 = vadd.f32 %v558_v26, %v555_v13  ;;  %v641_v44 = vadd.f32 %v640_v59, %v637_v36  ;;  %v770_v53 = vadd.f32 %v769_v22, %v766_v2 }
 0x129   : > { %s4331_s29 = sld [smem:[#allocation93_spill]]  ;;  %v3333_v38 = vmul.f32 %v1061_v16, %v3200_v58  ;;  %v722_v16 = vmul.f32 %v721_v41, %v3235_v11  ;;  %v851_v41 = vmul.f32 %v850_v57, %v3235_v11  ;;  %v977_v57 = vadd.f32 %v976_v43, %v973_v55 }
 0x12a   : > { %s4332_s7 = sld [smem:[#allocation59_spill]]  ;;  %v598_v39 = vadd.f32 %v597_v1, %v594_v17  ;;  %v813_v48 = vadd.f32 %v812_v27, %v809_v25  ;;  %v1148_v2 = vmul.f32 %v1147_v54, %v3200_v58 }
 0x12b   : > { %s3240_s0 = sld [smem:[#allocation3 + $0x18f]]  ;;  %v1065_v60 = vstv %s4326_s4  ;;  %v723_v7 = vadd.f32 %v722_v16, %v719_v49  ;;  %v852_v30 = vadd.f32 %v851_v41, %v848_v5  ;;  %v3398_v21 = vadd.f32 %v980_v63, %v977_v57 }
 0x12c   : > { %s4333_s28 = sld [smem:[#allocation64_spill]]  ;;  %v3403_v9 = vmul.f32 %v1065_v60, %v3235_v11  ;;  %v683_v60 = vmul.f32 %v682_v37, %v3396_v6  ;;  %v1063_v46 = vadd.f32 %v3333_v38, %v1059_v62 }
 0x12d   : > { %s3247_s9 = sld [smem:[#allocation6 + $0xf]]  ;;  %v1101_v8 = vstv %s4329_s24 }
 0x12e   : > { %v1104_v0 = vstv %s4330_s12  ;;  %s4370_s22 = sld [smem:[#allocation66_spill]]  ;;  %v1102_v43 = vmul.f32 %v1101_v8, %v3226_v15  ;;  %v726_v8 = vmul.f32 %v725_v42, %v3396_v6  ;;  %v684_v37 = vadd.f32 %v683_v60, %v680_v24 }
 0x12f   : > { %s4371_s19 = sld [smem:[#allocation32_spill]]  ;;  %v1105_v42 = vmul.f32 %v1104_v0, %v3200_v58  ;;  %v3459_v0 = vadd.f32 %v1023_v14, %v1020_v56  ;;  %v4385_v5 = vstv %s4331_s29 }
 0x130   : > { %s4372_s23 = sld [smem:[#allocation39_spill]]  ;;  %v727_v16 = vadd.f32 %v726_v8, %v723_v7  ;;  %v3464_v40 = vmul.f32 %v4385_v5, %v3235_v11 }
 0x131   : > { %s4373_s4 = sld [smem:[#allocation42_spill]]  ;;  %v1106_v45 = vadd.f32 %v1105_v42, %v1102_v43 }
 0x132   : > { %v1144_v23 = vstv %s4333_s28  ;;  %s4374_s24 = sld [smem:[#allocation47_spill]] }
 0x133   : > { %s4375_s11 = sld [smem:[#allocation52_spill]]  ;;  %v1145_v29 = vmul.f32 %v1144_v23, %v3226_v15 }
 0x134   : > { %s4376_s5 = sld [smem:[#allocation57_spill]]  ;;  %v4377_v31 = vstv %s4370_s22 }
 0x135   : > { %v855_v34 = vmul.f32 %v4377_v31, %v3396_v6  ;;  %s4378_s8 = sld [smem:[#allocation62_spill]]  ;;  %v4379_v47 = vstv %s4371_s19  ;;  %v4389_v31 = vstv %s3198_s20 }
 0x136   : > { %v3437_v49 = vadd.f32 %v4379_v47, %v559_v32  ;;  %v4380_v52 = vstv %s4372_s23  ;;  %s4386_s12 = sld [smem:[#allocation67_spill]] }
 0x137   : > { %v3441_v55 = vadd.f32 %v4380_v52, %v598_v39  ;;  %v4381_v18 = vstv %s4373_s4  ;;  %v856_v19 = vadd.f32 %v855_v34, %v852_v30  ;;  %v3506_v34 = vmul.f32 %v4389_v31, %v3235_v11  ;;  %s4390_s3 = sld [smem:[#allocation71_spill]] }
 0x138   : > { %v3445_v61 = vadd.f32 %v4381_v18, %v641_v44  ;;  %v4382_v13 = vstv %s4374_s24  ;;  %v564_v4 = vmul.f32 %v3437_v49, %v3437_v49  ;;  %s4391_s28 = sld [smem:[#allocation76_spill]]  ;;  %v4393_v18 = vstv %s3217_s18 }
 0x139   : > { %v3449_v17 = vadd.f32 %v4382_v13, %v684_v37  ;;  %v4383_v36 = vstv %s4375_s11  ;;  %v603_v12 = vmul.f32 %v3441_v55, %v3441_v55  ;;  %s4392_s29 = sld [smem:[#allocation80_spill]]  ;;  %v1188_v13 = vmul.f32 %v4393_v18, %v3226_v15 }
 0x13a   : > { %v3453_v20 = vadd.f32 %v4383_v36, %v727_v16  ;;  %v4384_v41 = vstv %s4376_s5  ;;  %v646_v51 = vmul.f32 %v3445_v61, %v3445_v61  ;;  %v565_v24 = vmul.f32 %v564_v4, %v3437_v49  ;;  %s4395_s20 = sld [smem:[#allocation84_spill]] }
 0x13b   : > { %v3457_v28 = vadd.f32 %v4384_v41, %v770_v53  ;;  %v689_v33 = vmul.f32 %v3449_v17, %v3449_v17  ;;  %v4387_v57 = vstv %s4378_s8  ;;  %v604_v7 = vmul.f32 %v603_v12, %v3441_v55  ;;  %s4397_s26 = sld [smem:[#allocation72_spill]] }
 0x13c   : > { %v3477_v63 = vadd.f32 %v4387_v57, %v813_v48  ;;  %v732_v38 = vmul.f32 %v3453_v20, %v3453_v20  ;;  %v647_v25 = vmul.f32 %v646_v51, %v3445_v61  ;;  %v566_v23 = vmul.f32 0.044715, %v565_v24  ;;  %s4399_s18 = sld [smem:[#allocation77_spill]] }
 0x13d   : > { %v690_v30 = vmul.f32 %v689_v33, %v3449_v17  ;;  %v775_v14 = vmul.f32 %v3457_v28, %v3457_v28  ;;  %v605_v56 = vmul.f32 0.044715, %v604_v7  ;;  %v4388_v26 = vstv %s4386_s12  ;;  %s3538_s14 = sld [smem:[#allocation8 + $0x1]] }
 0x13e   : > { %v733_v62 = vmul.f32 %v732_v38, %v3453_v20  ;;  %v3496_v1 = vadd.f32 %v4388_v26, %v856_v19  ;;  %v648_v59 = vmul.f32 0.044715, %v647_v25  ;;  %v818_v8 = vmul.f32 %v3477_v63, %v3477_v63  ;;  %s4403_s30 = sld [smem:[#allocation81_spill]] }
 0x13f   : > { %v691_v60 = vmul.f32 0.044715, %v690_v30  ;;  %v776_v54 = vmul.f32 %v775_v14, %v3457_v28  ;;  %v567_v22 = vadd.f32 %v566_v23, %v3437_v49  ;;  %v606_v43 = vadd.f32 %v605_v56, %v3441_v55  ;;  %s4405_s25 = sld [smem:[#allocation85_spill]] }
 0x140   : > { %v734_v27 = vmul.f32 0.044715, %v733_v62  ;;  %v649_v32 = vadd.f32 %v648_v59, %v3445_v61  ;;  %v819_v37 = vmul.f32 %v818_v8, %v3477_v63  ;;  %v861_v42 = vmul.f32 %v3496_v1, %v3496_v1  ;;  %s3545_s27 = sld [smem:[#allocation8 + $0x81]] }
 0x141   : > { %v692_v39 = vadd.f32 %v691_v60, %v3449_v17  ;;  %v777_v44 = vmul.f32 0.044715, %v776_v54  ;;  %v568_v16 = vmul.f32 0.7978846, %v567_v22  ;;  %v607_v53 = vmul.f32 0.7978846, %v606_v43 }
 0x142   : > { %v735_v48 = vadd.f32 %v734_v27, %v3453_v20  ;;  %v650_v47 = vmul.f32 0.7978846, %v649_v32  ;;  %v820_v52 = vmul.f32 0.044715, %v819_v37  ;;  %v4394_v36 = vstv %s3223_s21  ;;  %s4400_s21 = sld [smem:[#allocation89_spill]] }
 0x143   : > { %v1191_v41 = vmul.f32 %v4394_v36, %v3200_v58  ;;  %v693_v5 = vmul.f32 0.7978846, %v692_v39  ;;  %v778_v4 = vadd.f32 %v777_v44, %v3457_v28  ;;  %v862_v12 = vmul.f32 %v861_v42, %v3496_v1  ;;  %s3562_s2 = sld [smem:[#allocation8 + $0x101]] }
 0x144   : > { %v4396_v19 = vstv %s4390_s3  ;;  %2556 = vtanh.f32 %v568_v16  ;;  %v736_v33 = vmul.f32 0.7978846, %v735_v48  ;;  %v4398_v57 = vstv %s4391_s28  ;;  %s4410_s16 = sld [smem:[#allocation90_spill]] }
 0x145   : > { %v898_v51 = vmul.f32 %v4396_v19, %v3396_v6  ;;  %v941_v24 = vmul.f32 %v4398_v57, %v3396_v6  ;;  %v1067_v15 = vadd.f32 %v3403_v9, %v1063_v46  ;;  %2558 = vtanh.f32 %v607_v53  ;;  %s3574_s15 = sld [smem:[#allocation8 + $0x181]] }
 0x146   : > { %v863_v58 = vmul.f32 0.044715, %v862_v12  ;;  %v4401_v38 = vstv %s4392_s29  ;;  %2560 = vtanh.f32 %v650_v47  ;;  %v821_v30 = vadd.f32 %v820_v52, %v3477_v63  ;;  %s3582_s1 = sld [smem:[#allocation8 + $0x281]] }
 0x147   : > { %v899_v7 = vadd.f32 %v898_v51, %v3381_v35  ;;  %v984_v25 = vmul.f32 %v4401_v38, %v3396_v6  ;;  %v942_v14 = vadd.f32 %v941_v24, %v3389_v50  ;;  %v4402_v23 = vstv %s4395_s20  ;;  %s4414_s10 = sld [smem:[#allocation68_spill]] }
 0x148   : > { %v1027_v56 = vmul.f32 %v4402_v23, %v3396_v6  ;;  %2562 = vtanh.f32 %v693_v5  ;;  %v779_v9 = vmul.f32 0.7978846, %v778_v4  ;;  %v4404_v46 = vstv %s4397_s26  ;;  %s3605_s17 = sld [smem:[#allocation8 + $0x381]] }
 0x149   : > { %v3542_v35 = vadd.f32 %v4404_v46, %v899_v7  ;;  %v985_v62 = vadd.f32 %v984_v25, %v3398_v21  ;;  %v864_v26 = vadd.f32 %v863_v58, %v3496_v1  ;;  %v4406_v59 = vstv %s4399_s18  ;;  %s4416_s6 = sld [smem:[#allocation63_spill]] }
 0x14a   : > { %v3550_v50 = vadd.f32 %v4406_v59, %v942_v14  ;;  %v1028_v60 = vadd.f32 %v1027_v56, %v3459_v0  ;;  %v4407_v54 = vstv %s4400_s21  ;;  %v1110_v43 = vadd.f32 %v3464_v40, %v1106_v45  ;;  %s4419_s22 = sld [smem:[#allocation69_spill]] }
 0x14b   : > { %v1070_v8 = vmul.f32 %v4407_v54, %v3396_v6  ;;  %v904_v22 = vmul.f32 %v3542_v35, %v3542_v35  ;;  %v1149_v27 = vadd.f32 %v1148_v2, %v1145_v29  ;;  %v4408_v21 = vstv %s3232_s13  ;;  %s3577_s13 = sld [smem:[#allocation8 + $0x201]] }
 0x14c   : > { %v1195_v31 = vmul.f32 %v4408_v21, %v3235_v11  ;;  %v822_v32 = vmul.f32 0.7978846, %v821_v30  ;;  %v947_v39 = vmul.f32 %v3550_v50, %v3550_v50  ;;  %v4409_v44 = vstv %s4403_s30  ;;  %s3634_s19 = sld [smem:[#allocation8]] }
 0x14d   : > { %v3568_v0 = vadd.f32 %v4409_v44, %v985_v62  ;;  %v4411_v37 = vstv %s4405_s25  ;;  %2564 = vtanh.f32 %v736_v33  ;;  %v905_v40 = vmul.f32 %v904_v22, %v3542_v35  ;;  %s3654_s23 = sld [smem:[#allocation8 + $0x401]] }
 0x14e   : > { %v3572_v16 = vadd.f32 %v4411_v37, %v1028_v60  ;;  %v1071_v11 = vadd.f32 %v1070_v8, %v1067_v15  ;;  %v1192_v29 = vadd.f32 %v1191_v41, %v1188_v13  ;;  %2566 = vtanh.f32 %v779_v9  ;;  %s3663_s4 = sld [smem:[#allocation8 + $0x481]] }
 0x14f   : > { %v865_v2 = vmul.f32 0.7978846, %v864_v26  ;;  %v948_v45 = vmul.f32 %v947_v39, %v3550_v50  ;;  %v990_v53 = vmul.f32 %v3568_v0, %v3568_v0  ;;  %v906_v48 = vmul.f32 0.044715, %v905_v40  ;;  %s3669_s24 = sld [smem:[#allocation8 + $0x501]] }
 0x150   : > { %v1033_v42 = vmul.f32 %v3572_v16, %v3572_v16  ;;  %v4412_v47 = vstv %s4410_s16  ;;  %v4413_v18 = vstv %s4332_s7  ;;  %2568 = vtanh.f32 %v822_v32  ;;  %s3602_s7 = sld [smem:[#allocation8 + $0x301]] }
 0x151   : > { %v3588_v52 = vadd.f32 %v4412_v47, %v1071_v11  ;;  %v1113_v13 = vmul.f32 %v4413_v18, %v3396_v6  ;;  %v949_v36 = vmul.f32 0.044715, %v948_v45  ;;  %v991_v41 = vmul.f32 %v990_v53, %v3568_v0  ;;  %v2557_v15 = vpop.eup %2556  ;;  %s3682_s11 = sld [smem:[#allocation8 + $0x601]] }
 0x152   : > { %v1153_v5 = vadd.f32 %v3506_v34, %v1149_v27  ;;  %v907_v4 = vadd.f32 %v906_v48, %v3542_v35  ;;  %v1034_v12 = vmul.f32 %v1033_v42, %v3572_v16  ;;  %v576_v19 = vstv %s3538_s14  ;;  %v2559_v25 = vpop.eup %2558  ;;  %s3690_s5 = sld [smem:[#allocation8 + $0x681]] }
 0x153   : > { %v616_v51 = vstv %s3545_s27  ;;  %2570 = vtanh.f32 %v865_v2  ;;  %v950_v33 = vadd.f32 %v949_v36, %v3550_v50  ;;  %v992_v57 = vmul.f32 0.044715, %v991_v41  ;;  %v2561_v46 = vpop.eup %2560  ;;  %s3696_s8 = sld [smem:[#allocation8 + $0x2]] }
 0x154   : > { %v1076_v24 = vmul.f32 %v3588_v52, %v3588_v52  ;;  %v908_v34 = vmul.f32 0.7978846, %v907_v4  ;;  %v1035_v58 = vmul.f32 0.044715, %v1034_v12  ;;  %v1114_v7 = vadd.f32 %v1113_v13, %v1110_v43  ;;  %s3701_s12 = sld [smem:[#allocation8 + $0x82]] }
 0x155   : > { %v659_v38 = vstv %s3562_s2  ;;  %v951_v30 = vmul.f32 0.7978846, %v950_v33  ;;  %v993_v14 = vadd.f32 %v992_v57, %v3568_v0  ;;  %v4415_v23 = vstv %s4414_s10  ;;  %v2563_v60 = vpop.eup %2562  ;;  %s3707_s3 = sld [smem:[#allocation8 + $0x102]] }
 0x156   : > { %v1156_v56 = vmul.f32 %v4415_v23, %v3396_v6  ;;  %v1196_v9 = vadd.f32 %v1195_v31, %v1192_v29  ;;  %2572 = vtanh.f32 %v908_v34  ;;  %v1036_v62 = vadd.f32 %v1035_v58, %v3572_v16  ;;  %s3713_s28 = sld [smem:[#allocation8 + $0x182]] }
 0x157   : > { %v702_v26 = vstv %s3574_s15  ;;  %v745_v59 = vstv %s3577_s13  ;;  %v563_v54 = vmul.f32 0.5, %v3437_v49  ;;  %v994_v8 = vmul.f32 0.7978846, %v993_v14  ;;  %s3716_s29 = sld [smem:[#allocation8 + $0x202]] }
 0x158   : > { %v1077_v22 = vmul.f32 %v1076_v24, %v3588_v52  ;;  %v788_v43 = vstv %s3582_s1  ;;  %v570_v27 = vadd.f32 1.0, %v2557_v15  ;;  %2574 = vtanh.f32 %v951_v30  ;;  %s3723_s20 = sld [smem:[#allocation8 + $0x282]] }
 0x159   : > { %v1037_v21 = vmul.f32 0.7978846, %v1036_v62  ;;  %v4417_v32 = vstv %s4416_s6  ;;  %v602_v39 = vmul.f32 0.5, %v3441_v55  ;;  %v609_v44 = vadd.f32 1.0, %v2559_v25  ;;  %s3728_s26 = sld [smem:[#allocation8 + $0x701]] }
 0x15a   : > { %v3619_v31 = vadd.f32 %v4417_v32, %v1114_v7  ;;  %2576 = vtanh.f32 %v994_v8  ;;  %v1157_v37 = vadd.f32 %v1156_v56, %v1153_v5  ;;  %v645_v40 = vmul.f32 0.5, %v3445_v61  ;;  %v2565_v2 = vpop.eup %2564  ;;  %s3735_s18 = sld [smem:[#allocation8 + $0x302]] }
 0x15b   : > { %v652_v49 = vadd.f32 1.0, %v2561_v46  ;;  %2578 = vtanh.f32 %v1037_v21  ;;  %v4418_v11 = vstv %s3240_s0  ;;  %v688_v45 = vmul.f32 0.5, %v3449_v17  ;;  %v2567_v47 = vpop.eup %2566  ;;  %s3647_s0 = sld [smem:[#allocation2]] }
 0x15c   : > { %v1199_v29 = vmul.f32 %v4418_v11, %v3396_v6  ;;  %v695_v53 = vadd.f32 1.0, %v2563_v60  ;;  %v1078_v48 = vmul.f32 0.044715, %v1077_v22  ;;  %v831_v42 = vstv %s3602_s7  ;;  %s3743_s21 = sld [smem:[#allocation8 + $0x781]] }
 0x15d   : > { %v3628_v55 = vmul.f32 %v570_v27, %v563_v54  ;;  %v731_v18 = vmul.f32 0.5, %v3453_v20  ;;  %v1119_v61 = vmul.f32 %v3619_v31, %v3619_v31  ;;  %v874_v13 = vstv %s3605_s17  ;;  %v2569_v4 = vpop.eup %2568  ;;  %s3748_s14 = sld [smem:[#allocation8 + $0x382]] }
 0x15e   : > { %v3636_v36 = vmul.f32 %v609_v44, %v602_v39  ;;  %v774_v6 = vmul.f32 0.5, %v3457_v28  ;;  %v1079_v17 = vadd.f32 %v1078_v48, %v3588_v52  ;;  %v4420_v41 = vstv %s4419_s22  ;;  %s3750_s30 = sld [smem:[#allocation9 + $0x1]] }
 0x15f   : > { %v3642_v5 = vadd.f32 %v4420_v41, %v1157_v37  ;;  %v3644_v12 = vmul.f32 %v652_v49, %v645_v40  ;;  %v738_v20 = vadd.f32 1.0, %v2565_v2  ;;  %v1120_v33 = vmul.f32 %v1119_v61, %v3619_v31  ;;  %s3758_s25 = sld [smem:[#allocation8 + $0x402]] }
 0x160   : > { %v1200_v57 = vadd.f32 %v1199_v29, %v1196_v9  ;;  %v3649_v24 = vmul.f32 %v695_v53, %v688_v45  ;;  %v817_v28 = vmul.f32 0.5, %v3477_v63  ;;  %v1080_v15 = vmul.f32 0.7978846, %v1079_v17  ;;  %v2571_v58 = vpop.eup %2570  ;;  %s3763_s27 = sld [smem:[#allocation8 + $0x482]] }
 0x161   : > { %v1162_v34 = vmul.f32 %v3642_v5, %v3642_v5  ;;  %v781_v7 = vadd.f32 1.0, %v2567_v47  ;;  %v1121_v25 = vmul.f32 0.044715, %v1120_v33  ;;  %v4421_v30 = vstv %s3247_s9  ;;  %s3679_s9 = sld [smem:[#allocation8 + $0x581]] }
 0x162   : > { %v3658_v14 = vadd.f32 %v4421_v30, %v1200_v57  ;;  %v577_v23 = vmul.f32 %v576_v19, %v3628_v55  ;;  %v824_v56 = vadd.f32 1.0, %v2569_v4  ;;  %2580 = vtanh.f32 %v1080_v15  ;;  %s3769_s2 = sld [smem:[#allocation8 + $0x502]] }
 0x163   : > { %v1163_v63 = vmul.f32 %v1162_v34, %v3642_v5  ;;  %v617_v9 = vmul.f32 %v616_v51, %v3636_v36  ;;  %v3671_v46 = vmul.f32 %v738_v20, %v731_v18  ;;  %v1122_v62 = vadd.f32 %v1121_v25, %v3619_v31  ;;  %v2573_v54 = vpop.eup %2572  ;;  %s3773_s16 = sld [smem:[#allocation8 + $0x582]] }
 0x164   : > { %v1205_v60 = vmul.f32 %v3658_v14, %v3658_v14  ;;  %v660_v19 = vmul.f32 %v659_v38, %v3644_v12  ;;  %v860_v8 = vmul.f32 0.5, %v3496_v1  ;;  %v867_v22 = vadd.f32 1.0, %v2571_v58  ;;  %s3777_s15 = sld [smem:[#allocation8 + $0x602]] }
 0x165   : > { %v1164_v51 = vmul.f32 0.044715, %v1163_v63  ;;  %v618_v27 = vadd.f32 %v617_v9, %v577_v23  ;;  %v3684_v21 = vmul.f32 %v781_v7, %v774_v6  ;;  %v1123_v32 = vmul.f32 0.7978846, %v1122_v62  ;;  %v2575_v38 = vpop.eup %2574  ;;  %s3782_s13 = sld [smem:[#allocation8 + $0x682]] }
 0x166   : > { %v1206_v39 = vmul.f32 %v1205_v60, %v3658_v14  ;;  %v703_v44 = vmul.f32 %v702_v26, %v3649_v24  ;;  %v3692_v37 = vmul.f32 %v824_v56, %v817_v28  ;;  %v903_v1 = vmul.f32 0.5, %v3542_v35  ;;  %s3788_s1 = sld [smem:[#allocation8 + $0x3]] }
 0x167   : > { %v1165_v40 = vadd.f32 %v1164_v51, %v3642_v5  ;;  %v661_v49 = vadd.f32 %v660_v19, %v618_v27  ;;  %v2577_v11 = vpop.eup %2576  ;;  %v910_v29 = vadd.f32 1.0, %v2573_v54  ;;  %2582 = vtanh.f32 %v1123_v32  ;;  %s3792_s10 = sld [smem:[#allocation8 + $0x83]] }
 0x168   : > { %v1207_v2 = vmul.f32 0.044715, %v1206_v39  ;;  %v746_v26 = vmul.f32 %v745_v59, %v3671_v46  ;;  %v2579_v45 = vpop.eup %2578  ;;  %v3703_v53 = vmul.f32 %v867_v22, %v860_v8  ;;  %v946_v35 = vmul.f32 0.5, %v3550_v50  ;;  %s3797_s7 = sld [smem:[#allocation8 + $0x103]] }
 0x169   : > { %v989_v48 = vmul.f32 0.5, %v3568_v0  ;;  %v1166_v47 = vmul.f32 0.7978846, %v1165_v40  ;;  %v953_v18 = vadd.f32 1.0, %v2575_v38  ;;  %v704_v59 = vadd.f32 %v703_v44, %v661_v49  ;;  %s3803_s17 = sld [smem:[#allocation8 + $0x183]] }
 0x16a   : > { %v1208_v61 = vadd.f32 %v1207_v2, %v3658_v14  ;;  %v789_v6 = vmul.f32 %v788_v43, %v3684_v21  ;;  %v996_v17 = vadd.f32 1.0, %v2577_v11  ;;  %v1032_v50 = vmul.f32 0.5, %v3572_v16  ;;  %s3807_s6 = sld [smem:[#allocation8 + $0x702]] }
 0x16b   : > { %v1039_v0 = vadd.f32 1.0, %v2579_v45  ;;  %2584 = vtanh.f32 %v1166_v47  ;;  %v3718_v41 = vmul.f32 %v910_v29, %v903_v1  ;;  %v747_v20 = vadd.f32 %v746_v26, %v704_v59  ;;  %s3812_s22 = sld [smem:[#allocation8 + $0x203]] }
 0x16c   : > { %v1209_v4 = vmul.f32 0.7978846, %v1208_v61  ;;  %v832_v33 = vmul.f32 %v831_v42, %v3692_v37  ;;  %v917_v43 = vstv %s3654_s23  ;;  %v960_v57 = vstv %s3663_s4  ;;  %s3817_s23 = sld [smem:[#allocation8 + $0x283]] }
 0x16d   : > { %v1003_v28 = vstv %s3669_s24  ;;  %v3730_v16 = vmul.f32 %v953_v18, %v946_v35  ;;  %v790_v15 = vadd.f32 %v789_v6, %v747_v20  ;;  %v875_v34 = vmul.f32 %v874_v13, %v3703_v53  ;;  %s3821_s4 = sld [smem:[#allocation8 + $0x782]] }
 0x16e   : > { %2586 = vtanh.f32 %v1209_v4  ;;  %v3737_v42 = vmul.f32 %v996_v17, %v989_v48  ;;  %v3739_v58 = vmul.f32 %v1039_v0, %v1032_v50  ;;  %v1075_v7 = vmul.f32 0.5, %v3588_v52  ;;  %s3826_s24 = sld [smem:[#allocation8 + $0x303]] }
 0x16f   : > { %v1046_v25 = vstv %s3679_s9  ;;  %v2581_v30 = vpop.eup %2580  ;;  %v833_v23 = vadd.f32 %v832_v33, %v790_v15  ;;  %v918_v56 = vmul.f32 %v917_v43, %v3718_v41  ;;  %v579_v63 = vstv %s3696_s8  ;;  %s3828_s9 = sld [smem:[#allocation8 + $0x80]] }
 0x170   : > { %v620_v13 = vstv %s3701_s12  ;;  %v1082_v9 = vadd.f32 1.0, %v2581_v30  ;;  %v580_v62 = vmul.f32 %v579_v63, %v3628_v55  ;;  %v663_v60 = vstv %s3707_s3  ;;  %s3855_s8 = sld [smem:[#allocation9 + $0x2]] }
 0x171   : > { %v621_v52 = vmul.f32 %v620_v13, %v3636_v36  ;;  %v876_v19 = vadd.f32 %v875_v34, %v833_v23  ;;  %v961_v54 = vmul.f32 %v960_v57, %v3730_v16  ;;  %v664_v8 = vmul.f32 %v663_v60, %v3644_v12  ;;  %s3866_s12 = sld [smem:[#allocation8 + $0x100]] }
 0x172   : > { %v706_v22 = vstv %s3713_s28  ;;  %v1118_v51 = vmul.f32 0.5, %v3619_v31  ;;  %v749_v39 = vstv %s3716_s29  ;;  %v3765_v44 = vmul.f32 %v1082_v9, %v1075_v7  ;;  %s3874_s3 = sld [smem:[#allocation8 + $0x503]] }
 0x173   : > { %v622_v27 = vadd.f32 %v621_v52, %v580_v62  ;;  %v707_v32 = vmul.f32 %v706_v22, %v3649_v24  ;;  %v919_v38 = vadd.f32 %v918_v56, %v876_v19  ;;  %v1004_v1 = vmul.f32 %v1003_v28, %v3737_v42  ;;  %s3881_s28 = sld [smem:[#allocation8 + $0x583]] }
 0x174   : > { %v792_v40 = vstv %s3723_s20  ;;  %v2583_v49 = vpop.eup %2582  ;;  %v1089_v11 = vstv %s3682_s11  ;;  %v750_v31 = vmul.f32 %v749_v39, %v3671_v46  ;;  %v1047_v45 = vmul.f32 %v1046_v25, %v3739_v58  ;;  %s3836_s11 = sld [smem:[#allocation8 + $0x383]] }
 0x175   : > { %v665_v29 = vadd.f32 %v664_v8, %v622_v27  ;;  %v1125_v2 = vadd.f32 1.0, %v2583_v49  ;;  %v962_v26 = vadd.f32 %v961_v54, %v919_v38  ;;  %v835_v35 = vstv %s3735_s18  ;;  %s3883_s29 = sld [smem:[#allocation8 + $0x180]] }
 0x176   : > { %v1161_v48 = vmul.f32 0.5, %v3642_v5  ;;  %v1132_v47 = vstv %s3690_s5  ;;  %v793_v61 = vmul.f32 %v792_v40, %v3684_v21  ;;  %v1090_v50 = vmul.f32 %v1089_v11, %v3765_v44  ;;  %s3853_s5 = sld [smem:[#allocation8 + $0x403]] }
 0x177   : > { %v708_v18 = vadd.f32 %v707_v32, %v665_v29  ;;  %v3784_v6 = vmul.f32 %v1125_v2, %v1118_v51  ;;  %v1005_v17 = vadd.f32 %v1004_v1, %v962_v26  ;;  %v878_v0 = vstv %s3748_s14  ;;  %s3888_s20 = sld [smem:[#allocation8 + $0x603]] }
 0x178   : > { %v2585_v59 = vpop.eup %2584  ;;  %v1175_v20 = vstv %s3728_s26  ;;  %v836_v5 = vmul.f32 %v835_v35, %v3692_v37  ;;  %v1204_v43 = vmul.f32 0.5, %v3658_v14  ;;  %v921_v15 = vstv %s3758_s25  ;;  %s3898_s26 = sld [smem:[#allocation8 + $0x200]] }
 0x179   : > { %v1168_v4 = vadd.f32 1.0, %v2585_v59  ;;  %v751_v33 = vadd.f32 %v750_v31, %v708_v18  ;;  %v1048_v57 = vadd.f32 %v1047_v45, %v1005_v17  ;;  %v1133_v28 = vmul.f32 %v1132_v47, %v3784_v6  ;;  %s3902_s18 = sld [smem:[#allocation8 + $0x703]] }
 0x17a   : > { %v4422_v25 = vlaneseq  ;;  %v879_v56 = vmul.f32 %v878_v0, %v3703_v53  ;;  %v1218_v13 = vstv %s3743_s21  ;;  %v964_v9 = vstv %s3763_s27  ;;  %s2351_s21 = sld [smem:[#allocation8 + $0x783]] }
 0x17b   : > { %v2587_v34 = vpop.eup %2586  ;;  %v3799_v7 = vmul.f32 %v1168_v4, %v1161_v48  ;;  %v794_v23 = vadd.f32 %v793_v61, %v751_v33  ;;  %v1091_v14 = vadd.f32 %v1090_v50, %v1048_v57  ;;  %v922_v60 = vmul.f32 %v921_v15, %v3718_v41  ;;  %s2258_s14 = sld [smem:[#allocation8 + $0x280]] }
 0x17c   : > { %v1230_v30 = vand.u32 127, %v4422_v25  ;;  %v1211_v63 = vadd.f32 1.0, %v2587_v34  ;;  %v1007_v19 = vstv %s3769_s2  ;;  %v1050_v22 = vstv %s3773_s16  ;;  %s2365_s25 = sld [smem:[#allocation9 + $0x3]] }
 0x17d   : > { %v1176_v62 = vmul.f32 %v1175_v20, %v3799_v7  ;;  %v837_v52 = vadd.f32 %v836_v5, %v794_v23  ;;  %v1134_v8 = vadd.f32 %v1133_v28, %v1091_v14  ;;  %v965_v27 = vmul.f32 %v964_v9, %v3730_v16  ;;  %s2276_s27 = sld [smem:[#allocation8 + $0x380]] }
 0x17e   : > { %v3814_v54 = vmul.f32 %v1211_v63, %v1204_v43  ;;  %vm1231_vm5 = vcmp.ge.s32.totalorder %v1230_v30, 1  ;;  %v1431_v38 = vstv %s3750_s30  ;;  %v1008_v1 = vmul.f32 %v1007_v19, %v3737_v42  ;;  %s2267_s30 = sld [smem:[#allocation8 + $0x300]] }
 0x17f   : > { %v880_v51 = vadd.f32 %v879_v56, %v837_v52  ;;  %v1177_v32 = vadd.f32 %v1176_v62, %v1134_v8  ;;  %v1051_v49 = vmul.f32 %v1050_v22, %v3739_v58  ;;  %v1093_v11 = vstv %s3777_s15  ;;  %vm3841_vm7 = vmand %vm1236_vm6, %vm1231_vm5  ;;  %s2285_s2 = sld [smem:[#allocation8 + $0x400]] }
 0x180   : > { %v1219_v39 = vmul.f32 %v1218_v13, %v3814_v54  ;;  %v582_v29 = vstv %s3788_s1  ;;  %v1136_v2 = vstv %s3782_s13  ;;  %v624_v45 = vstv %s3792_s10  ;;  %s2294_s16 = sld [smem:[#allocation8 + $0x480]] }
 0x181   : > { %v923_v40 = vadd.f32 %v922_v60, %v880_v51  ;;  %v583_v26 = vmul.f32 %v582_v29, %v3628_v55  ;;  %v625_v47 = vmul.f32 %v624_v45, %v3636_v36  ;;  %v667_v18 = vstv %s3797_s7  ;;  %s2303_s15 = sld [smem:[#allocation8 + $0x500]] }
 0x182   : > { %v1220_v31 = vadd.f32 %v1219_v39, %v1177_v32  ;;  %v710_v61 = vstv %s3803_s17  ;;  %v3849_v59 = vstv %s3647_s0  ;;  %v1094_v50 = vmul.f32 %v1093_v11, %v3765_v44  ;;  %s3864_s0 = sld [smem:[#allocation8 + $0x483]] }
 0x183   : > { %v966_v48 = vadd.f32 %v965_v27, %v923_v40  ;;  %v668_v0 = vmul.f32 %v667_v18, %v3644_v12  ;;  %v626_v4 = vadd.f32 %v625_v47, %v583_v26  ;;  %v711_v20 = vmul.f32 %v710_v61, %v3649_v24  ;;  %s2312_s13 = sld [smem:[#allocation8 + $0x580]] }
 0x184   : > { %v1432_v17 = vadd.f32 %v1431_v38, %v1220_v31  ;;  %v753_v33 = vstv %s3812_s22  ;;  %v1137_v43 = vmul.f32 %v1136_v2, %v3784_v6  ;;  %v1179_v57 = vstv %s3807_s6  ;;  %s2321_s1 = sld [smem:[#allocation8 + $0x600]] }
 0x185   : > { %v1009_v3 = vadd.f32 %v1008_v1, %v966_v48  ;;  %v796_v28 = vstv %s3817_s23  ;;  %v669_v25 = vadd.f32 %v668_v0, %v626_v4  ;;  %v754_v30 = vmul.f32 %v753_v33, %v3671_v46  ;;  %s2330_s10 = sld [smem:[#allocation8 + $0x680]]  ;;  %s2767_s23 = smov 88  }
 0x186   : > { %v1433_v5 = vsel %vm3841_vm7, %v1432_v17, 0.0  ;;  %v1222_v23 = vstv %s3821_s4  ;;  %v839_v56 = vstv %s3826_s24  ;;  %v1180_v14 = vmul.f32 %v1179_v57, %v3799_v7  ;;  %s2339_s7 = sld [smem:[#allocation8 + $0x700]]  ;;  %s2768_s4 = smov 120  }
 0x187   : > { %v3869_v15 = vmul.f32 %v1433_v5, %v3849_v59  ;;  %v1052_v34 = vadd.f32 %v1051_v49, %v1009_v3  ;;  %v712_v13 = vadd.f32 %v711_v20, %v669_v25  ;;  %v797_v9 = vmul.f32 %v796_v28, %v3684_v21  ;;  %s2348_s17 = sld [smem:[#allocation8 + $0x780]]  ;;  %s2769_s24 = smov 112  }
 0x188   : > { %v573_v62 = vstv %s3634_s19  ;;  %v612_v52 = vstv %s3828_s9  ;;  %v882_v60 = vstv %s3836_s11  ;;  %v1223_v8 = vmul.f32 %v1222_v23, %v3814_v54  ;;  %s3895_s19 = sld [smem:[#allocation8 + $0x683]]  ;;  %s2770_s9 = smov 104  }
 0x189   : > { %v1095_v63 = vadd.f32 %v1094_v50, %v1052_v34  ;;  %v755_v22 = vadd.f32 %v754_v30, %v712_v13  ;;  %v840_v51 = vmul.f32 %v839_v56, %v3692_v37  ;;  %v925_v27 = vstv %s3853_s5  ;;  %s1245_s6 = sld [smem:[#allocation9]]  ;;  %s2771_s5 = smov 64  }
 0x18a   : > { %v883_v38 = vmul.f32 %v882_v60, %v3703_v53  ;;  %v574_v1 = vmul.f32 %v573_v62, %v3628_v55  ;;  %v613_v40 = vmul.f32 %v612_v52, %v3636_v36  ;;  %v1610_v49 = vstv %s3855_s8  ;;  %s4425_s22 = sld [smem:[#allocation27_spill]]  ;;  %s2772_s8 = smov 80  }
 0x18b   : > { %v1138_v19 = vadd.f32 %v1137_v43, %v1095_v63  ;;  %v798_v39 = vadd.f32 %v797_v9, %v755_v22  ;;  %v968_v11 = vstv %s3864_s0  ;;  %v655_v29 = vstv %s3866_s12  ;;  %s4426_s11 = sld [smem:[#allocation17_spill]]  ;;  %s2773_s0 = smov 72  }
 0x18c   : > { %v926_v26 = vmul.f32 %v925_v27, %v3718_v41  ;;  %v1011_v45 = vstv %s3874_s3  ;;  %v969_v36 = vmul.f32 %v968_v11, %v3730_v16  ;;  %v614_v47 = vadd.f32 %v613_v40, %v574_v1 }
 0x18d   : > { %v1181_v32 = vadd.f32 %v1180_v14, %v1138_v19  ;;  %v841_v2 = vadd.f32 %v840_v51, %v798_v39  ;;  %v656_v18 = vmul.f32 %v655_v29, %v3644_v12  ;;  %v1054_v61 = vstv %s3881_s28 }
 0x18e   : > { %v698_v17 = vstv %s3883_s29  ;;  %v1012_v3 = vmul.f32 %v1011_v45, %v3737_v42  ;;  %v1097_v20 = vstv %s3888_s20  ;;  %v1055_v5 = vmul.f32 %v1054_v61, %v3739_v58  ;;  %s2774_s29 = smov 56   ;;  %s2775_s20 = smov 40  }
 0x18f   : > { %v1224_v31 = vadd.f32 %v1223_v8, %v1181_v32  ;;  %v884_v48 = vadd.f32 %v883_v38, %v841_v2  ;;  %v657_v43 = vadd.f32 %v656_v18, %v614_v47  ;;  %v699_v12 = vmul.f32 %v698_v17, %v3649_v24 }
 0x190   : > { %v1140_v57 = vstv %s3895_s19  ;;  %v741_v28 = vstv %s3898_s26  ;;  %v1098_v25 = vmul.f32 %v1097_v20, %v3765_v44  ;;  %v1183_v30 = vstv %s3902_s18  ;;  %s2776_s19 = smov 48   ;;  %s4428_s26 = sld [smem:[#allocation19_spill]] }
 0x191   : > { %v1611_v55 = vadd.f32 %v1610_v49, %v1224_v31  ;;  %v927_v0 = vadd.f32 %v926_v26, %v884_v48  ;;  %v1141_v56 = vmul.f32 %v1140_v57, %v3784_v6  ;;  %v700_v63 = vadd.f32 %v699_v12, %v657_v43  ;;  %s474_s12 = sand.u32 1, %s4426_s11   ;;  %s4429_s18 = sld [smem:[#allocation23_spill]] }
 0x192   : > { %v742_v14 = vmul.f32 %v741_v28, %v3671_v46  ;;  %v1226_v13 = vstv %s2351_s21  ;;  %v784_v9 = vstv %s2258_s14  ;;  %v1184_v24 = vmul.f32 %v1183_v30, %v3799_v7  ;;  %s2206_s3 = sshll.u32 %s474_s12, 5 }
 0x193   : > { %v1612_v50 = vsel %vm3841_vm7, %v1611_v55, 0.0  ;;  %v970_v33 = vadd.f32 %v969_v36, %v927_v0  ;;  %v1227_v60 = vmul.f32 %v1226_v13, %v3814_v54  ;;  %v785_v8 = vmul.f32 %v784_v9, %v3684_v21  ;;  %v2604_v13 = vld [vmem:[%s4425_s22] sm:$0xff]  ;;  %s3963_s28 = scalar_lea.vmem [#allocation11], %s2206_s3 }
 0x194   : > { %v3912_v4 = vmul.f32 %v1612_v50, %v3849_v59  ;;  %v743_v19 = vadd.f32 %v742_v14, %v700_v63  ;;  %v827_v22 = vstv %s2267_s30  ;;  %v1789_v27 = vstv %s2365_s25  ;;  %s4430_s25 = sld [smem:[#allocation103_spill]] }
 0x195   : > { %v1013_v34 = vadd.f32 %v1012_v3, %v970_v33  ;;  %v828_v46 = vmul.f32 %v827_v22, %v3692_v37  ;;  %v870_v38 = vstv %s2276_s27  ;;  %v913_v21 = vstv %s2285_s2  ;;  %s2011_s2 = sshll.u32 %s3963_s28, 4  ;;  %s4024_s2 = int_to_ptr.vmem [resolvable:$true] %s2011_s2 }
 0x196   : > { %v786_v39 = vadd.f32 %v785_v8, %v743_v19  ;;  %v871_v11 = vmul.f32 %v870_v38, %v3703_v53  ;;  %v914_v2 = vmul.f32 %v913_v21, %v3718_v41  ;;  %v956_v26 = vstv %s2294_s16  ;;  %s2375_s21 = sshll.u32 %s4428_s26, 9  ;;  %s4028_s16 = scalar_lea.sflag [#allocation4], %s474_s12 }
 0x197   : > { %v1056_v23 = vadd.f32 %v1055_v5, %v1013_v34  ;;  %v957_v45 = vmul.f32 %v956_v26, %v3730_v16  ;;  %v999_v55 = vstv %s2303_s15  ;;  %v1042_v47 = vstv %s2312_s13  ;;  %s2665_s15 = scalar_lea.vmem %s4024_s2, 512  ;;  %p4431_p9 = scmp.ne.s32.totalorder %s4429_s18, 0 }
 0x198   : > { %v829_v49 = vadd.f32 %v828_v46, %v786_v39  ;;  %v1000_v36 = vmul.f32 %v999_v55, %v3737_v42  ;;  %v1043_v18 = vmul.f32 %v1042_v47, %v3739_v58  ;;  %v1085_v61 = vstv %s2321_s1  ;;  %p2666_p1 = scmp.ne.s32.totalorder %s4024_s2, %s2665_s15  ;;  %s2777_s13 = smov [#allocation11]  }
 0x199   : > { %v1099_v62 = vadd.f32 %v1098_v25, %v1056_v23  ;;  %v1086_v41 = vmul.f32 %v1085_v61, %v3765_v44  ;;  %v1128_v50 = vstv %s2330_s10  ;;  %v1171_v3 = vstv %s2339_s7  ;;  %s2669_s1 = sshll.u32 %s2777_s13, 4  ;;  %s2670_s1 = int_to_ptr.vmem [resolvable:$false] %s2669_s1 }
 0x19a   : > { %v872_v31 = vadd.f32 %v871_v11, %v829_v49  ;;  %v1129_v16 = vmul.f32 %v1128_v50, %v3784_v6  ;;  %v1172_v33 = vmul.f32 %v1171_v3, %v3799_v7  ;;  %v1214_v42 = vstv %s2348_s17  ;;  %s4021_s27 = scalar_lea.hbm %s4430_s25, %s2375_s21  ;;  %p2667_p8 = pnand %p2666_p1, %p4431_p9 }
 0x19b   : > { %v1142_v52 = vadd.f32 %v1141_v56, %v1099_v62  ;;  %v1215_v58 = vmul.f32 %v1214_v42, %v3814_v54  ;;  %v1246_v12 = vstv %s1245_s6  ;;  %v3949_v54 = vld [vmem:[%s4425_s22] sm:$0xff]  ;;  %s2671_s10 = scalar_lea.vmem %s2670_s1, 1024  ;;  %p2672_p4 = scmp.lt.s32.totalorder %s4024_s2, %s2670_s1 }
 0x19c   : > { %v915_v37 = vadd.f32 %v914_v2, %v872_v31  ;;  %p2668_p12 = pneg %p2667_p8  ;;  %p2673_p10 = scmp.lt.s32.totalorder %s2671_s10, %s2665_s15 }
 0x19d   : > { %v1185_v51 = vadd.f32 %v1184_v24, %v1142_v52  ;;  %v4427_v24 = vmov 0.0  }
 0x19e   : > { %v958_v48 = vadd.f32 %v957_v45, %v915_v37  ;;  %p2674_p11 = por %p2673_p10, %p2672_p4 }
 0x19f   : > { %v1228_v32 = vadd.f32 %v1227_v60, %v1185_v51 }
 0x1a0   : > { %v1001_v53 = vadd.f32 %v1000_v36, %v958_v48  ;;  %p2675_p0 = pnand %p2674_p11, %p2668_p12 }
 0x1a1   : > { %v1790_v1 = vadd.f32 %v1789_v27, %v1228_v32 }
 0x1a2   : > { %v1044_v17 = vadd.f32 %v1043_v18, %v1001_v53 }
 0x1a3   : > { %v1791_v40 = vsel %vm3841_vm7, %v1790_v1, 0.0 }
 0x1a4   : > { %v3931_v29 = vmul.f32 %v1791_v40, %v3849_v59  ;;  %v1087_v0 = vadd.f32 %v1086_v41, %v1044_v17 }
 0x1a6   : > { %v1130_v20 = vadd.f32 %v1129_v16, %v1087_v0 }
 0x1a8   : > { %v1173_v5 = vadd.f32 %v1172_v33, %v1130_v20 }
 0x1aa   : > { %v1216_v43 = vadd.f32 %v1215_v58, %v1173_v5 }
 0x1ac   : > { %v1247_v57 = vadd.f32 %v1246_v12, %v1216_v43 }
 0x1ae   : > { %v1248_v44 = vsel %vm3841_vm7, %v1247_v57, 0.0  ;;  %v1327_v28 = vpop.f32.mrf.mxu0 }
 0x1af   : > { %v1331_v34 = vmul.f32 0.35355338, %v1327_v28  ;;  %v1333_v6 = vmul.f32 %v3849_v59, %v1248_v44 }
 0x1b0   : > { %v2396_v25 = vpop.f32.mrf.mxu0 }
 0x1b1   : > { %v1334_v7 = vadd.f32 %v1333_v6, %v1331_v34 }
 0x1b3   : > { %v1341_v30 = vsel %vm1340_vm8, -inf, %v1334_v7 }
 0x1b4   : > { %v1342_v23 = vsel %vm1255_vm2, %v1341_v30, -inf }
 0x1b5   : > { %1343 = vmax.xlane.f32.xlu1 %v1342_v23 }
 0x1c6   : > { %1440 = vrot.lane.b32.xlu1 %v3949_v54, %s2767_s23 }
 0x1ca   : > { %1437 = vrot.lane.b32.xlu1 %v3949_v54, %s2768_s4 }
 0x1ce   : > { %1616 = vrot.lane.b32.xlu1 %v3949_v54, %s2769_s24 }
 0x1d2   : > { %1795 = vrot.lane.b32.xlu1 %v3949_v54, %s2770_s9 }
 0x23e   : > { %v1344_v35 = vpop.xlane.xlu1 %1343 }
 0x23f   : > { %v1345_v59 = vsub.f32 %v1341_v30, %v1344_v35 }
 0x241   : > { %v1346_v56 = vmul.f32 1.442695, %v1345_v59 }
 0x242   : > { %v1441_v52 = vpop.permute.xlu1 %1440 }
 0x243   : > { %2588 = vpow2.f32 %v1346_v56 }
 0x246   : > { %v1438_v19 = vpop.permute.xlu1 %1437 }
 0x24a   : > { %v1617_v51 = vpop.permute.xlu1 %1616 }
 0x24e   : > { %v1796_v32 = vpop.permute.xlu1 %1795 }
 0x250   : > { %v2589_v63 = vpop.eup %2588 }
 0x251   : > { %v1348_v14 = vsel %vm1255_vm2, %v2589_v63, 0.0 }
 0x252   : > { %1349 = vadd.xlane.f32.xlu0 %v1348_v14 }
 0x268   : > { %1354 = vrot.lane.b32.xlu0 %v2604_v13, %s2771_s5 }
 0x26c   : > { %1619 = vrot.lane.b32.xlu0 %v3949_v54, %s2772_s8 }
 0x270   : > { %1798 = vrot.lane.b32.xlu0 %v3949_v54, %s2773_s0 }
 0x2db   : > { %v1350_v9 = vpop.xlane.xlu0 %1349 }
 0x2dc   : > { %2590 = vrcp.f32 %v1350_v9 }
 0x2df   : > { %v1355_v62 = vpop.permute.xlu0 %1354 }
 0x2e0   : > { %2398 = vmatpush3.msra.mxu1 %v1355_v62 }
 0x2e1   : > { %2402 = vmatprep.subr.mxu1 %v4427_v24 }
 0x2e3   : > { %v1620_v22 = vpop.permute.xlu0 %1619 }
 0x2e7   : > { %v1799_v27 = vpop.permute.xlu0 %1798 }
 0x2e9   : > { %v2591_v60 = vpop.eup %2590 }
 0x2ea   : > { %v1352_v8 = vmul.f32 %v2591_v60, %v2589_v63 }
 0x2ec   : > { %1353 = vst.msk [vmem:[%s3963_s28] sm:$0xff] %vm1255_vm2, %v1352_v8  ;;  %2400 = vmatmul.mubr.msk.f32.vlgmr.msra.gmra.mxu1 %vm1255_vm2, %v1352_v8 }
 0x2ed   : > { %2403 = vmatpush3.xpose.msk.msra.mxu1 %vm1255_vm2, %v1441_v52  ;;  %2404 = vmatprep.mubr.msk.f32.mxu1 %vm2764_vm0, %v4427_v24 }
 0x2ee   : > { %2412 = vmatprep.subr.mxu1 %v4427_v24 }
 0x2f0   : > { %2405 = vmatmul.mubr.msk.f32.vlgmr.msra.gmra.mxu1 %vm1255_vm2, %v1438_v19 }
 0x2f1   : > { %2413 = vmatpush3.xpose.msk.msra.mxu1 %vm1255_vm2, %v1620_v22  ;;  %2414 = vmatprep.mubr.msk.f32.mxu1 %vm2764_vm0, %v4427_v24 }
 0x2f2   : > { %2422 = vmatprep.subr.mxu1 %v4427_v24 }
 0x2f4   : > { %2415 = vmatmul.mubr.msk.f32.vlgmr.msra.gmra.mxu1 %vm1255_vm2, %v1617_v51 }
 0x2f5   : > { %2423 = vmatpush3.xpose.msk.msra.mxu1 %vm1255_vm2, %v1799_v27  ;;  %2424 = vmatprep.mubr.msk.f32.mxu1 %vm2764_vm0, %v4427_v24 }
 0x2f8   : > { %2425 = vmatmul.mubr.msk.f32.vlgmr.msra.gmra.mxu1 %vm1255_vm2, %v1796_v32 }
 0x3ac   : > { %v3982_v39 = vpop.f32.mrf.mxu1 }
 0x3ae   : > { %v2401_v46 = vpop.f32.mrf.mxu1 }
 0x3b0   : > { %v1512_v38 = vpop.f32.mrf.mxu1 }
 0x3b1   : > { %v1516_v1 = vmul.f32 0.35355338, %v1512_v38 }
 0x3b2   : > { %v2406_v40 = vpop.f32.mrf.mxu1 }
 0x3b3   : > { %v1518_v49 = vadd.f32 %v3869_v15, %v1516_v1 }
 0x3b4   : > { %v1691_v11 = vpop.f32.mrf.mxu1 }
 0x3b5   : > { %v1695_v21 = vmul.f32 0.35355338, %v1691_v11  ;;  %v1519_v31 = vsel %vm1340_vm8, -inf, %v1518_v49 }
 0x3b6   : > { %v2416_v2 = vpop.f32.mrf.mxu1  ;;  %v1520_v26 = vsel %vm1255_vm2, %v1519_v31, -inf }
 0x3b7   : > { %v1697_v37 = vadd.f32 %v3912_v4, %v1695_v21  ;;  %1521 = vmax.xlane.f32.xlu0 %v1520_v26 }
 0x3b8   : > { %v1870_v45 = vpop.f32.mrf.mxu1 }
 0x3b9   : > { %v1874_v55 = vmul.f32 0.35355338, %v1870_v45  ;;  %v1698_v48 = vsel %vm1340_vm8, -inf, %v1697_v37 }
 0x3ba   : > { %v2426_v36 = vpop.f32.mrf.mxu1  ;;  %v1699_v47 = vsel %vm1255_vm2, %v1698_v48, -inf }
 0x3bb   : > { %v1876_v15 = vadd.f32 %v3931_v29, %v1874_v55  ;;  %1700 = vmax.xlane.f32.xlu1 %v1699_v47 }
 0x3bd   : > { %v1877_v53 = vsel %vm1340_vm8, -inf, %v1876_v15 }
 0x3be   : > { %v1878_v18 = vsel %vm1255_vm2, %v1877_v53, -inf }
 0x3bf   : > { %1879 = vmax.xlane.f32.xlu0 %v1878_v18 }
 0x3cc   : > { %1533 = vrot.lane.b32.xlu1 %v3949_v54, %s2774_s29 }
 0x440   : > { %v1522_v4 = vpop.xlane.xlu0 %1521 }
 0x441   : > { %v1523_v61 = vsub.f32 %v1519_v31, %v1522_v4 }
 0x443   : > { %v1524_v17 = vmul.f32 1.442695, %v1523_v61 }
 0x444   : > { %v1701_v41 = vpop.xlane.xlu1 %1700 }
 0x445   : > { %2592 = vpow2.f32 %v1524_v17  ;;  %v1702_v50 = vsub.f32 %v1698_v48, %v1701_v41 }
 0x447   : > { %v1703_v0 = vmul.f32 1.442695, %v1702_v50 }
 0x448   : > { %v1880_v16 = vpop.xlane.xlu0 %1879  ;;  %v1534_v3 = vpop.permute.xlu1 %1533 }
 0x449   : > { %2594 = vpow2.f32 %v1703_v0  ;;  %v1881_v29 = vsub.f32 %v1877_v53, %v1880_v16  ;;  %2408 = vmatpush3.msra.mxu0 %v1534_v3 }
 0x44a   : > { %2417 = vmatprep.subr.mxu0 %v4427_v24 }
 0x44b   : > { %v1882_v10 = vmul.f32 1.442695, %v1881_v29 }
 0x44d   : > { %2596 = vpow2.f32 %v1882_v10 }
 0x452   : > { %v2593_v20 = vpop.eup %2592 }
 0x453   : > { %v1526_v33 = vsel %vm1255_vm2, %v2593_v20, 0.0 }
 0x454   : > { %1527 = vadd.xlane.f32.xlu0 %v1526_v33 }
 0x456   : > { %v2595_v42 = vpop.eup %2594 }
 0x457   : > { %v1705_v5 = vsel %vm1255_vm2, %v2595_v42, 0.0 }
 0x458   : > { %1706 = vadd.xlane.f32.xlu1 %v1705_v5 }
 0x45a   : > { %v2597_v58 = vpop.eup %2596 }
 0x45b   : > { %v1884_v43 = vsel %vm1255_vm2, %v2597_v58, 0.0 }
 0x45c   : > { %1885 = vadd.xlane.f32.xlu0 %v1884_v43 }
 0x469   : > { %1891 = vrot.lane.b32.xlu1 %v3949_v54, %s2775_s20 }
 0x472   : > { %1712 = vrot.lane.b32.xlu0 %v3949_v54, %s2776_s19 }
 0x4dd   : > { %v1528_v12 = vpop.xlane.xlu0 %1527 }
 0x4de   : > { %2598 = vrcp.f32 %v1528_v12 }
 0x4e1   : > { %v1707_v57 = vpop.xlane.xlu1 %1706 }
 0x4e2   : > { %2600 = vrcp.f32 %v1707_v57 }
 0x4e5   : > { %v1886_v44 = vpop.xlane.xlu0 %1885  ;;  %v1892_v7 = vpop.permute.xlu1 %1891 }
 0x4e6   : > { %2602 = vrcp.f32 %v1886_v44 }
 0x4e9   : > { %v1713_v34 = vpop.permute.xlu0 %1712 }
 0x4eb   : > { %v2599_v28 = vpop.eup %2598 }
 0x4ec   : > { %v1530_v6 = vmul.f32 %v2599_v28, %v2593_v20 }
 0x4ee   : > { %2358 = vst.msk [vmem:[%s3963_s28 + $0x8] sm:$0xff] %vm1255_vm2, %v1530_v6  ;;  %2410 = vmatmul.mubr.msk.f32.vlgmr.msra.gmra.mxu0 %vm1255_vm2, %v1530_v6 }
 0x4ef   : > { %v2601_v25 = vpop.eup %2600  ;;  %2418 = vmatpush3.msra.mxu0 %v1713_v34  ;;  %2419 = vmatprep.mubr.msk.f32.mxu0 %vm2764_vm0, %v4427_v24 }
 0x4f0   : > { %2427 = vmatprep.subr.mxu0 %v4427_v24  ;;  %v1709_v30 = vmul.f32 %v2601_v25, %v2595_v42 }
 0x4f2   : > { %2363 = vst.msk [vmem:[%s3963_s28 + $0x10] sm:$0xff] %vm1255_vm2, %v1709_v30  ;;  %2420 = vmatmul.mubr.msk.f32.vlgmr.msra.gmra.mxu0 %vm1255_vm2, %v1709_v30 }
 0x4f3   : > { %v2603_v23 = vpop.eup %2602  ;;  %2428 = vmatpush3.msra.mxu0 %v1892_v7  ;;  %2429 = vmatprep.mubr.msk.f32.mxu0 %vm2764_vm0, %v4427_v24 }
 0x4f4   : > { %v1888_v54 = vmul.f32 %v2603_v23, %v2597_v58 }
 0x4f6   : > { %2368 = vst.msk [vmem:[%s3963_s28 + $0x18] sm:$0xff] %vm1255_vm2, %v1888_v54  ;;  %2430 = vmatmul.mubr.msk.f32.vlgmr.msra.gmra.mxu0 %vm1255_vm2, %v1888_v54 }
 0x5ae   : > { %v1605_v35 = vpop.f32.mrf.mxu0 }
 0x5af   : > { %2678 = shalt.err (!%p2675_p0)
}
 0x5b0   : > { %s2679_s7 = scalar_lea.hbm %s4021_s27, 512  ;;  %s2683_s22 = scalar_lea.hbm %s4430_s25, 1024 }
 0x5b1   : > { %p2680_p2 = scmp.ne.s32.totalorder %s4021_s27, %s2679_s7  ;;  %p2684_p6 = scmp.lt.s32.totalorder %s4021_s27, %s4430_s25 }
 0x5b2   : > { %p2685_p7 = scmp.lt.s32.totalorder %s2683_s22, %s2679_s7 }
 0x5b3   : > { %p2681_p3 = pnand %p2680_p2, %p4431_p9 }
 0x5b4   : > { %p2686_p13 = por %p2685_p7, %p2684_p6 }
 0x5b5   : > { %p2682_p5 = pneg %p2681_p3 }
 0x5b7   : > { %p2687_p1 = pnand %p2686_p13, %p2682_p5 }
 0x5b9   : > { %2690 = shalt.err (!%p2687_p1)
}
 0x5ba   : > { %s2778_s24 = smov 128   ;;  %s2779_s9 = smov 8   ;;  %v2411_v59 = vpop.f32.mrf.mxu0  ;;  %vm1980_vm9 = vcmask 130048   ;;  %vm1982_vm10 = vcmask 195584   ;;  %vm1984_vm11 = vcmask 261120  }
 0x5bb   : > { %2448 = dma.vmem_to_hbm [thread:$0]  (%p4431_p9), %s4024_s2, 512, %s4021_s27, %s4028_s16, %s2778_s24, %s2778_s24, %s2779_s9  }
 0x5bc   : > { %s4432_s11 = sld [smem:[#allocation26_spill]]  ;;  %1968 = vrot.lane.b32.xlu1 %v1605_v35, %s2779_s9  ;;  %v1784_v56 = vpop.f32.mrf.mxu0  ;;  %s2780_s5 = smov 16  }
 0x5bd   : > { %1972 = vrot.lane.b32.xlu0 %v1784_v56, %s2780_s5  ;;  %s2781_s8 = smov 24   ;;  %s4433_s3 = sld [smem:[#allocation102_spill]] }
 0x5be   : > { %v2421_v63 = vpop.f32.mrf.mxu0 }
 0x5c0   : > { %v1963_v14 = vpop.f32.mrf.mxu0 }
 0x5c1   : > { %1976 = vrot.lane.b32.xlu1 %v1963_v14, %s2781_s8 }
 0x5c2   : > { %v2431_v13 = vpop.f32.mrf.mxu0 }
 0x5c3   : > { %s501_s28 = scalar_lea.vmem %s4433_s3, %s4432_s11 }
 0x62e   : > { %v1969_v9 = vpop.permute.xlu1 %1968 }
 0x62f   : > { %v1973_v62 = vpop.permute.xlu0 %1972  ;;  %v1979_v24 = vsel %vm1255_vm2, %v3982_v39, %v1969_v9 }
 0x630   : > { %v1981_v52 = vsel %vm1980_vm9, %v1979_v24, %v1973_v62 }
 0x633   : > { %v1977_v60 = vpop.permute.xlu1 %1976 }
 0x634   : > { %v1983_v19 = vsel %vm1982_vm10, %v1981_v52, %v1977_v60 }
 0x635   : > { %1985 = vst.msk [vmem:[%s501_s28] sm:$0xff] %vm1984_vm11, %v1983_v19 }
 0x636 PF: > { %s4434_s29 = sld [smem:[#allocation21_spill]] }
 0x637   : > { %s4435_s20 = sld [smem:[#allocation16_spill]] }
 0x638   : > { %s4436_s19 = sld [smem:[#allocation24_spill]] }
 0x63c   : > { %p2475_p9 = scmp.ge.s32.totalorder %s4434_s29, 2 }
 0x63d   : > { %s2036_s26 = sand.u32 1, %s4435_s20  }
 0x63e   : > { %p4437_p8 = scmp.ne.s32.totalorder %s4436_s19, 0  ;;  %s2037_s18 = scalar_lea.sflag [#allocation4], %s2036_s26 }
 0x640   : > { %p2464_p12 = pnand %p2475_p9, %p4437_p8 }
 0x642   : > { %p2465_p4 = pneg %p2464_p12 }
 0x644   : > { %2728 = dma.done.wait (%p2465_p4), %s2037_s18, 512  }
 0x645   : > { %2730 = vsyncadd (%p2465_p4), %s2037_s18, 4294966784  ;;  %s28_s20 = sadd.s32 1, %s4434_s29   ;;  %s4438_s15 = sld [smem:[#allocation17_spill]] }
 0x646   : > { %p25_p10 = scmp.ge.s32.totalorder %s28_s20, 4   ;;  %s4439_s16 = sld [smem:[#allocation18_spill]] }
 0x647   : > { %s4440_s17 = sld [smem:[#allocation25_spill]] }
 0x648   : > { %s4441_s18 = sld [smem:[#allocation20_spill]]  ;;  %27 = sbr.rel (!%p25_p10) target bundleno = 19 (0x13), region = 133 }
 0x649   : > { %s4442_s19 = sld [smem:[#allocation22_spill]] }
 0x64d   :  { %2042 = vsyncpa [#allocation4], 1 }
 0x64e   :  { %2044 = vsyncpa [#allocation4 + $0x1], 1 }
 0x64f   :  { %2045 = vsyncpa [#allocation5], 1 }
 0x650   :  { %2047 = vsyncpa [#allocation5 + $0x1], 1 }
 0x651   :  { %2048 = vsyncpa [#allocation7], 1 }
 0x652   :  { %2049 = vsyncpa [#allocation10], 1 }

</bundles_post_ra>
